<compile_context>
chip_gen: v7x
topology: tpu7x:2x2x1
jax: 0.10.0
libtpu: 0.0.40
codegen_flags: <defaults>
</compile_context>

<pallas_src>
import functools

import jax
import jax.numpy as jnp
from jax import lax
from jax.experimental import pallas as pl
from jax.experimental.pallas import tpu as pltpu


def _default_ew_dtype():
    """bf16 elementwise on chips with bf16 VALUs (v6e/v7x); f32 elsewhere (v5e-)."""
    try:
        kind = jax.devices()[0].device_kind.lower()
    except Exception:
        return jnp.float32
    if "v6" in kind or "v7" in kind:
        return jnp.bfloat16
    return jnp.float32


# ---------------- Pallas kernels ----------------

def pattern_mlp_kernel(h_ref, r_ref, t_ref,
                       w1_ref, b1_ref, w2_ref, b2_ref,
                       w3_ref, b3_ref, w4_ref, b4_ref,
                       o_ref, *, ew_dtype, mm_dtype):
    """PatternLearner encoder, transposed: channels on sublanes, positions on lanes.

    h/r/t blocks are (1, TM) position rows (bf16 in HBM); intermediates are
    (128, TM), (64, TM), (32, TM); output block is (1, TM) f32 — all lane-dense.
    """
    h = h_ref[...].astype(ew_dtype)       # (1, TM)
    r = r_ref[...].astype(ew_dtype)
    t = t_ref[...].astype(ew_dtype)
    w1 = w1_ref[...]                      # (128, 3) pre-cast: cols = [head, rel, tail]

    # conv1 (1x3): K=3 contraction as a broadcast FMA on the VPU (bf16 on v6e/v7x).
    x = w1[:, 0:1] * h + w1[:, 1:2] * r + w1[:, 2:3] * t + b1_ref[...]   # (128, TM)
    x = jnp.maximum(x, 0.0)                                              # relu1
    # conv2 / conv3 / conv4 (1x1) = channel matmuls on the MXU, bf16 operands.
    x = jnp.dot(w2_ref[...], x.astype(mm_dtype),
                preferred_element_type=ew_dtype) + b2_ref[...]           # (64, TM)
    x = jnp.maximum(x, 0.0)                                              # relu2
    x = jnp.dot(w3_ref[...], x.astype(mm_dtype),
                preferred_element_type=ew_dtype) + b3_ref[...]           # (32, TM)
    x = jnp.maximum(x, 0.0)                                              # relu3
    o_ref[...] = (jnp.dot(w4_ref[...], x.astype(mm_dtype),
                          preferred_element_type=jnp.float32)
                  + b4_ref[...])                                         # (1, TM) f32


def fused_score_kernel(e1_ref, e2_ref, relq_ref, rq_ref, rpos_ref, rneg_ref,
                       o_ref, *, gamma):
    """Fused EmbeddingLearner + 2x PatternMatcher over a (TB, T, D) batch tile:
       score = -||e1 + rel_q - e2|| + gamma * (-||relq - rel_pos|| + ||relq - rel_neg||).
    Output block is lane-dense (TB, T)."""
    rq = rq_ref[...]            # (TB, 1, D) per-task vectors
    rpos = rpos_ref[...]
    rneg = rneg_ref[...]

    d = e1_ref[...] + rq - e2_ref[...]               # (TB, T, D)
    relq = relq_ref[...]
    dp = relq - rpos
    dn = relq - rneg

    emb = jnp.sqrt(jnp.sum(d * d, axis=-1))          # (TB, T)  lane-dense
    scp = jnp.sqrt(jnp.sum(dp * dp, axis=-1))
    scn = jnp.sqrt(jnp.sum(dn * dn, axis=-1))
    o_ref[...] = -(emb + gamma * (scp - scn))


def grad_meta_kernel(hp_ref, tp_ref, hn_ref, tn_ref, r_ref, g_ref, *,
                     margin, inv_count, eps):
    """Analytic d(MarginRankingLoss)/d(rel_pos) for a tile of tasks.

    Note: diverges from autograd only on measure-zero sets (rsqrt(ss+eps) vs
    exact 1/sqrt at zero distance; strict '>0' hinge vs max(0,.) subgradient)."""
    r = r_ref[...]                                   # (TB, 1, D)
    dp = hp_ref[...] + r - tp_ref[...]               # (TB, F, D)
    dn = hn_ref[...] + r - tn_ref[...]
    ssp = jnp.sum(dp * dp, axis=-1, keepdims=True)   # (TB, F, 1)
    ssn = jnp.sum(dn * dn, axis=-1, keepdims=True)
    inv_p = lax.rsqrt(ssp + eps)                     # eps-guarded (no NaN at 0)
    inv_n = lax.rsqrt(ssn + eps)
    norm_p = ssp * inv_p                             # ~= sqrt(ssp)
    norm_n = ssn * inv_n
    # hinge max(0, margin - (p - n)) with p = -norm_p, n = -norm_n
    active = (margin + norm_p - norm_n) > 0.0
    contrib = jnp.where(active, dp * inv_p - dn * inv_n, 0.0)
    g_ref[...] = jnp.sum(contrib, axis=1, keepdims=True) * inv_count   # (TB,1,D)


# ---------------- pallas_call wrappers ----------------

def pattern_learner_call(head, rel, tail, params, *, tm=8192,
                         mm_dtype=jnp.bfloat16, ew_dtype=None):
    """head/rel/tail: (1, M) flattened (b, t, d) position rows -> (M,) f32 outputs.

    mm_dtype: MXU operand dtype (bf16 default, ~2x MXU density on all gens).
    ew_dtype: VPU elementwise dtype (auto: bf16 on v6e/v7x, f32 on v5e-)."""
    if ew_dtype is None:
        ew_dtype = _default_ew_dtype()
    w1, b1, w2, b2, w3, b3, w4, b4 = params
    # Hoist weight/bias casts out of the kernel (once per call, not per grid step).
    w1c = w1.astype(ew_dtype)
    b1c = b1.astype(ew_dtype)
    w2c = w2.astype(mm_dtype)
    b2c = b2.astype(ew_dtype)
    w3c = w3.astype(mm_dtype)
    b3c = b3.astype(ew_dtype)
    w4c = w4.astype(mm_dtype)
    b4c = b4.astype(jnp.float32)

    m = head.shape[1]
    tm_eff = min(tm, m)
    if m > 128:
        # keep >=2 grid steps so v7x's second TensorCore gets work
        tm_eff = min(tm_eff, ((m + 255) // 256) * 128)
    tm_eff = max(128, ((tm_eff + 127) // 128) * 128)
    m_pad = pl.cdiv(m, tm_eff) * tm_eff
    if m_pad != m:
        pad = ((0, 0), (0, m_pad - m))
        head = jnp.pad(head, pad)
        rel = jnp.pad(rel, pad)
        tail = jnp.pad(tail, pad)

    row_spec = pl.BlockSpec((1, tm_eff), lambda i: (0, i))

    def w_spec(a):
        return pl.BlockSpec(a.shape, lambda i: (0, 0))

    kern = functools.partial(pattern_mlp_kernel, ew_dtype=ew_dtype, mm_dtype=mm_dtype)
    out = pl.pallas_call(
        kern,
        out_shape=jax.ShapeDtypeStruct((1, m_pad), jnp.float32),
        grid=(m_pad // tm_eff,),
        in_specs=[row_spec, row_spec, row_spec,
                  w_spec(w1c), w_spec(b1c), w_spec(w2c), w_spec(b2c),
                  w_spec(w3c), w_spec(b3c), w_spec(w4c), w_spec(b4c)],
        out_specs=row_spec,
        compiler_params=pltpu.CompilerParams(
            dimension_semantics=("parallel",),
            vmem_limit_bytes=32 * 1024 * 1024),
    )(head, rel, tail, w1c, b1c, w2c, b2c, w3c, b3c, w4c, b4c)
    return out[0, :m]


def fused_scores(e1, e2, rel_query, rel_q, rel_pos, rel_neg, gamma, *, tb=32):
    """e1/e2/rel_query: (B, T, D); rel_*: (B, D) -> combined scores (B, T)."""
    B, T, D = e1.shape
    tb_eff = min(tb, B)
    if 16 <= B <= tb_eff:               # keep >=2 grid steps for v7x's second TC
        tb_eff = max(8, ((B // 2 + 7) // 8) * 8)
    kern = functools.partial(fused_score_kernel, gamma=float(gamma))
    row3 = pl.BlockSpec((tb_eff, T, D), lambda i: (i, 0, 0))
    vec3 = pl.BlockSpec((tb_eff, 1, D), lambda i: (i, 0, 0))
    out = pl.pallas_call(
        kern,
        out_shape=jax.ShapeDtypeStruct((B, T), jnp.float32),
        grid=(pl.cdiv(B, tb_eff),),
        in_specs=[row3, row3, row3, vec3, vec3, vec3],
        out_specs=pl.BlockSpec((tb_eff, T), lambda i: (i, 0)),
        compiler_params=pltpu.CompilerParams(
            dimension_semantics=("parallel",),
            vmem_limit_bytes=32 * 1024 * 1024),
    )(e1, e2, rel_query,
      rel_q.reshape(B, 1, D), rel_pos.reshape(B, 1, D), rel_neg.reshape(B, 1, D))
    return out                                          # (B, T)


def grad_meta_call(hp, tp, hn, tn, rel_pos, margin, *, tb=128):
    """Grad of mean margin-ranking loss w.r.t. rel_pos. Inputs (B,F,D), (B,D)."""
    B, F, D = hp.shape
    tb_eff = min(tb, B)
    if 16 <= B <= tb_eff:               # keep >=2 grid steps for v7x's second TC
        tb_eff = max(8, ((B // 2 + 7) // 8) * 8)
    r = rel_pos.reshape(B, 1, D)
    kern = functools.partial(grad_meta_kernel, margin=float(margin),
                             inv_count=1.0 / float(B * F), eps=1e-12)
    big = pl.BlockSpec((tb_eff, F, D), lambda i: (i, 0, 0))
    vec = pl.BlockSpec((tb_eff, 1, D), lambda i: (i, 0, 0))
    out = pl.pallas_call(
        kern,
        out_shape=jax.ShapeDtypeStruct((B, 1, D), jnp.float32),
        grid=(pl.cdiv(B, tb_eff),),
        in_specs=[big, big, big, big, vec],
        out_specs=vec,
        compiler_params=pltpu.CompilerParams(
            dimension_semantics=("parallel",),
            vmem_limit_bytes=32 * 1024 * 1024),
    )(hp, tp, hn, tn, r)
    return out.reshape(B, D)


# ---------------- MetaR forward (training path: iseval=False, abla=False) ----

def metar_forward(params, support, support_negative, query, negative, *,
                  beta, gamma, margin):
    B, few, _, D = support.shape
    num_sn = support_negative.shape[1]
    num_q = query.shape[1]
    num_n = negative.shape[1]
    if num_sn != few:
        raise ValueError("margin-ranking grad assumes num_sn == few")

    # get_relation(support.unsqueeze(2), mean=True): mean over few of (tail-head)
    pos_relation = jnp.mean(support[:, :, 1, :] - support[:, :, 0, :], axis=1)  # (B,D)

    # One fused PatternLearner pass over support / support_neg / query / negative.
    in_dt = jnp.bfloat16        # halves HBM traffic feeding the pattern kernel
    heads = jnp.concatenate([support[:, :, 0, :], support_negative[:, :, 0, :],
                             query[:, :, 0, :], negative[:, :, 0, :]],
                            axis=1).astype(in_dt)
    tails = jnp.concatenate([support[:, :, 1, :], support_negative[:, :, 1, :],
                             query[:, :, 1, :], negative[:, :, 1, :]],
                            axis=1).astype(in_dt)
    t_all = few + num_sn + num_q + num_n
    # TODO(synk): a (B, t_tiles) pattern grid with a per-batch (1, D) rel block would
    # remove this broadcast materialization entirely; kept (in bf16, half the bytes)
    # because the in-kernel (1,D)->(1,TM) lane tiling needs a relayout Mosaic may reject.
    rels = jnp.broadcast_to(pos_relation.astype(in_dt)[:, None, :], (B, t_all, D))

    pat = pattern_learner_call(heads.reshape(1, -1), rels.reshape(1, -1),
                               tails.reshape(1, -1), params)
    pat = pat.reshape(B, t_all, D)
    rel_pos = jnp.mean(pat[:, :few], axis=1)                        # (B, D)
    rel_neg = jnp.mean(pat[:, few:few + num_sn], axis=1)            # (B, D)
    rel_query = pat[:, few + num_sn:]                               # (B, nq+nn, D)

    # One-step gradient update of rel_pos through support margin-ranking loss.
    gmeta = grad_meta_call(support[:, :, 0, :], support[:, :, 1, :],
                           support_negative[:, :, 0, :], support_negative[:, :, 1, :],
                           rel_pos, margin)
    rel_q = rel_pos - beta * gmeta                                  # (B, D)

    # Fused EmbeddingLearner + PatternMatcher scores over query + negative.
    # TODO(synk): e1/e2 are still wrapper-side slice+concat copies; folding the
    # [:, :, 0/1, :] split into the score kernel needs integer indexing on a tiled
    # ref dim, deferred for lowering safety.
    e1 = jnp.concatenate([query[:, :, 0, :], negative[:, :, 0, :]], axis=1)
    e2 = jnp.concatenate([query[:, :, 1, :], negative[:, :, 1, :]], axis=1)
    scores = fused_scores(e1, e2, rel_query, rel_q, rel_pos, rel_neg, gamma)

    return scores[:, :num_q], scores[:, num_q:]


# ---------------- pure-JAX reference (for correctness check) ----------------

def reference_forward(params, support, support_negative, query, negative, *,
                      beta, gamma, margin):
    w1, b1, w2, b2, w3, b3, w4, b4 = params
    B, few, _, D = support.shape
    num_q = query.shape[1]
    pos_relation = jnp.mean(support[:, :, 1, :] - support[:, :, 0, :], axis=1)

    def pattern(pairs):
        T = pairs.shape[1]
        rel = jnp.broadcast_to(pos_relation[:, None, :], (B, T, D))
        x = jnp.stack([pairs[:, :, 0, :], rel, pairs[:, :, 1, :]], axis=-1)  # (B,T,D,3)
        h = jax.nn.relu(jnp.einsum('btdk,ck->btdc', x, w1) + b1[:, 0])
        h = jax.nn.relu(jnp.einsum('btdc,ec->btde', h, w2) + b2[:, 0])
        h = jax.nn.relu(jnp.einsum('btde,fe->btdf', h, w3) + b3[:, 0])
        return jnp.einsum('btdf,of->btdo', h, w4)[..., 0] + b4[0, 0]         # (B,T,D)

    rel_pos = jnp.mean(pattern(support), axis=1)
    rel_neg = jnp.mean(pattern(support_negative), axis=1)
    rel_query = jnp.concatenate([pattern(query), pattern(negative)], axis=1)

    def loss_fn(r):
        rb = r[:, None, :]
        p = -jnp.sqrt(jnp.sum((support[:, :, 0, :] + rb - support[:, :, 1, :]) ** 2, -1))
        n = -jnp.sqrt(jnp.sum((support_negative[:, :, 0, :] + rb
                               - support_negative[:, :, 1, :]) ** 2, -1))
        return jnp.mean(jnp.maximum(0.0, margin - (p - n)))

    rel_q = rel_pos - beta * jax.grad(loss_fn)(rel_pos)

    e1 = jnp.concatenate([query[:, :, 0, :], negative[:, :, 0, :]], axis=1)
    e2 = jnp.concatenate([query[:, :, 1, :], negative[:, :, 1, :]], axis=1)
    emb = -jnp.sqrt(jnp.sum((e1 + rel_q[:, None, :] - e2) ** 2, -1))
    sc_pos = -jnp.sqrt(jnp.sum((rel_query - rel_pos[:, None, :]) ** 2, -1))
    sc_neg = -jnp.sqrt(jnp.sum((rel_query - rel_neg[:, None, :]) ** 2, -1))
    p_score = emb[:, :num_q] + gamma * (sc_pos[:, :num_q] - sc_neg[:, :num_q])
    n_score = emb[:, num_q:] + gamma * (sc_pos[:, num_q:] - sc_neg[:, num_q:])
    return p_score, n_score


# ---------------- deterministic parameter init (PatternLearner convs) --------

def init_pattern_params(key):
    ks = jax.random.split(key, 8)

    def kaiming(k, shape, fan_in):
        return jax.random.normal(k, shape, jnp.float32) * jnp.sqrt(2.0 / fan_in)

    def bias(k, shape, fan_in):
        bound = 1.0 / jnp.sqrt(fan_in)
        return jax.random.uniform(k, shape, jnp.float32, -bound, bound)

    # Conv2d weights laid out for the transposed GEMM chain: (out_ch, in).
    w1 = kaiming(ks[0], (128, 3), 3.0)      # conv1: Conv2d(1, 128, (1, 3))
    b1 = bias(ks[1], (128, 1), 3.0)
    w2 = kaiming(ks[2], (64, 128), 128.0)   # conv2: Conv2d(128, 64, (1, 1))
    b2 = bias(ks[3], (64, 1), 128.0)
    w3 = kaiming(ks[4], (32, 64), 64.0)     # conv3: Conv2d(64, 32, (1, 1))
    b3 = bias(ks[5], (32, 1), 64.0)
    w4 = kaiming(ks[6], (1, 32), 32.0)      # conv4: Conv2d(32, 1, (1, 1))
    b4 = bias(ks[7], (1, 1), 32.0)
    return (w1, b1, w2, b2, w3, b3, w4, b4)


if __name__ == "__main__":
    key = jax.random.PRNGKey(0)
    kp, ks, ksn, kq, kn = jax.random.split(key, 5)
    B, few, num_q, num_n, D = 2, 4, 4, 8, 32       # num_sn == few (margin loss)
    beta, gamma, margin = 5.0, 0.1, 1.0

    params = init_pattern_params(kp)
    support = jax.random.normal(ks, (B, few, 2, D), jnp.float32)
    support_negative = jax.random.normal(ksn, (B, few, 2, D), jnp.float32)
    query = jax.random.normal(kq, (B, num_q, 2, D), jnp.float32)
    negative = jax.random.normal(kn, (B, num_n, 2, D), jnp.float32)

    fwd = jax.jit(metar_forward, static_argnames=("beta", "gamma", "margin"))
    p_score, n_score = fwd(params, support, support_negative, query, negative,
                           beta=beta, gamma=gamma, margin=margin)
    jax.block_until_ready((p_score, n_score))

    p_ref, n_ref = reference_forward(params, support, support_negative, query,
                                     negative, beta=beta, gamma=gamma, margin=margin)
    assert p_score.shape == (B, num_q) and n_score.shape == (B, num_n)
    # Tolerance loosened vs. the f32 kernel: the pattern path now runs with bf16
    # inputs / MXU operands (and bf16 elementwise on v6e/v7x).
    assert jnp.allclose(p_score, p_ref, atol=1e-1, rtol=3e-2)
    assert jnp.allclose(n_score, n_ref, atol=1e-1, rtol=3e-2)
    print("KERNEL_OK")
</pallas_src>

<mosaic_0001>
module attributes {stable_mosaic.version = 11 : i64} {
  func.func @pattern_mlp_kernel(%arg0: i32, %arg1: memref<1x640xbf16, #tpu.memory_space<vmem>>, %arg2: memref<1x640xbf16, #tpu.memory_space<vmem>>, %arg3: memref<1x640xbf16, #tpu.memory_space<vmem>>, %arg4: memref<128x3xf32, #tpu.memory_space<vmem>>, %arg5: memref<128x1xf32, #tpu.memory_space<vmem>>, %arg6: memref<64x128xbf16, #tpu.memory_space<vmem>>, %arg7: memref<64x1xf32, #tpu.memory_space<vmem>>, %arg8: memref<32x64xbf16, #tpu.memory_space<vmem>>, %arg9: memref<32x1xf32, #tpu.memory_space<vmem>>, %arg10: memref<1x32xbf16, #tpu.memory_space<vmem>>, %arg11: memref<1x1xf32, #tpu.memory_space<vmem>>, %arg12: memref<1x640xf32, #tpu.memory_space<vmem>>) attributes {dimension_semantics = [#tpu.dimension_semantics<parallel>], iteration_bounds = array<i64: 2>, scalar_prefetch = 0 : i64, scratch_operands = 0 : i64, tpu.core_type = #tpu.core_type<tc>, window_params = [{transform_indices = @transform_0, window_bounds = array<i64: 1, 640>}, {transform_indices = @transform_1, window_bounds = array<i64: 1, 640>}, {transform_indices = @transform_2, window_bounds = array<i64: 1, 640>}, {pipeline_mode = #tpu.pipeline_mode<synchronous>, transform_indices = @transform_3, window_bounds = array<i64: 128, 3>}, {pipeline_mode = #tpu.pipeline_mode<synchronous>, transform_indices = @transform_4, window_bounds = array<i64: 128, 1>}, {pipeline_mode = #tpu.pipeline_mode<synchronous>, transform_indices = @transform_5, window_bounds = array<i64: 64, 128>}, {pipeline_mode = #tpu.pipeline_mode<synchronous>, transform_indices = @transform_6, window_bounds = array<i64: 64, 1>}, {pipeline_mode = #tpu.pipeline_mode<synchronous>, transform_indices = @transform_7, window_bounds = array<i64: 32, 64>}, {pipeline_mode = #tpu.pipeline_mode<synchronous>, transform_indices = @transform_8, window_bounds = array<i64: 32, 1>}, {pipeline_mode = #tpu.pipeline_mode<synchronous>, transform_indices = @transform_9, window_bounds = array<i64: 1, 32>}, {pipeline_mode = #tpu.pipeline_mode<synchronous>, transform_indices = @transform_10, window_bounds = array<i64: 1, 1>}, {transform_indices = @transform_11, window_bounds = array<i64: 1, 640>}]} {
    %c0 = arith.constant 0 : index
    %c0_0 = arith.constant 0 : index
    %0 = vector.load %arg1[%c0, %c0_0] : memref<1x640xbf16, #tpu.memory_space<vmem>>, vector<1x640xbf16>
    %1 = arith.extf %0 : vector<1x640xbf16> to vector<1x640xf32>
    %c0_1 = arith.constant 0 : index
    %c0_2 = arith.constant 0 : index
    %2 = vector.load %arg2[%c0_1, %c0_2] : memref<1x640xbf16, #tpu.memory_space<vmem>>, vector<1x640xbf16>
    %3 = arith.extf %2 : vector<1x640xbf16> to vector<1x640xf32>
    %c0_3 = arith.constant 0 : index
    %c0_4 = arith.constant 0 : index
    %4 = vector.load %arg3[%c0_3, %c0_4] : memref<1x640xbf16, #tpu.memory_space<vmem>>, vector<1x640xbf16>
    %5 = arith.extf %4 : vector<1x640xbf16> to vector<1x640xf32>
    %c0_5 = arith.constant 0 : index
    %c0_6 = arith.constant 0 : index
    %6 = vector.load %arg4[%c0_5, %c0_6] : memref<128x3xf32, #tpu.memory_space<vmem>>, vector<128x3xf32>
    %7 = vector.extract_strided_slice %6 {offsets = [0, 0], sizes = [128, 1], strides = [1, 1]} : vector<128x3xf32> to vector<128x1xf32>
    %8 = vector.broadcast %7 : vector<128x1xf32> to vector<128x640xf32>
    %9 = vector.broadcast %1 : vector<1x640xf32> to vector<128x640xf32>
    %10 = arith.mulf %8, %9 : vector<128x640xf32>
    %11 = vector.extract_strided_slice %6 {offsets = [0, 1], sizes = [128, 1], strides = [1, 1]} : vector<128x3xf32> to vector<128x1xf32>
    %12 = vector.broadcast %11 : vector<128x1xf32> to vector<128x640xf32>
    %13 = vector.broadcast %3 : vector<1x640xf32> to vector<128x640xf32>
    %14 = arith.mulf %12, %13 : vector<128x640xf32>
    %15 = arith.addf %10, %14 : vector<128x640xf32>
    %16 = vector.extract_strided_slice %6 {offsets = [0, 2], sizes = [128, 1], strides = [1, 1]} : vector<128x3xf32> to vector<128x1xf32>
    %17 = vector.broadcast %16 : vector<128x1xf32> to vector<128x640xf32>
    %18 = vector.broadcast %5 : vector<1x640xf32> to vector<128x640xf32>
    %19 = arith.mulf %17, %18 : vector<128x640xf32>
    %20 = arith.addf %15, %19 : vector<128x640xf32>
    %c0_7 = arith.constant 0 : index
    %c0_8 = arith.constant 0 : index
    %21 = vector.load %arg5[%c0_7, %c0_8] : memref<128x1xf32, #tpu.memory_space<vmem>>, vector<128x1xf32>
    %22 = vector.broadcast %21 : vector<128x1xf32> to vector<128x640xf32>
    %23 = arith.addf %20, %22 : vector<128x640xf32>
    %cst = arith.constant 0.000000e+00 : f32
    %24 = vector.broadcast %cst : f32 to vector<128x640xf32>
    %25 = arith.maximumf %23, %24 : vector<128x640xf32>
    %c0_9 = arith.constant 0 : index
    %c0_10 = arith.constant 0 : index
    %26 = vector.load %arg6[%c0_9, %c0_10] : memref<64x128xbf16, #tpu.memory_space<vmem>>, vector<64x128xbf16>
    %27 = arith.truncf %25 : vector<128x640xf32> to vector<128x640xbf16>
    %cst_11 = arith.constant dense<0.000000e+00> : vector<64x640xf32>
    %28 = tpu.matmul %26, %27, %cst_11 {dimension_numbers = #tpu.dot_dimension_numbers<[1], [0], [0], [1], [0, 0, 1, 1], [], []>} : vector<64x128xbf16>, vector<128x640xbf16>, vector<64x640xf32> -> vector<64x640xf32>
    %c0_12 = arith.constant 0 : index
    %c0_13 = arith.constant 0 : index
    %29 = vector.load %arg7[%c0_12, %c0_13] : memref<64x1xf32, #tpu.memory_space<vmem>>, vector<64x1xf32>
    %30 = vector.broadcast %29 : vector<64x1xf32> to vector<64x640xf32>
    %31 = arith.addf %28, %30 : vector<64x640xf32>
    %cst_14 = arith.constant 0.000000e+00 : f32
    %32 = vector.broadcast %cst_14 : f32 to vector<64x640xf32>
    %33 = arith.maximumf %31, %32 : vector<64x640xf32>
    %c0_15 = arith.constant 0 : index
    %c0_16 = arith.constant 0 : index
    %34 = vector.load %arg8[%c0_15, %c0_16] : memref<32x64xbf16, #tpu.memory_space<vmem>>, vector<32x64xbf16>
    %35 = arith.truncf %33 : vector<64x640xf32> to vector<64x640xbf16>
    %cst_17 = arith.constant dense<0.000000e+00> : vector<32x640xf32>
    %36 = tpu.matmul %34, %35, %cst_17 {dimension_numbers = #tpu.dot_dimension_numbers<[1], [0], [0], [1], [0, 0, 1, 1], [], []>} : vector<32x64xbf16>, vector<64x640xbf16>, vector<32x640xf32> -> vector<32x640xf32>
    %c0_18 = arith.constant 0 : index
    %c0_19 = arith.constant 0 : index
    %37 = vector.load %arg9[%c0_18, %c0_19] : memref<32x1xf32, #tpu.memory_space<vmem>>, vector<32x1xf32>
    %38 = vector.broadcast %37 : vector<32x1xf32> to vector<32x640xf32>
    %39 = arith.addf %36, %38 : vector<32x640xf32>
    %cst_20 = arith.constant 0.000000e+00 : f32
    %40 = vector.broadcast %cst_20 : f32 to vector<32x640xf32>
    %41 = arith.maximumf %39, %40 : vector<32x640xf32>
    %c0_21 = arith.constant 0 : index
    %c0_22 = arith.constant 0 : index
    %42 = vector.load %arg10[%c0_21, %c0_22] : memref<1x32xbf16, #tpu.memory_space<vmem>>, vector<1x32xbf16>
    %43 = arith.truncf %41 : vector<32x640xf32> to vector<32x640xbf16>
    %cst_23 = arith.constant dense<0.000000e+00> : vector<1x640xf32>
    %44 = tpu.matmul %42, %43, %cst_23 {dimension_numbers = #tpu.dot_dimension_numbers<[1], [0], [0], [1], [0, 0, 1, 1], [], []>} : vector<1x32xbf16>, vector<32x640xbf16>, vector<1x640xf32> -> vector<1x640xf32>
    %c0_24 = arith.constant 0 : index
    %c0_25 = arith.constant 0 : index
    %45 = vector.load %arg11[%c0_24, %c0_25] : memref<1x1xf32, #tpu.memory_space<vmem>>, vector<1x1xf32>
    %46 = vector.broadcast %45 : vector<1x1xf32> to vector<1x640xf32>
    %47 = arith.addf %44, %46 : vector<1x640xf32>
    %c0_26 = arith.constant 0 : index
    %c0_27 = arith.constant 0 : index
    %48 = vector.load %arg12[%c0_26, %c0_27] : memref<1x640xf32, #tpu.memory_space<vmem>>, vector<1x640xf32>
    tpu.vector_store %arg12[%c0_26, %c0_27], %47 {strides = array<i32>} : memref<1x640xf32, #tpu.memory_space<vmem>>, vector<1x640xf32>,
    return
  }
  func.func @transform_0(%arg0: i32) -> (i32, i32) {
    %c0_i32 = arith.constant 0 : i32
    %c0_i32_0 = arith.constant 0 : i32
    return %c0_i32, %arg0 : i32, i32
  }
  func.func @transform_1(%arg0: i32) -> (i32, i32) {
    %c0_i32 = arith.constant 0 : i32
    %c0_i32_0 = arith.constant 0 : i32
    return %c0_i32, %arg0 : i32, i32
  }
  func.func @transform_2(%arg0: i32) -> (i32, i32) {
    %c0_i32 = arith.constant 0 : i32
    %c0_i32_0 = arith.constant 0 : i32
    return %c0_i32, %arg0 : i32, i32
  }
  func.func @transform_3(%arg0: i32) -> (i32, i32) {
    %c0_i32 = arith.constant 0 : i32
    %c0_i32_0 = arith.constant 0 : i32
    %c0_i32_1 = arith.constant 0 : i32
    return %c0_i32, %c0_i32_0 : i32, i32
  }
  func.func @transform_4(%arg0: i32) -> (i32, i32) {
    %c0_i32 = arith.constant 0 : i32
    %c0_i32_0 = arith.constant 0 : i32
    %c0_i32_1 = arith.constant 0 : i32
    return %c0_i32, %c0_i32_0 : i32, i32
  }
  func.func @transform_5(%arg0: i32) -> (i32, i32) {
    %c0_i32 = arith.constant 0 : i32
    %c0_i32_0 = arith.constant 0 : i32
    %c0_i32_1 = arith.constant 0 : i32
    return %c0_i32, %c0_i32_0 : i32, i32
  }
  func.func @transform_6(%arg0: i32) -> (i32, i32) {
    %c0_i32 = arith.constant 0 : i32
    %c0_i32_0 = arith.constant 0 : i32
    %c0_i32_1 = arith.constant 0 : i32
    return %c0_i32, %c0_i32_0 : i32, i32
  }
  func.func @transform_7(%arg0: i32) -> (i32, i32) {
    %c0_i32 = arith.constant 0 : i32
    %c0_i32_0 = arith.constant 0 : i32
    %c0_i32_1 = arith.constant 0 : i32
    return %c0_i32, %c0_i32_0 : i32, i32
  }
  func.func @transform_8(%arg0: i32) -> (i32, i32) {
    %c0_i32 = arith.constant 0 : i32
    %c0_i32_0 = arith.constant 0 : i32
    %c0_i32_1 = arith.constant 0 : i32
    return %c0_i32, %c0_i32_0 : i32, i32
  }
  func.func @transform_9(%arg0: i32) -> (i32, i32) {
    %c0_i32 = arith.constant 0 : i32
    %c0_i32_0 = arith.constant 0 : i32
    %c0_i32_1 = arith.constant 0 : i32
    return %c0_i32, %c0_i32_0 : i32, i32
  }
  func.func @transform_10(%arg0: i32) -> (i32, i32) {
    %c0_i32 = arith.constant 0 : i32
    %c0_i32_0 = arith.constant 0 : i32
    %c0_i32_1 = arith.constant 0 : i32
    return %c0_i32, %c0_i32_0 : i32, i32
  }
  func.func @transform_11(%arg0: i32) -> (i32, i32) {
    %c0_i32 = arith.constant 0 : i32
    %c0_i32_0 = arith.constant 0 : i32
    return %c0_i32, %arg0 : i32, i32
  }
}

module attributes {stable_mosaic.version = 11 : i64} {
  func.func @grad_meta_kernel(%arg0: i32, %arg1: memref<2x4x32xf32, #tpu.memory_space<vmem>>, %arg2: memref<2x4x32xf32, #tpu.memory_space<vmem>>, %arg3: memref<2x4x32xf32, #tpu.memory_space<vmem>>, %arg4: memref<2x4x32xf32, #tpu.memory_space<vmem>>, %arg5: memref<2x1x32xf32, #tpu.memory_space<vmem>>, %arg6: memref<2x1x32xf32, #tpu.memory_space<vmem>>) attributes {dimension_semantics = [#tpu.dimension_semantics<parallel>], iteration_bounds = array<i64: 1>, scalar_prefetch = 0 : i64, scratch_operands = 0 : i64, tpu.core_type = #tpu.core_type<tc>, window_params = [{transform_indices = @transform_0, window_bounds = array<i64: 2, 4, 32>}, {transform_indices = @transform_1, window_bounds = array<i64: 2, 4, 32>}, {transform_indices = @transform_2, window_bounds = array<i64: 2, 4, 32>}, {transform_indices = @transform_3, window_bounds = array<i64: 2, 4, 32>}, {transform_indices = @transform_4, window_bounds = array<i64: 2, 1, 32>}, {transform_indices = @transform_5, window_bounds = array<i64: 2, 1, 32>}]} {
    %c0 = arith.constant 0 : index
    %c0_0 = arith.constant 0 : index
    %c0_1 = arith.constant 0 : index
    %0 = vector.load %arg5[%c0, %c0_0, %c0_1] : memref<2x1x32xf32, #tpu.memory_space<vmem>>, vector<2x1x32xf32>
    %c0_2 = arith.constant 0 : index
    %c0_3 = arith.constant 0 : index
    %c0_4 = arith.constant 0 : index
    %1 = vector.load %arg1[%c0_2, %c0_3, %c0_4] : memref<2x4x32xf32, #tpu.memory_space<vmem>>, vector<2x4x32xf32>
    %2 = vector.broadcast %0 : vector<2x1x32xf32> to vector<2x4x32xf32>
    %3 = arith.addf %1, %2 : vector<2x4x32xf32>
    %c0_5 = arith.constant 0 : index
    %c0_6 = arith.constant 0 : index
    %c0_7 = arith.constant 0 : index
    %4 = vector.load %arg2[%c0_5, %c0_6, %c0_7] : memref<2x4x32xf32, #tpu.memory_space<vmem>>, vector<2x4x32xf32>
    %5 = arith.subf %3, %4 : vector<2x4x32xf32>
    %c0_8 = arith.constant 0 : index
    %c0_9 = arith.constant 0 : index
    %c0_10 = arith.constant 0 : index
    %6 = vector.load %arg3[%c0_8, %c0_9, %c0_10] : memref<2x4x32xf32, #tpu.memory_space<vmem>>, vector<2x4x32xf32>
    %7 = vector.broadcast %0 : vector<2x1x32xf32> to vector<2x4x32xf32>
    %8 = arith.addf %6, %7 : vector<2x4x32xf32>
    %c0_11 = arith.constant 0 : index
    %c0_12 = arith.constant 0 : index
    %c0_13 = arith.constant 0 : index
    %9 = vector.load %arg4[%c0_11, %c0_12, %c0_13] : memref<2x4x32xf32, #tpu.memory_space<vmem>>, vector<2x4x32xf32>
    %10 = arith.subf %8, %9 : vector<2x4x32xf32>
    %11 = arith.mulf %5, %5 : vector<2x4x32xf32>
    %cst = arith.constant dense<0.000000e+00> : vector<2x4xf32>
    %12 = vector.multi_reduction <add>, %11, %cst [2] : vector<2x4x32xf32> to vector<2x4xf32>
    %13 = vector.shape_cast %12 : vector<2x4xf32> to vector<2x4x1xf32>
    %14 = arith.mulf %10, %10 : vector<2x4x32xf32>
    %cst_14 = arith.constant dense<0.000000e+00> : vector<2x4xf32>
    %15 = vector.multi_reduction <add>, %14, %cst_14 [2] : vector<2x4x32xf32> to vector<2x4xf32>
    %16 = vector.shape_cast %15 : vector<2x4xf32> to vector<2x4x1xf32>
    %cst_15 = arith.constant 9.99999996E-13 : f32
    %17 = vector.broadcast %cst_15 : f32 to vector<2x4x1xf32>
    %18 = arith.addf %13, %17 : vector<2x4x1xf32>
    %19 = math.rsqrt %18 : vector<2x4x1xf32>
    %cst_16 = arith.constant 9.99999996E-13 : f32
    %20 = vector.broadcast %cst_16 : f32 to vector<2x4x1xf32>
    %21 = arith.addf %16, %20 : vector<2x4x1xf32>
    %22 = math.rsqrt %21 : vector<2x4x1xf32>
    %23 = arith.mulf %13, %19 : vector<2x4x1xf32>
    %24 = arith.mulf %16, %22 : vector<2x4x1xf32>
    %cst_17 = arith.constant 1.000000e+00 : f32
    %25 = vector.broadcast %cst_17 : f32 to vector<2x4x1xf32>
    %26 = arith.addf %25, %23 : vector<2x4x1xf32>
    %27 = arith.subf %26, %24 : vector<2x4x1xf32>
    %cst_18 = arith.constant 0.000000e+00 : f32
    %28 = vector.broadcast %cst_18 : f32 to vector<2x4x1xf32>
    %29 = arith.cmpf ogt, %27, %28 : vector<2x4x1xf32>
    %30 = vector.broadcast %19 : vector<2x4x1xf32> to vector<2x4x32xf32>
    %31 = arith.mulf %5, %30 : vector<2x4x32xf32>
    %32 = vector.broadcast %22 : vector<2x4x1xf32> to vector<2x4x32xf32>
    %33 = arith.mulf %10, %32 : vector<2x4x32xf32>
    %34 = arith.subf %31, %33 : vector<2x4x32xf32>
    %cst_19 = arith.constant 0.000000e+00 : f32
    %35 = vector.shape_cast %29 : vector<2x4x1xi1> to vector<2x4x1xi1>
    %36 = vector.broadcast %35 : vector<2x4x1xi1> to vector<2x4x32xi1>
    %37 = vector.broadcast %cst_19 : f32 to vector<2x4x32xf32>
    %38 = arith.select %36, %34, %37 : vector<2x4x32xi1>, vector<2x4x32xf32>
    %cst_20 = arith.constant dense<0.000000e+00> : vector<2x32xf32>
    %39 = vector.multi_reduction <add>, %38, %cst_20 [1] : vector<2x4x32xf32> to vector<2x32xf32>
    %40 = vector.shape_cast %39 : vector<2x32xf32> to vector<2x1x32xf32>
    %cst_21 = arith.constant 1.250000e-01 : f32
    %41 = vector.broadcast %cst_21 : f32 to vector<2x1x32xf32>
    %42 = arith.mulf %40, %41 : vector<2x1x32xf32>
    %c0_22 = arith.constant 0 : index
    %c0_23 = arith.constant 0 : index
    %c0_24 = arith.constant 0 : index
    %43 = vector.load %arg6[%c0_22, %c0_23, %c0_24] : memref<2x1x32xf32, #tpu.memory_space<vmem>>, vector<2x1x32xf32>
    tpu.vector_store %arg6[%c0_22, %c0_23, %c0_24], %42 {strides = array<i32>} : memref<2x1x32xf32, #tpu.memory_space<vmem>>, vector<2x1x32xf32>,
    return
  }
  func.func @transform_0(%arg0: i32) -> (i32, i32, i32) {
    %c0_i32 = arith.constant 0 : i32
    %c0_i32_0 = arith.constant 0 : i32
    %c0_i32_1 = arith.constant 0 : i32
    return %arg0, %c0_i32, %c0_i32_0 : i32, i32, i32
  }
  func.func @transform_1(%arg0: i32) -> (i32, i32, i32) {
    %c0_i32 = arith.constant 0 : i32
    %c0_i32_0 = arith.constant 0 : i32
    %c0_i32_1 = arith.constant 0 : i32
    return %arg0, %c0_i32, %c0_i32_0 : i32, i32, i32
  }
  func.func @transform_2(%arg0: i32) -> (i32, i32, i32) {
    %c0_i32 = arith.constant 0 : i32
    %c0_i32_0 = arith.constant 0 : i32
    %c0_i32_1 = arith.constant 0 : i32
    return %arg0, %c0_i32, %c0_i32_0 : i32, i32, i32
  }
  func.func @transform_3(%arg0: i32) -> (i32, i32, i32) {
    %c0_i32 = arith.constant 0 : i32
    %c0_i32_0 = arith.constant 0 : i32
    %c0_i32_1 = arith.constant 0 : i32
    return %arg0, %c0_i32, %c0_i32_0 : i32, i32, i32
  }
  func.func @transform_4(%arg0: i32) -> (i32, i32, i32) {
    %c0_i32 = arith.constant 0 : i32
    %c0_i32_0 = arith.constant 0 : i32
    %c0_i32_1 = arith.constant 0 : i32
    return %arg0, %c0_i32, %c0_i32_0 : i32, i32, i32
  }
  func.func @transform_5(%arg0: i32) -> (i32, i32, i32) {
    %c0_i32 = arith.constant 0 : i32
    %c0_i32_0 = arith.constant 0 : i32
    %c0_i32_1 = arith.constant 0 : i32
    return %arg0, %c0_i32, %c0_i32_0 : i32, i32, i32
  }
}

module attributes {stable_mosaic.version = 11 : i64} {
  func.func @fused_score_kernel(%arg0: i32, %arg1: memref<2x12x32xf32, #tpu.memory_space<vmem>>, %arg2: memref<2x12x32xf32, #tpu.memory_space<vmem>>, %arg3: memref<2x12x32xf32, #tpu.memory_space<vmem>>, %arg4: memref<2x1x32xf32, #tpu.memory_space<vmem>>, %arg5: memref<2x1x32xf32, #tpu.memory_space<vmem>>, %arg6: memref<2x1x32xf32, #tpu.memory_space<vmem>>, %arg7: memref<2x12xf32, #tpu.memory_space<vmem>>) attributes {dimension_semantics = [#tpu.dimension_semantics<parallel>], iteration_bounds = array<i64: 1>, scalar_prefetch = 0 : i64, scratch_operands = 0 : i64, tpu.core_type = #tpu.core_type<tc>, window_params = [{transform_indices = @transform_0, window_bounds = array<i64: 2, 12, 32>}, {transform_indices = @transform_1, window_bounds = array<i64: 2, 12, 32>}, {transform_indices = @transform_2, window_bounds = array<i64: 2, 12, 32>}, {transform_indices = @transform_3, window_bounds = array<i64: 2, 1, 32>}, {transform_indices = @transform_4, window_bounds = array<i64: 2, 1, 32>}, {transform_indices = @transform_5, window_bounds = array<i64: 2, 1, 32>}, {transform_indices = @transform_6, window_bounds = array<i64: 2, 12>}]} {
    %c0 = arith.constant 0 : index
    %c0_0 = arith.constant 0 : index
    %c0_1 = arith.constant 0 : index
    %0 = vector.load %arg4[%c0, %c0_0, %c0_1] : memref<2x1x32xf32, #tpu.memory_space<vmem>>, vector<2x1x32xf32>
    %c0_2 = arith.constant 0 : index
    %c0_3 = arith.constant 0 : index
    %c0_4 = arith.constant 0 : index
    %1 = vector.load %arg5[%c0_2, %c0_3, %c0_4] : memref<2x1x32xf32, #tpu.memory_space<vmem>>, vector<2x1x32xf32>
    %c0_5 = arith.constant 0 : index
    %c0_6 = arith.constant 0 : index
    %c0_7 = arith.constant 0 : index
    %2 = vector.load %arg6[%c0_5, %c0_6, %c0_7] : memref<2x1x32xf32, #tpu.memory_space<vmem>>, vector<2x1x32xf32>
    %c0_8 = arith.constant 0 : index
    %c0_9 = arith.constant 0 : index
    %c0_10 = arith.constant 0 : index
    %3 = vector.load %arg1[%c0_8, %c0_9, %c0_10] : memref<2x12x32xf32, #tpu.memory_space<vmem>>, vector<2x12x32xf32>
    %4 = vector.broadcast %0 : vector<2x1x32xf32> to vector<2x12x32xf32>
    %5 = arith.addf %3, %4 : vector<2x12x32xf32>
    %c0_11 = arith.constant 0 : index
    %c0_12 = arith.constant 0 : index
    %c0_13 = arith.constant 0 : index
    %6 = vector.load %arg2[%c0_11, %c0_12, %c0_13] : memref<2x12x32xf32, #tpu.memory_space<vmem>>, vector<2x12x32xf32>
    %7 = arith.subf %5, %6 : vector<2x12x32xf32>
    %c0_14 = arith.constant 0 : index
    %c0_15 = arith.constant 0 : index
    %c0_16 = arith.constant 0 : index
    %8 = vector.load %arg3[%c0_14, %c0_15, %c0_16] : memref<2x12x32xf32, #tpu.memory_space<vmem>>, vector<2x12x32xf32>
    %9 = vector.broadcast %1 : vector<2x1x32xf32> to vector<2x12x32xf32>
    %10 = arith.subf %8, %9 : vector<2x12x32xf32>
    %11 = vector.broadcast %2 : vector<2x1x32xf32> to vector<2x12x32xf32>
    %12 = arith.subf %8, %11 : vector<2x12x32xf32>
    %13 = arith.mulf %7, %7 : vector<2x12x32xf32>
    %cst = arith.constant dense<0.000000e+00> : vector<2x12xf32>
    %14 = vector.multi_reduction <add>, %13, %cst [2] : vector<2x12x32xf32> to vector<2x12xf32>
    %15 = math.sqrt %14 : vector<2x12xf32>
    %16 = arith.mulf %10, %10 : vector<2x12x32xf32>
    %cst_17 = arith.constant dense<0.000000e+00> : vector<2x12xf32>
    %17 = vector.multi_reduction <add>, %16, %cst_17 [2] : vector<2x12x32xf32> to vector<2x12xf32>
    %18 = math.sqrt %17 : vector<2x12xf32>
    %19 = arith.mulf %12, %12 : vector<2x12x32xf32>
    %cst_18 = arith.constant dense<0.000000e+00> : vector<2x12xf32>
    %20 = vector.multi_reduction <add>, %19, %cst_18 [2] : vector<2x12x32xf32> to vector<2x12xf32>
    %21 = math.sqrt %20 : vector<2x12xf32>
    %22 = arith.subf %18, %21 : vector<2x12xf32>
    %cst_19 = arith.constant 1.000000e-01 : f32
    %23 = vector.broadcast %cst_19 : f32 to vector<2x12xf32>
    %24 = arith.mulf %23, %22 : vector<2x12xf32>
    %25 = arith.addf %15, %24 : vector<2x12xf32>
    %cst_20 = arith.constant 0.000000e+00 : f32
    %26 = vector.broadcast %cst_20 : f32 to vector<2x12xf32>
    %27 = arith.subf %26, %25 : vector<2x12xf32>
    %c0_21 = arith.constant 0 : index
    %c0_22 = arith.constant 0 : index
    %28 = vector.load %arg7[%c0_21, %c0_22] : memref<2x12xf32, #tpu.memory_space<vmem>>, vector<2x12xf32>
    tpu.vector_store %arg7[%c0_21, %c0_22], %27 {strides = array<i32>} : memref<2x12xf32, #tpu.memory_space<vmem>>, vector<2x12xf32>,
    return
  }
  func.func @transform_0(%arg0: i32) -> (i32, i32, i32) {
    %c0_i32 = arith.constant 0 : i32
    %c0_i32_0 = arith.constant 0 : i32
    %c0_i32_1 = arith.constant 0 : i32
    return %arg0, %c0_i32, %c0_i32_0 : i32, i32, i32
  }
  func.func @transform_1(%arg0: i32) -> (i32, i32, i32) {
    %c0_i32 = arith.constant 0 : i32
    %c0_i32_0 = arith.constant 0 : i32
    %c0_i32_1 = arith.constant 0 : i32
    return %arg0, %c0_i32, %c0_i32_0 : i32, i32, i32
  }
  func.func @transform_2(%arg0: i32) -> (i32, i32, i32) {
    %c0_i32 = arith.constant 0 : i32
    %c0_i32_0 = arith.constant 0 : i32
    %c0_i32_1 = arith.constant 0 : i32
    return %arg0, %c0_i32, %c0_i32_0 : i32, i32, i32
  }
  func.func @transform_3(%arg0: i32) -> (i32, i32, i32) {
    %c0_i32 = arith.constant 0 : i32
    %c0_i32_0 = arith.constant 0 : i32
    %c0_i32_1 = arith.constant 0 : i32
    return %arg0, %c0_i32, %c0_i32_0 : i32, i32, i32
  }
  func.func @transform_4(%arg0: i32) -> (i32, i32, i32) {
    %c0_i32 = arith.constant 0 : i32
    %c0_i32_0 = arith.constant 0 : i32
    %c0_i32_1 = arith.constant 0 : i32
    return %arg0, %c0_i32, %c0_i32_0 : i32, i32, i32
  }
  func.func @transform_5(%arg0: i32) -> (i32, i32, i32) {
    %c0_i32 = arith.constant 0 : i32
    %c0_i32_0 = arith.constant 0 : i32
    %c0_i32_1 = arith.constant 0 : i32
    return %arg0, %c0_i32, %c0_i32_0 : i32, i32, i32
  }
  func.func @transform_6(%arg0: i32) -> (i32, i32) {
    %c0_i32 = arith.constant 0 : i32
    %c0_i32_0 = arith.constant 0 : i32
    return %arg0, %c0_i32 : i32, i32
  }
}

</mosaic_0001>

<bundles_post_ra>
// kernel: squeeze.29
= control target key start
LH: loop header
LB: loop body
LE: loop exit
PB: predicated region body
PF: predicated region fallthrough
CT: control target
= control target key end

     0   :  { %vm3_vm0 = vcmask 261120   ;;  %s75_s10 = smov 64   ;;  %s76_s11 = smov 96   ;;  %s151_s0 = inlined_call_operand.vmem [shape: f32[1280], index: 0, kind: input, shape index: {}]   ;;  %s152_s1 = inlined_call_operand.vmem [shape: f32[2,20,32], index: 1, kind: output, shape index: {}]  }
   0x1   :  { %v27_v0 = vld [vmem:[%s151_s0] sm:$0xff]   ;;  %v58_v1 = vld [vmem:[%s151_s0 + $0x8] sm:$0x3]  }
   0x2   :  { %28 = vrot.lane.b32.xlu1 %v27_v0, %s75_s10  ;;  %13 = vrot.lane.b32.xlu0 %v27_v0, %s76_s11  ;;  %4 = vst.msk [vmem:[%s152_s1] ss:$4 sm:$0x1f] %vm3_vm0, %v27_v0   ;;  %57 = vst.msk [vmem:[%s152_s1 + $0x4] ss:$4 sm:$0xe0] %vm3_vm0, %v27_v0  }
   0x3   :  { %59 = vst.msk [vmem:[%s152_s1 + $0x24] ss:$4 sm:$0x3] %vm3_vm0, %v58_v1   ;;  %v66_v2 = vld [vmem:[%s151_s0 + $0x8] sm:$0x3]  }
   0x4   :  { %v62_v3 = vld [vmem:[%s151_s0 + $0x8] sm:$0x3]  }
   0x5   :  { %v70_v4 = vld [vmem:[%s151_s0 + $0x8] sm:$0x3]   ;;  %s77_s0 = smov 32  }
   0x6   :  { %37 = vrot.lane.b32.xlu1 %v66_v2, %s75_s10  ;;  %22 = vrot.lane.b32.xlu0 %v62_v3, %s76_s11 }
   0xa   :  { %52 = vrot.lane.b32.xlu1 %v70_v4, %s77_s0  ;;  %43 = vrot.lane.b32.xlu0 %v27_v0, %s77_s0 }
  0x74   :  { %v29_v5 = vpop.permute.xlu1 %28   ;;  %v14_v6 = vpop.permute.xlu0 %13  }
  0x75   :  { %64 = vst.msk [vmem:[%s152_s1 + $0x2] ss:$4 sm:$0x1f] %vm3_vm0, %v29_v5   ;;  %65 = vst.msk [vmem:[%s152_s1 + $0x6] ss:$4 sm:$0xe0] %vm3_vm0, %v29_v5  }
  0x76   :  { %60 = vst.msk [vmem:[%s152_s1 + $0x1] ss:$4 sm:$0x1f] %vm3_vm0, %v14_v6   ;;  %61 = vst.msk [vmem:[%s152_s1 + $0x5] ss:$4 sm:$0xe0] %vm3_vm0, %v14_v6  }
  0x78   :  { %v38_v7 = vpop.permute.xlu1 %37   ;;  %v23_v8 = vpop.permute.xlu0 %22  }
  0x79   :  { %67 = vst.msk [vmem:[%s152_s1 + $0x26] ss:$4 sm:$0x3] %vm3_vm0, %v38_v7   ;;  %63 = vst.msk [vmem:[%s152_s1 + $0x25] ss:$4 sm:$0x3] %vm3_vm0, %v23_v8  }
  0x7c   :  { %v53_v9 = vpop.permute.xlu1 %52   ;;  %v44_v10 = vpop.permute.xlu0 %43  }
  0x7d   :  { %71 = vst.msk [vmem:[%s152_s1 + $0x27] ss:$4 sm:$0x3] %vm3_vm0, %v53_v9   ;;  %68 = vst.msk [vmem:[%s152_s1 + $0x3] ss:$4 sm:$0x1f] %vm3_vm0, %v44_v10  }
  0x7e   :  { %69 = vst.msk [vmem:[%s152_s1 + $0x7] ss:$4 sm:$0xe0] %vm3_vm0, %v44_v10  }

// kernel: metar_forward.4
= control target key start
LH: loop header
LB: loop body
LE: loop exit
PB: predicated region body
PF: predicated region fallthrough
CT: control target
= control target key end

     0   :  { %vm52_vm0 = vcmask 257024   ;;  %vm113_vm3 = vcmask 253952   ;;  %s202_s2 = inlined_call_operand.vmem [shape: f32[2,4,32], index: 2, kind: input, shape index: {}]   ;;  %s203_s3 = inlined_call_operand.vmem [shape: f32[2,4,32], index: 3, kind: input, shape index: {}]   ;;  %s204_s4 = inlined_call_operand.vmem [shape: f32[2,1,32], index: 4, kind: input, shape index: {}]   ;;  %s205_s0 = inlined_call_operand.vmem [shape: f32[2,4,32], index: 0, kind: input, shape index: {}]   ;;  %s206_s1 = inlined_call_operand.vmem [shape: f32[2,4,32], index: 1, kind: input, shape index: {}]   ;;  %s207_s5 = inlined_call_operand.vmem [shape: f32[2,1,32], index: 5, kind: output, shape index: {}]  }
   0x1   :  { %v120_v0 = vld [vmem:[%s204_s4] ss:$0 sm:$0xff]  ;;  %v121_v6 = vld [vmem:[%s204_s4 + $0x1] ss:$0 sm:$0xff]  ;;  %v43_v8 = vld [vmem:[%s202_s2 + $0x4] sm:$0xf] }
   0x2   :  { %v42_v1 = vld [vmem:[%s202_s2] sm:$0xf]  ;;  %v47_v9 = vld [vmem:[%s203_s3 + $0x4] sm:$0xf]  ;;  %v45_v12 = vadd.f32 %v121_v6, %v43_v8 }
   0x3   :  { %v46_v2 = vld [vmem:[%s203_s3] sm:$0xf]  ;;  %v44_v3 = vadd.f32 %v120_v0, %v42_v1  ;;  %v23_v10 = vld [vmem:[%s205_s0 + $0x4] sm:$0xf] }
   0x4   :  { %v22_v4 = vld [vmem:[%s205_s0] sm:$0xf]  ;;  %v37_v13 = vadd.f32 %v121_v6, %v23_v10  ;;  %v39_v14 = vld [vmem:[%s206_s1 + $0x4] sm:$0xf]  ;;  %v49_v17 = vsub.f32 %v45_v12, %v47_v9 }
   0x5   :  { %v38_v5 = vld [vmem:[%s206_s1] sm:$0xf]  ;;  %v36_v7 = vadd.f32 %v120_v0, %v22_v4  ;;  %v48_v11 = vsub.f32 %v44_v3, %v46_v2 }
   0x6   :  { %v41_v18 = vsub.f32 %v37_v13, %v39_v14  ;;  %v60_v21 = vmul.f32 %v49_v17, %v49_v17 }
   0x7   :  { %v40_v15 = vsub.f32 %v36_v7, %v38_v5  ;;  %v59_v16 = vmul.f32 %v48_v11, %v48_v11 }
   0x8   :  { %v51_v22 = vmul.f32 %v41_v18, %v41_v18  ;;  %v64_v24 = vsel %vm52_vm0, %v60_v21, 0.0 }
   0x9   :  { %v50_v19 = vmul.f32 %v40_v15, %v40_v15  ;;  %v61_v20 = vsel %vm52_vm0, %v59_v16, 0.0 }
   0xa   :  { %62 = vadd.xlane.f32.xlu1 %v61_v20  ;;  %v56_v25 = vsel %vm52_vm0, %v51_v22, 0.0 }
   0xb   :  { %v53_v23 = vsel %vm52_vm0, %v50_v19, 0.0 }
   0xc   :  { %54 = vadd.xlane.f32.xlu0 %v53_v23 }
   0xe   :  { %65 = vadd.xlane.f32.xlu1 %v64_v24 }
  0x10   :  { %57 = vadd.xlane.f32.xlu0 %v56_v25 }
  0x97   :  { %v63_v26 = vpop.xlane.xlu1 %62 }
  0x98   :  { %v71_v27 = vadd.f32 1e-12, %v63_v26 }
  0x99   :  { %v55_v28 = vpop.xlane.xlu0 %54 }
  0x9a   :  { %v67_v29 = vadd.f32 1e-12, %v55_v28  ;;  %122 = vrsqrt.f32 %v71_v27 }
  0x9b   :  { %v66_v30 = vpop.xlane.xlu1 %65 }
  0x9c   :  { %124 = vrsqrt.f32 %v67_v29  ;;  %v72_v31 = vadd.f32 1e-12, %v66_v30 }
  0x9d   :  { %v58_v32 = vpop.xlane.xlu0 %57 }
  0x9e   :  { %v68_v33 = vadd.f32 1e-12, %v58_v32  ;;  %126 = vrsqrt.f32 %v72_v31 }
  0xa0   :  { %128 = vrsqrt.f32 %v68_v33 }
  0xa4   :  { %v123_v34 = vpop.eup %122 }
  0xa5   :  { %v87_v37 = vmul.f32 %v123_v34, %v48_v11  ;;  %v77_v40 = vmul.f32 %v123_v34, %v63_v26 }
  0xa6   :  { %v125_v35 = vpop.eup %124 }
  0xa7   :  { %v75_v36 = vmul.f32 %v125_v35, %v55_v28  ;;  %v85_v38 = vmul.f32 %v125_v35, %v40_v15 }
  0xa8   :  { %v127_v39 = vpop.eup %126 }
  0xa9   :  { %v79_v41 = vadd.f32 1.0, %v75_v36  ;;  %v89_v45 = vsub.f32 %v85_v38, %v87_v37  ;;  %v88_v46 = vmul.f32 %v127_v39, %v49_v17  ;;  %v78_v48 = vmul.f32 %v127_v39, %v66_v30 }
  0xaa   :  { %v129_v42 = vpop.eup %128 }
  0xab   :  { %v81_v43 = vsub.f32 %v79_v41, %v77_v40  ;;  %v76_v44 = vmul.f32 %v129_v42, %v58_v32  ;;  %v86_v47 = vmul.f32 %v129_v42, %v41_v18 }
  0xad   :  { %vm83_vm1 = vcmp.gt.f32.partialorder %v81_v43, 0.0  ;;  %v80_v49 = vadd.f32 1.0, %v76_v44  ;;  %v90_v54 = vsub.f32 %v86_v47, %v88_v46 }
  0xae   :  { %v95_v50 = vsel %vm83_vm1, %v89_v45, 0.0 }
  0xaf   :  { %v97_v51 = vsel %vm52_vm0, %v95_v50, 0.0  ;;  %v82_v52 = vsub.f32 %v80_v49, %v78_v48 }
  0xb0   :  { %v98_v53 = vrot.slane %v97_v51, 4 }
  0xb1   :  { %vm84_vm2 = vcmp.gt.f32.partialorder %v82_v52, 0.0 }
  0xb2   :  { %v99_v55 = vadd.f32 %v98_v53, %v97_v51  ;;  %v96_v56 = vsel %vm84_vm2, %v90_v54, 0.0 }
  0xb3   :  { %v104_v57 = vsel %vm52_vm0, %v96_v56, 0.0 }
  0xb4   :  { %v100_v58 = vrot.slane %v99_v55, 2  ;;  %v105_v59 = vrot.slane %v104_v57, 4 }
  0xb6   :  { %v101_v60 = vadd.f32 %v100_v58, %v99_v55  ;;  %v106_v61 = vadd.f32 %v105_v59, %v104_v57 }
  0xb8   :  { %v102_v62 = vrot.slane %v101_v60, 1  ;;  %v107_v63 = vrot.slane %v106_v61, 2 }
  0xba   :  { %v103_v0 = vadd.f32 %v102_v62, %v101_v60  ;;  %v108_v1 = vadd.f32 %v107_v63, %v106_v61 }
  0xbc   :  { %v111_v2 = vmul.f32 0.125, %v103_v0  ;;  %v109_v3 = vrot.slane %v108_v1, 1 }
  0xbe   :  { %114 = vst.msk [vmem:[%s207_s5] sm:$0x1] %vm113_vm3, %v111_v2  ;;  %v110_v4 = vadd.f32 %v109_v3, %v108_v1 }
  0xc0   :  { %v112_v5 = vmul.f32 0.125, %v110_v4 }
  0xc2   :  { %115 = vst.msk [vmem:[%s207_s5 + $0x1] sm:$0x1] %vm113_vm3, %v112_v5 }

// kernel: metar_forward.5
= control target key start
LH: loop header
LB: loop body
LE: loop exit
PB: predicated region body
PF: predicated region fallthrough
CT: control target
= control target key end

     0   :  { %vm97_vm0 = vcmask 261120   ;;  %vm101_vm1 = vcmask 257024   ;;  %v247_v60 = vlaneseq  ;;  %s546_s2 = inlined_call_operand.vmem [shape: f32[2,12,32], index: 2, kind: input, shape index: {}]   ;;  %s547_s4 = inlined_call_operand.vmem [shape: f32[2,1,32], index: 4, kind: input, shape index: {}]   ;;  %s548_s5 = inlined_call_operand.vmem [shape: f32[2,1,32], index: 5, kind: input, shape index: {}]   ;;  %s549_s0 = inlined_call_operand.vmem [shape: f32[2,12,32], index: 0, kind: input, shape index: {}]   ;;  %s550_s3 = inlined_call_operand.vmem [shape: f32[2,1,32], index: 3, kind: input, shape index: {}]   ;;  %s551_s1 = inlined_call_operand.vmem [shape: f32[2,12,32], index: 1, kind: input, shape index: {}]   ;;  %s552_s6 = inlined_call_operand.vmem [shape: f32[2,12], index: 6, kind: output, shape index: {}]  }
   0x1   :  { %v281_v0 = vld [vmem:[%s547_s4 + $0x1] ss:$0 sm:$0xff]  ;;  %v59_v1 = vld [vmem:[%s546_s2 + $0x10] sm:$0xff]  ;;  %v280_v2 = vld [vmem:[%s547_s4] ss:$0 sm:$0xff] }
   0x2   :  { %v75_v3 = vsub.f32 %v59_v1, %v281_v0  ;;  %v57_v4 = vld [vmem:[%s546_s2] sm:$0xff]  ;;  %v60_v5 = vld [vmem:[%s546_s2 + $0x18] sm:$0xf]  ;;  %v58_v6 = vld [vmem:[%s546_s2 + $0x8] sm:$0xf]  ;;  %v248_v63 = vand.u32 127, %v247_v60 }
   0x3   :  { %v73_v7 = vsub.f32 %v57_v4, %v280_v2  ;;  %v76_v8 = vsub.f32 %v60_v5, %v281_v0  ;;  %v74_v9 = vsub.f32 %v58_v6, %v280_v2  ;;  %v282_v10 = vld [vmem:[%s548_s5] ss:$0 sm:$0xff]  ;;  %v283_v17 = vld [vmem:[%s548_s5 + $0x1] ss:$0 sm:$0xff]  ;;  %v30_v19 = vld [vmem:[%s549_s0 + $0x8] sm:$0xf] }
   0x4   :  { %v141_v11 = vmul.f32 %v75_v3, %v75_v3  ;;  %v90_v12 = vsub.f32 %v58_v6, %v282_v10  ;;  %v89_v16 = vsub.f32 %v57_v4, %v282_v10  ;;  %v278_v18 = vld [vmem:[%s550_s3] ss:$0 sm:$0xff]  ;;  %v92_v25 = vsub.f32 %v60_v5, %v283_v17  ;;  %v50_v27 = vld [vmem:[%s551_s1 + $0x8] sm:$0xf]  ;;  %v279_v32 = vld [vmem:[%s550_s3 + $0x1] ss:$0 sm:$0xff] }
   0x5   :  { %v139_v13 = vmul.f32 %v73_v7, %v73_v7  ;;  %v142_v14 = vmul.f32 %v76_v8, %v76_v8  ;;  %v140_v15 = vmul.f32 %v74_v9, %v74_v9  ;;  %v29_v21 = vld [vmem:[%s549_s0] sm:$0xff]  ;;  %v46_v26 = vadd.f32 %v278_v18, %v30_v19  ;;  %v32_v33 = vld [vmem:[%s549_s0 + $0x18] sm:$0xf]  ;;  %v31_v35 = vld [vmem:[%s549_s0 + $0x10] sm:$0xff] }
   0x6   :  { %v149_v20 = vsel %vm97_vm0, %v141_v11, 0.0  ;;  %v184_v24 = vmul.f32 %v90_v12, %v90_v12  ;;  %v183_v29 = vmul.f32 %v89_v16, %v89_v16  ;;  %v91_v30 = vsub.f32 %v59_v1, %v283_v17  ;;  %v49_v34 = vld [vmem:[%s551_s1] sm:$0xff]  ;;  %v52_v43 = vld [vmem:[%s551_s1 + $0x18] sm:$0xf]  ;;  %v51_v45 = vld [vmem:[%s551_s1 + $0x10] sm:$0xff] }
   0x7   :  { %150 = vadd.xlane.f32.xlu1 %v149_v20  ;;  %v143_v22 = vsel %vm97_vm0, %v139_v13, 0.0  ;;  %v152_v23 = vsel %vm101_vm1, %v142_v14, 0.0  ;;  %v146_v28 = vsel %vm101_vm1, %v140_v15, 0.0  ;;  %v45_v31 = vadd.f32 %v278_v18, %v29_v21 }
   0x8   :  { %144 = vadd.xlane.f32.xlu0 %v143_v22  ;;  %v190_v36 = vsel %vm101_vm1, %v184_v24, 0.0  ;;  %v186_v37 = vmul.f32 %v92_v25, %v92_v25  ;;  %v54_v38 = vsub.f32 %v46_v26, %v50_v27  ;;  %v48_v39 = vadd.f32 %v279_v32, %v32_v33 }
   0x9   :  { %v187_v40 = vsel %vm97_vm0, %v183_v29, 0.0  ;;  %v185_v41 = vmul.f32 %v91_v30, %v91_v30  ;;  %v53_v42 = vsub.f32 %v45_v31, %v49_v34  ;;  %v47_v44 = vadd.f32 %v279_v32, %v31_v35 }
   0xa   :  { %v196_v46 = vsel %vm101_vm1, %v186_v37, 0.0  ;;  %v94_v47 = vmul.f32 %v54_v38, %v54_v38  ;;  %v56_v48 = vsub.f32 %v48_v39, %v52_v43  ;;  %v250_v2 = vshrl.u32 %v247_v60, 7 }
   0xb   :  { %153 = vadd.xlane.f32.xlu1 %v152_v23  ;;  %v193_v49 = vsel %vm97_vm0, %v185_v41, 0.0  ;;  %v93_v50 = vmul.f32 %v53_v42, %v53_v42  ;;  %v55_v51 = vsub.f32 %v47_v44, %v51_v45  ;;  %v253_v3 = vadd.s32 4294967288, %v248_v63 }
   0xc   :  { %147 = vadd.xlane.f32.xlu0 %v146_v28  ;;  %v102_v52 = vsel %vm101_vm1, %v94_v47, 0.0  ;;  %v96_v53 = vmul.f32 %v56_v48, %v56_v48  ;;  %v433_v8 = vsub.s32 %v248_v63, %v250_v2 }
   0xd   :  { %v98_v54 = vsel %vm97_vm0, %v93_v50, 0.0  ;;  %v95_v55 = vmul.f32 %v55_v51, %v55_v51  ;;  %v431_v7 = vsub.s32 %v253_v3, %v250_v2 }
   0xe   :  { %v108_v56 = vsel %vm101_vm1, %v96_v53, 0.0 }
   0xf   :  { %191 = vadd.xlane.f32.xlu1 %v190_v36  ;;  %v105_v57 = vsel %vm97_vm0, %v95_v55, 0.0 }
  0x10   :  { %188 = vadd.xlane.f32.xlu0 %v187_v40 }
  0x13   :  { %197 = vadd.xlane.f32.xlu1 %v196_v46 }
  0x14   :  { %194 = vadd.xlane.f32.xlu0 %v193_v49 }
  0x17   :  { %103 = vadd.xlane.f32.xlu1 %v102_v52 }
  0x18   :  { %99 = vadd.xlane.f32.xlu0 %v98_v54 }
  0x1b   :  { %109 = vadd.xlane.f32.xlu1 %v108_v56 }
  0x1c   :  { %106 = vadd.xlane.f32.xlu0 %v105_v57 }
  0x94   :  { %v409_v58 = vpop.xlane.xlu1 %150 }
  0x95   :  { %v411_v59 = vpop.xlane.xlu0 %144  ;;  %284 = vrsqrt.f32 %v409_v58  ;;  %vm171_vm2 = vcmp.eq.f32.partialorder %v409_v58, inf  ;;  %vm173_vm3 = vcmp.eq.f32.partialorder %v409_v58, 0.0  ;;  %v174_v10 = vand.u32 2147483648, %v409_v58 }
  0x96   :  { %286 = vrsqrt.f32 %v411_v59  ;;  %vm157_vm4 = vcmp.eq.f32.partialorder %v411_v59, inf  ;;  %v160_v11 = vand.u32 2147483648, %v411_v59  ;;  %vm159_vm5 = vcmp.eq.f32.partialorder %v411_v59, 0.0 }
  0x98   :  { %v414_v61 = vpop.xlane.xlu1 %153 }
  0x99   :  { %v417_v62 = vpop.xlane.xlu0 %147  ;;  %vm178_vm6 = vcmp.eq.f32.partialorder %v414_v61, inf  ;;  %v181_v14 = vand.u32 2147483648, %v414_v61  ;;  %vm180_vm11 = vcmp.eq.f32.partialorder %v414_v61, 0.0 }
  0x9a   :  { %288 = vrsqrt.f32 %v417_v62  ;;  %vm164_vm7 = vcmp.eq.f32.partialorder %v417_v62, inf  ;;  %vm166_vm8 = vcmp.eq.f32.partialorder %v417_v62, 0.0  ;;  %v167_v16 = vand.u32 2147483648, %v417_v62 }
  0x9b   :  { %290 = vrsqrt.f32 %v414_v61 }
  0x9c   :  { %v192_v0 = vpop.xlane.xlu1 %191 }
  0x9d   :  { %292 = vrsqrt.f32 %v192_v0  ;;  %v421_v1 = vpop.xlane.xlu0 %188  ;;  %vm208_vm9 = vcmp.eq.f32.partialorder %v192_v0, inf  ;;  %vm210_vm10 = vcmp.eq.f32.partialorder %v192_v0, 0.0  ;;  %v211_v22 = vand.u32 2147483648, %v192_v0 }
  0x9e   :  { %294 = vrsqrt.f32 %v421_v1  ;;  %vm201_vm12 = vcmp.eq.f32.partialorder %v421_v1, inf  ;;  %vm203_vm13 = vcmp.eq.f32.partialorder %v421_v1, 0.0  ;;  %v204_v23 = vand.u32 2147483648, %v421_v1 }
  0x9f   :  { %v285_v5 = vpop.eup %284 }
  0xa0   :  { %v424_v4 = vpop.xlane.xlu1 %197  ;;  %v287_v9 = vpop.eup %286  ;;  %v170_v13 = vmul.f32 %v285_v5, %v409_v58 }
  0xa1   :  { %296 = vrsqrt.f32 %v424_v4  ;;  %v427_v6 = vpop.xlane.xlu0 %194  ;;  %v156_v19 = vmul.f32 %v287_v9, %v411_v59  ;;  %vm222_vm14 = vcmp.eq.f32.partialorder %v424_v4, inf  ;;  %vm224_vm15 = vcmp.eq.f32.partialorder %v424_v4, 0.0 }
  0xa2   :  { %298 = vrsqrt.f32 %v427_v6  ;;  %v172_v25 = vsel %vm171_vm2, %v409_v58, %v170_v13  ;;  %v225_v30 = vand.u32 2147483648, %v424_v4  ;;  %vm215_vm0 = vcmp.eq.f32.partialorder %v427_v6, inf }
  0xa3   :  { %v158_v32 = vsel %vm157_vm4, %v411_v59, %v156_v19  ;;  %v175_v36 = vsel %vm173_vm3, %v174_v10, %v172_v25  ;;  %vm217_vm1 = vcmp.eq.f32.partialorder %v427_v6, 0.0  ;;  %v218_v42 = vand.u32 2147483648, %v427_v6 }
  0xa4   :  { %v289_v12 = vpop.eup %288  ;;  %v444_v15 = vpop.xlane.xlu1 %103  ;;  %v161_v43 = vsel %vm159_vm5, %v160_v11, %v158_v32 }
  0xa5   :  { %300 = vrsqrt.f32 %v444_v15  ;;  %v449_v17 = vpop.xlane.xlu0 %99  ;;  %v291_v18 = vpop.eup %290  ;;  %v163_v20 = vmul.f32 %v289_v12, %v417_v62  ;;  %vm120_vm2 = vcmp.eq.f32.partialorder %v444_v15, inf  ;;  %vm122_vm3 = vcmp.eq.f32.partialorder %v444_v15, 0.0 }
  0xa6   :  { %302 = vrsqrt.f32 %v449_v17  ;;  %v177_v28 = vmul.f32 %v291_v18, %v414_v61  ;;  %v123_v53 = vand.u32 2147483648, %v444_v15  ;;  %vm113_vm4 = vcmp.eq.f32.partialorder %v449_v17, inf }
  0xa7   :  { %v293_v21 = vpop.eup %292  ;;  %v165_v33 = vsel %vm164_vm7, %v417_v62, %v163_v20  ;;  %vm115_vm5 = vcmp.eq.f32.partialorder %v449_v17, 0.0  ;;  %v116_v59 = vand.u32 2147483648, %v449_v17 }
  0xa8   :  { %v295_v24 = vpop.eup %294  ;;  %v207_v26 = vmul.f32 %v293_v21, %v192_v0  ;;  %v463_v27 = vpop.xlane.xlu1 %109  ;;  %v179_v44 = vsel %vm178_vm6, %v414_v61, %v177_v28  ;;  %v168_v45 = vsel %vm166_vm8, %v167_v16, %v165_v33 }
  0xa9   :  { %v200_v29 = vmul.f32 %v295_v24, %v421_v1  ;;  %304 = vrsqrt.f32 %v463_v27  ;;  %v469_v31 = vpop.xlane.xlu0 %106  ;;  %v182_v55 = vsel %vm180_vm11, %v181_v14, %v179_v44  ;;  %vm134_vm6 = vcmp.eq.f32.partialorder %v463_v27, inf }
  0xaa   :  { %v209_v34 = vsel %vm208_vm9, %v192_v0, %v207_v26  ;;  %306 = vrsqrt.f32 %v469_v31  ;;  %vm136_vm7 = vcmp.eq.f32.partialorder %v463_v27, 0.0  ;;  %v137_v10 = vand.u32 2147483648, %v463_v27 }
  0xab   :  { %v297_v35 = vpop.eup %296  ;;  %v212_v37 = vsel %vm210_vm10, %v211_v22, %v209_v34  ;;  %v202_v38 = vsel %vm201_vm12, %v421_v1, %v200_v29  ;;  %vm127_vm8 = vcmp.eq.f32.partialorder %v469_v31, inf  ;;  %vm129_vm9 = vcmp.eq.f32.partialorder %v469_v31, 0.0 }
  0xac   :  { %v299_v39 = vpop.eup %298  ;;  %v205_v40 = vsel %vm203_vm13, %v204_v23, %v202_v38  ;;  %v221_v41 = vmul.f32 %v297_v35, %v424_v4  ;;  %v228_v47 = vsub.f32 %v168_v45, %v212_v37  ;;  %v130_v16 = vand.u32 2147483648, %v469_v31 }
  0xad   :  { %v214_v46 = vmul.f32 %v299_v39, %v427_v6  ;;  %v227_v50 = vsub.f32 %v161_v43, %v205_v40  ;;  %vm258_vm10 = vcmask 130112   ;;  %vm269_vm11 = vcmask 1041409  }
  0xae   :  { %v223_v48 = vsel %vm222_vm14, %v424_v4, %v221_v41  ;;  %v232_v60 = vmul.f32 0.1, %v228_v47  ;;  %vm272_vm12 = vcmask 91136  }
  0xaf   :  { %v301_v49 = vpop.eup %300  ;;  %v226_v51 = vsel %vm224_vm15, %v225_v30, %v223_v48  ;;  %v216_v52 = vsel %vm215_vm0, %v427_v6, %v214_v46  ;;  %v231_v1 = vmul.f32 0.1, %v227_v50 }
  0xb0   :  { %v303_v54 = vpop.eup %302  ;;  %v219_v56 = vsel %vm217_vm1, %v218_v42, %v216_v52  ;;  %v119_v57 = vmul.f32 %v301_v49, %v444_v15  ;;  %v230_v62 = vsub.f32 %v182_v55, %v226_v51 }
  0xb1   :  { %v112_v58 = vmul.f32 %v303_v54, %v449_v17  ;;  %v229_v63 = vsub.f32 %v175_v36, %v219_v56 }
  0xb2   :  { %v121_v61 = vsel %vm120_vm2, %v444_v15, %v119_v57  ;;  %v234_v13 = vmul.f32 0.1, %v230_v62 }
  0xb3   :  { %v305_v0 = vpop.eup %304  ;;  %v124_v2 = vsel %vm122_vm3, %v123_v53, %v121_v61  ;;  %v114_v3 = vsel %vm113_vm4, %v449_v17, %v112_v58  ;;  %v233_v15 = vmul.f32 0.1, %v229_v63 }
  0xb4   :  { %v307_v4 = vpop.eup %306  ;;  %v236_v5 = vadd.f32 %v232_v60, %v124_v2  ;;  %v117_v6 = vsel %vm115_vm5, %v116_v59, %v114_v3  ;;  %v133_v9 = vmul.f32 %v305_v0, %v463_v27 }
  0xb5   :  { %v235_v11 = vadd.f32 %v231_v1, %v117_v6  ;;  %v126_v12 = vmul.f32 %v307_v4, %v469_v31 }
  0xb6   :  { %v135_v14 = vsel %vm134_vm6, %v463_v27, %v133_v9  ;;  %v240_v17 = vsub.f32 0.0, %v236_v5 }
  0xb7   :  { %v239_v18 = vsub.f32 0.0, %v235_v11  ;;  %v138_v19 = vsel %vm136_vm7, %v137_v10, %v135_v14  ;;  %v128_v20 = vsel %vm127_vm8, %v469_v31, %v126_v12 }
  0xb8   :  { %v238_v21 = vadd.f32 %v234_v13, %v138_v19  ;;  %v131_v22 = vsel %vm129_vm9, %v130_v16, %v128_v20  ;;  %v257_v25 = vrot.slane %v240_v17, %v431_v7 }
  0xb9   :  { %v237_v23 = vadd.f32 %v233_v15, %v131_v22  ;;  %v252_v26 = vrot.slane %v239_v18, %v433_v8 }
  0xba   :  { %v242_v24 = vsub.f32 0.0, %v238_v21 }
  0xbb   :  { %v241_v28 = vsub.f32 0.0, %v237_v23  ;;  %v259_v27 = vsel %vm258_vm10, %v257_v25, %v252_v26 }
  0xbc   :  { %v267_v29 = vrot.slane %v242_v24, %v431_v7 }
  0xbd   :  { %v263_v30 = vrot.slane %v241_v28, %v433_v8 }
  0xbf   :  { %v268_v32 = vsel %vm258_vm10, %v267_v29, %v263_v30 }
  0xc0   :  { %v270_v33 = vsel %vm269_vm11, %v268_v32, %v259_v27 }
  0xc1   :  { %273 = vst.msk [vmem:[%s552_s6] sm:$0x3] %vm272_vm12, %v270_v33 }

// kernel: metar_forward.3
= control target key start
LH: loop header
LB: loop body
LE: loop exit
PB: predicated region body
PF: predicated region fallthrough
CT: control target
= control target key end

     0   :  { %s2540_s19 = smov 0   ;;  %s3784_s0 = inlined_call_operand.vmem [shape: bf16[1,1280], index: 0, kind: input, shape index: {}]   ;;  %s3785_s1 = inlined_call_operand.vmem [shape: bf16[1,1280], index: 1, kind: input, shape index: {}]   ;;  %s3786_s2 = inlined_call_operand.vmem [shape: bf16[1,1280], index: 2, kind: input, shape index: {}]   ;;  %s3787_s3 = inlined_call_operand.vmem [shape: f32[128,3], index: 3, kind: input, shape index: {}]   ;;  %s3788_s4 = inlined_call_operand.vmem [shape: f32[128,1], index: 4, kind: input, shape index: {}]   ;;  %s3789_s5 = inlined_call_operand.vmem [shape: bf16[64,128], index: 5, kind: input, shape index: {}]   ;;  %s3790_s6 = inlined_call_operand.vmem [shape: f32[64,1], index: 6, kind: input, shape index: {}]   ;;  %s3791_s7 = inlined_call_operand.vmem [shape: bf16[32,64], index: 7, kind: input, shape index: {}]   ;;  %s3792_s8 = inlined_call_operand.vmem [shape: f32[32,1], index: 8, kind: input, shape index: {}]   ;;  %s3793_s9 = inlined_call_operand.vmem [shape: bf16[1,32], index: 9, kind: input, shape index: {}]   ;;  %s3794_s10 = inlined_call_operand.<no memory space> [shape: f32[1,1], index: 10, kind: input, shape index: {}]   ;;  %s3795_s11 = inlined_call_operand.vmem [shape: f32[1,1280], index: 11, kind: output, shape index: {}]  }
   0x1   :  { %v16_v0 = vstv %s3794_s10 }
   0x2   :  { %17 = vst [vmem:[#allocation2] sm:$0x1] %v16_v0 }
   0x3 LB: > { %s2329_s20 = sadd.s32 4294967295, %s2469_s19   ;;  %p2333_p0 = scmp.ge.s32.totalorder %s2469_s19, 1  ;;  %s2469_s19 = sphi %s2540_s19, %s23_s19  }
   0x4   : > { %p359_p1 = scmp.lt.s32.totalorder %s2469_s19, 3 }
   0x6   : > { %p360_p2 = pnand %p2333_p0, %p359_p1 }
   0x8   : > { %363 = sbr.rel (%p360_p2) target bundleno = 1053 (0x41d), region = 64 }
   0xf   : > { %v435_v1 = vld [vmem:[%s3787_s3] sm:$0xff]  ;;  %v3799_v2 = vmov 2   ;;  %v2472_v3 = vmov 1   ;;  %v437_v4 = vld [vmem:[%s3787_s3 + $0x10] sm:$0xff]  ;;  %v436_v5 = vld [vmem:[%s3787_s3 + $0x8] sm:$0xff]  ;;  %v3797_v6 = vmov 0   ;;  %v3796_v34 = vlaneseq }
  0x10   : > { %2431 = vset.pattern.permute.xlu0 %v3799_v2  ;;  %2430 = vset.pattern.permute.xlu1 %v2472_v3  ;;  %v440_v7 = vld [vmem:[%s3787_s3 + $0x28] sm:$0xff]  ;;  %v439_v8 = vld [vmem:[%s3787_s3 + $0x20] sm:$0xff]  ;;  %v442_v9 = vld [vmem:[%s3787_s3 + $0x38] sm:$0xff]  ;;  %s405_s15 = smul.u32 5, %s2329_s20  ;;  %vm1885_vm0 = vcmask 523264   ;;  %vm2088_vm1 = vcmask 261120  }
  0x11   : > { %930 = vperm.xlu0 %2431, %v435_v1   ;;  %659 = vperm.xlu1 %2430, %v435_v1   ;;  %v2577_v10 = vld [vmem:[%s3787_s3 + $0x48] sm:$0xff]  ;;  %v438_v11 = vld [vmem:[%s3787_s3 + $0x18] sm:$0xff]  ;;  %v1200_v15 = vld [vmem:[%s3788_s4] sm:$0xff]  ;;  %v2687_v36 = vshrl.u32 %v3796_v34, 7  ;;  %vm2475_vm2 = vmmov 0  }
  0x12   : > { %1608 = vmatprep.mubr.bf16.mxu0 %v3797_v6  ;;  %1681 = vmatprep.mubr.bf16.mxu1 %v3797_v6  ;;  %v2586_v12 = vld [vmem:[%s3787_s3 + $0x58] sm:$0xff]  ;;  %v2592_v13 = vld [vmem:[%s3787_s3 + $0x68] sm:$0xff]  ;;  %v441_v17 = vld [vmem:[%s3787_s3 + $0x30] sm:$0xff]  ;;  %p406_p3 = scmp.lt.s32.totalorder %s405_s15, 9 }
  0x13   : > { %v2599_v14 = vld [vmem:[%s3787_s3 + $0x78] sm:$0xff]  ;;  %v1201_v16 = vld [vmem:[%s3788_s4 + $0x8] sm:$0xff]  ;;  %v1202_v18 = vld [vmem:[%s3788_s4 + $0x10] sm:$0xff]  ;;  %3857 = vst [vmem:[#allocation3_spill] sm:$0xff] %v2687_v36  ;;  %v2698_v40 = vsub.s32 0, %v2687_v36 }
  0x14   : > { %v1204_v19 = vld [vmem:[%s3788_s4 + $0x20] sm:$0xff]  ;;  %v1203_v20 = vld [vmem:[%s3788_s4 + $0x18] sm:$0xff]  ;;  %v1206_v21 = vld [vmem:[%s3788_s4 + $0x30] sm:$0xff]  ;;  %s3997_s15 = smov (!%p406_p3, %s405_s15), 9 }
  0x15   : > { %938 = vperm.xlu0 %2431, %v437_v4   ;;  %663 = vperm.xlu1 %2430, %v436_v5   ;;  %v1208_v22 = vld [vmem:[%s3788_s4 + $0x40] sm:$0xff]  ;;  %v1210_v23 = vld [vmem:[%s3788_s4 + $0x50] sm:$0xff]  ;;  %v1205_v24 = vld [vmem:[%s3788_s4 + $0x28] sm:$0xff]  ;;  %s413_s28 = scalar_lea.vmem %s3785_s1, %s3997_s15  ;;  %s418_s14 = scalar_lea.vmem %s3786_s2, %s3997_s15  ;;  %3858 = vst [vmem:[#allocation4_spill] sm:$0xff] %v2698_v40 }
  0x16   : > { %v443_v25 = vld [vmem:[%s3787_s3 + $0x40] sm:$0xff]  ;;  %v1215_v27 = vld [vmem:[%s3788_s4 + $0x78] sm:$0xff]  ;;  %v1505_v28 = vld [vmem:[%s3790_s6 + $0x8] sm:$0xff]  ;;  %s408_s22 = scalar_lea.vmem %s3784_s0, %s3997_s15  ;;  %s423_s25 = scalar_lea.vmem %s3795_s11, %s3997_s15 }
  0x17   : > { %v1212_v26 = vld [vmem:[%s3788_s4 + $0x60] sm:$0xff]  ;;  %v1507_v29 = vld [vmem:[%s3790_s6 + $0x18] sm:$0xff]  ;;  %v1509_v31 = vld [vmem:[%s3790_s6 + $0x28] sm:$0xff] }
  0x18   : > { %v1207_v30 = vld [vmem:[%s3788_s4 + $0x38] sm:$0xff]  ;;  %v445_v32 = vld [vmem:[%s3787_s3 + $0x50] sm:$0xff]  ;;  %v1852_v35 = vld [vmem:[%s3792_s8 + $0x8] sm:$0xff] }
  0x19   : > { %950 = vperm.xlu0 %2431, %v440_v7   ;;  %2432 = vset.pattern.permute.xlu1 %v3799_v2  ;;  %v1511_v33 = vld [vmem:[%s3790_s6 + $0x38] sm:$0xff]  ;;  %v429_v37 = vld [vmem:[%s413_s28] sm:$0x1f]  ;;  %v1209_v47 = vld [vmem:[%s3788_s4 + $0x48] sm:$0xff] }
  0x1a   : > { %934 = vperm.xlu1 %2432, %v436_v5   ;;  %v1854_v38 = vld [vmem:[%s3792_s8 + $0x18] sm:$0xff]  ;;  %v432_v39 = vld [vmem:[%s418_s14] sm:$0x1f]  ;;  %v431_v41 = vunpack.c.h.bf16 %v429_v37 }
  0x1b   : > { %v434_v42 = vunpack.c.h.bf16 %v432_v39  ;;  %v426_v52 = vld [vmem:[%s408_s22] sm:$0x1f] }
  0x1c   : > { %v743_v43 = vrot.slane %v431_v41, %v2698_v40  ;;  %v447_v53 = vld [vmem:[%s3787_s3 + $0x60] sm:$0xff]  ;;  %v428_v56 = vunpack.c.h.bf16 %v426_v52 }
  0x1d   : > { %2439 = vset.pattern.permute.xlu0 %v2472_v3  ;;  %v1014_v44 = vrot.slane %v434_v42, %v2698_v40 }
  0x1e   : > { %675 = vperm.xlu0 %2439, %v439_v8   ;;  %2433 = vset.pattern.permute.xlu1 %v3797_v6  ;;  %v2705_v45 = vrot.slane %v743_v43, %v2698_v40  ;;  %v552_v60 = vrot.slane %v428_v56, %v2698_v40 }
  0x1f   : > { %463 = vperm.xlu1 %2433, %v437_v4   ;;  %v2712_v46 = vrot.slane %v1014_v44, %v2698_v40 }
  0x20   : > { %v2758_v0 = vrot.slane %v552_v60, %v2698_v40 }
  0x21   : > { %3859 = vst [vmem:[#allocation5_spill] sm:$0xff] %v2712_v46 }
  0x22   : > { %687 = vperm.xlu0 %2439, %v442_v9  }
  0x23   : > { %2434 = vset.pattern.permute.xlu1 %v2472_v3 }
  0x24   : > { %667 = vperm.xlu1 %2434, %v437_v4  }
  0x26   : > { %695 = vperm.xlu0 %2439, %v2577_v10  }
  0x28   : > { %671 = vperm.xlu1 %2434, %v438_v11  }
  0x2a   : > { %703 = vperm.xlu0 %2439, %v2586_v12  }
  0x2c   : > { %2435 = vset.pattern.permute.xlu1 %v3799_v2 }
  0x2d   : > { %942 = vperm.xlu1 %2435, %v438_v11  }
  0x2e   : > { %711 = vperm.xlu0 %2439, %v2592_v13  }
  0x31   : > { %2436 = vset.pattern.permute.xlu1 %v3797_v6 }
  0x32   : > { %719 = vperm.xlu0 %2439, %v2599_v14   ;;  %1218 = vperm.xlu1 %2436, %v1200_v15  }
  0x36   : > { %2454 = vset.pattern.permute.xlu0 %v3797_v6  ;;  %473 = vperm.xlu1 %2436, %v439_v8  }
  0x37   : > { %453 = vperm.xlu0 %2454, %v435_v1  }
  0x3a   : > { %478 = vperm.xlu1 %2436, %v440_v7  }
  0x3b   : > { %458 = vperm.xlu0 %2454, %v436_v5  }
  0x3e   : > { %2437 = vset.pattern.permute.xlu1 %v2472_v3 }
  0x3f   : > { %468 = vperm.xlu0 %2454, %v438_v11   ;;  %679 = vperm.xlu1 %2437, %v440_v7   ;;  %v543_v11 = vsub.s32 4, %v2687_v36 }
  0x43   : > { %1223 = vperm.xlu0 %2454, %v1201_v16   ;;  %2438 = vset.pattern.permute.xlu1 %v3799_v2 }
  0x44   : > { %946 = vperm.xlu1 %2438, %v439_v8  }
  0x47   : > { %483 = vperm.xlu0 %2454, %v441_v17  }
  0x48   : > { %2440 = vset.pattern.permute.xlu1 %v3797_v6 }
  0x49   : > { %1228 = vperm.xlu1 %2440, %v1202_v18   ;;  %v547_v18 = vsub.s32 6, %v2687_v36 }
  0x4b   : > { %1238 = vperm.xlu0 %2454, %v1204_v19   ;;  %v1211_v19 = vld [vmem:[%s3788_s4 + $0x58] sm:$0xff] }
  0x4d   : > { %1233 = vperm.xlu1 %2440, %v1203_v20   ;;  %v433_v20 = vunpack.c.l.bf16 %v432_v39 }
  0x4f   : > { %498 = vperm.xlu0 %2454, %v2577_v10  }
  0x51   : > { %488 = vperm.xlu1 %2440, %v442_v9  }
  0x53   : > { %1248 = vperm.xlu0 %2454, %v1206_v21  }
  0x55   : > { %2441 = vset.pattern.permute.xlu1 %v2472_v3 }
  0x56   : > { %683 = vperm.xlu1 %2441, %v441_v17  }
  0x57   : > { %508 = vperm.xlu0 %2454, %v2586_v12  }
  0x5a   : > { %2442 = vset.pattern.permute.xlu1 %v3799_v2 }
  0x5b   : > { %954 = vperm.xlu1 %2442, %v441_v17   ;;  %1258 = vperm.xlu0 %2454, %v1208_v22   ;;  %v539_v17 = vsub.s32 2, %v2687_v36  ;;  %v427_v22 = vunpack.c.l.bf16 %v426_v52 }
  0x5d   : > { %v540_v39 = vrot.slane %v427_v22, %v539_v17  ;;  %v544_v44 = vrot.slane %v427_v22, %v543_v11 }
  0x5f   : > { %958 = vperm.xlu1 %2442, %v442_v9   ;;  %518 = vperm.xlu0 %2454, %v2592_v13  }
  0x63   : > { %2443 = vset.pattern.permute.xlu1 %v3797_v6  ;;  %1268 = vperm.xlu0 %2454, %v1210_v23  }
  0x64   : > { %1243 = vperm.xlu1 %2443, %v1205_v24  }
  0x67   : > { %528 = vperm.xlu0 %2454, %v2599_v14  }
  0x68   : > { %493 = vperm.xlu1 %2443, %v443_v25  }
  0x6b   : > { %1278 = vperm.xlu0 %2454, %v1212_v26  }
  0x6c   : > { %2444 = vset.pattern.permute.xlu1 %v2472_v3 }
  0x6d   : > { %691 = vperm.xlu1 %2444, %v443_v25  }
  0x6f   : > { %1293 = vperm.xlu0 %2454, %v1215_v27  }
  0x71   : > { %2445 = vset.pattern.permute.xlu1 %v3799_v2 }
  0x72   : > { %962 = vperm.xlu1 %2445, %v443_v25  }
  0x73   : > { %1519 = vperm.xlu0 %2454, %v1505_v28  }
  0x76   : > { %966 = vperm.xlu1 %2445, %v2577_v10  }
  0x77   : > { %1529 = vperm.xlu0 %2454, %v1507_v29   ;;  %v449_v29 = vld [vmem:[%s3787_s3 + $0x70] sm:$0xff] }
  0x7a   : > { %2446 = vset.pattern.permute.xlu1 %v3797_v6 }
  0x7b   : > { %1253 = vperm.xlu1 %2446, %v1207_v30   ;;  %1539 = vperm.xlu0 %2454, %v1509_v31   ;;  %v998_v30 = vrot.slane %v433_v20, %v2698_v40  ;;  %v1002_v31 = vrot.slane %v433_v20, %v539_v17 }
  0x7f   : > { %503 = vperm.xlu1 %2446, %v445_v32   ;;  %1549 = vperm.xlu0 %2454, %v1511_v33  }
  0x83   : > { %2447 = vset.pattern.permute.xlu1 %v2472_v3  ;;  %1862 = vperm.xlu0 %2454, %v1852_v35   ;;  %v1006_v35 = vrot.slane %v433_v20, %v543_v11 }
  0x84   : > { %699 = vperm.xlu1 %2447, %v445_v32  }
  0x87   : > { %1872 = vperm.xlu0 %2454, %v1854_v38   ;;  %v536_v38 = vrot.slane %v427_v22, %v2698_v40 }
  0x88   : > { %2448 = vset.pattern.permute.xlu1 %v3799_v2 }
  0x89   : > { %970 = vperm.xlu1 %2448, %v445_v32  }
  0x8d   : > { %974 = vperm.xlu1 %2448, %v2586_v12   ;;  %v430_v12 = vunpack.c.l.bf16 %v429_v37  ;;  %v1010_v37 = vrot.slane %v433_v20, %v547_v18  ;;  %v2855_v20 = vrot.slane %v540_v39, %v2698_v40 }
  0x8f   : > { %v727_v23 = vrot.slane %v430_v12, %v2698_v40  ;;  %v735_v24 = vrot.slane %v430_v12, %v543_v11  ;;  %v731_v27 = vrot.slane %v430_v12, %v539_v17  ;;  %v739_v28 = vrot.slane %v430_v12, %v547_v18  ;;  %3883 = vst [vmem:[#allocation29_spill] sm:$0xff] %v2855_v20 }
  0x90   : > { %v2717_v48 = vpop.permute.xlu1 %659  ;;  %v2719_v49 = vpop.permute.xlu0 %930  ;;  %v2837_v12 = vrot.slane %v1002_v31, %v2698_v40  ;;  %v2846_v17 = vrot.slane %v1006_v35, %v2698_v40 }
  0x91   : > { %v2723_v50 = vmul.f32 %v2705_v45, %v2717_v48  ;;  %2449 = vset.pattern.permute.xlu1 %v3797_v6  ;;  %v2728_v51 = vmul.f32 %v2712_v46, %v2719_v49  ;;  %v2816_v42 = vrot.slane %v727_v23, %v2698_v40  ;;  %v2819_v43 = vrot.slane %v735_v24, %v2698_v40 }
  0x92   : > { %1263 = vperm.xlu1 %2449, %v1209_v47   ;;  %v548_v47 = vrot.slane %v427_v22, %v547_v18  ;;  %v2827_v56 = vrot.slane %v739_v28, %v2698_v40  ;;  %v2849_v18 = vrot.slane %v1010_v37, %v2698_v40  ;;  %v1041_v31 = vmul.f32 %v2837_v12, %v2719_v49 }
  0x93   : > { %3860 = vst [vmem:[#allocation6_spill] sm:$0xff] %v2723_v50  ;;  %3861 = vst [vmem:[#allocation7_spill] sm:$0xff] %v2728_v51  ;;  %v769_v22 = vmul.f32 %v2816_v42, %v2717_v48  ;;  %v771_v23 = vmul.f32 %v2819_v43, %v2717_v48  ;;  %v2892_v39 = vmul.f32 %v2846_v17, %v2719_v49 }
  0x94   : > { %v2733_v54 = vpop.permute.xlu1 %663  ;;  %v2735_v55 = vpop.permute.xlu0 %938  ;;  %3874 = vst [vmem:[#allocation20_spill] sm:$0xff] %v2816_v42  ;;  %3875 = vst [vmem:[#allocation21_spill] sm:$0xff] %v2819_v43  ;;  %v2865_v24 = vrot.slane %v548_v47, %v2698_v40  ;;  %v1043_v35 = vmul.f32 %v2849_v18, %v2719_v49 }
  0x95   : > { %v2739_v57 = vmul.f32 %v2705_v45, %v2733_v54  ;;  %v1054_v58 = vmul.f32 %v2712_v46, %v2735_v55  ;;  %3878 = vst [vmem:[#allocation24_spill] sm:$0xff] %v2827_v56  ;;  %v1051_v47 = vmul.f32 %v2837_v12, %v2735_v55  ;;  %v2904_v34 = vmul.f32 %v2846_v17, %v2735_v55 }
  0x96   : > { %513 = vperm.xlu1 %2449, %v447_v53  }
  0x97   : > { %3862 = vst [vmem:[#allocation8_spill] sm:$0xff] %v2739_v57 }
  0x98   : > { %v2743_v59 = vpop.permute.xlu0 %950 }
  0x99   : > { %v2746_v61 = vpop.permute.xlu1 %934  ;;  %v2754_v63 = vmul.f32 %v2712_v46, %v2743_v59 }
  0x9a   : > { %v2750_v62 = vmul.f32 %v2712_v46, %v2746_v61  ;;  %2450 = vset.pattern.permute.xlu1 %v2472_v3  ;;  %v1046_v36 = vmul.f32 %v2837_v12, %v2746_v61 }
  0x9b   : > { %3864 = vst [vmem:[#allocation10_spill] sm:$0xff] %v2754_v63  ;;  %707 = vperm.xlu1 %2450, %v447_v53  }
  0x9c   : > { %3863 = vst [vmem:[#allocation9_spill] sm:$0xff] %v2750_v62 }
  0x9d   : > { %v2760_v1 = vpop.permute.xlu0 %675 }
  0x9e   : > { %3865 = vst [vmem:[#allocation11_spill] sm:$0xff] %v2760_v1  ;;  %v2762_v4 = vpop.permute.xlu1 %463  ;;  %v2766_v5 = vmul.f32 %v2705_v45, %v2760_v1 }
  0x9f   : > { %2451 = vset.pattern.permute.xlu1 %v3799_v2  ;;  %v592_v7 = vmul.f32 %v2758_v0, %v2762_v4  ;;  %v589_v63 = vmul.f32 %v2855_v20, %v2762_v4 }
  0xa0   : > { %3866 = vst [vmem:[#allocation12_spill] sm:$0xff] %v2766_v5  ;;  %978 = vperm.xlu1 %2451, %v447_v53   ;;  %v2824_v53 = vrot.slane %v731_v27, %v2698_v40  ;;  %v591_v5 = vmul.f32 %v2865_v24, %v2762_v4 }
  0xa1   : > { %v2771_v8 = vpop.permute.xlu0 %687 }
  0xa2   : > { %3867 = vst [vmem:[#allocation13_spill] sm:$0xff] %v2771_v8  ;;  %v2775_v9 = vmul.f32 %v2705_v45, %v2771_v8  ;;  %3877 = vst [vmem:[#allocation23_spill] sm:$0xff] %v2824_v53 }
  0xa3   : > { %v2777_v10 = vpop.permute.xlu1 %667 }
  0xa4   : > { %3868 = vst [vmem:[#allocation14_spill] sm:$0xff] %v2775_v9  ;;  %982 = vperm.xlu1 %2451, %v2592_v13   ;;  %v783_v15 = vmul.f32 %v2705_v45, %v2777_v10  ;;  %v781_v51 = vmul.f32 %v2819_v43, %v2777_v10 }
  0xa5   : > { %v2783_v16 = vpop.permute.xlu0 %695 }
  0xa6   : > { %3869 = vst [vmem:[#allocation15_spill] sm:$0xff] %v2783_v16  ;;  %v2792_v13 = vmul.f32 %v2705_v45, %v2783_v16  ;;  %v863_v33 = vadd.f32 %v783_v15, %v592_v7  ;;  %v2834_v7 = vrot.slane %v998_v30, %v2698_v40  ;;  %v770_v30 = vmul.f32 %v2824_v53, %v2717_v48 }
  0xa7   : > { %v2794_v21 = vpop.permute.xlu1 %671 }
  0xa8   : > { %3870 = vst [vmem:[#allocation16_spill] sm:$0xff] %v2792_v13  ;;  %2452 = vset.pattern.permute.xlu1 %v3797_v6  ;;  %v2800_v25 = vmul.f32 %v2705_v45, %v2794_v21  ;;  %v2843_v15 = vadd.f32 %v1054_v58, %v863_v33  ;;  %v2862_v58 = vrot.slane %v544_v44, %v2698_v40 }
  0xa9   : > { %1273 = vperm.xlu1 %2452, %v1211_v19   ;;  %v2802_v26 = vpop.permute.xlu0 %703  ;;  %v2852_v19 = vrot.slane %v536_v38, %v2698_v40  ;;  %v772_v33 = vmul.f32 %v2827_v56, %v2717_v48  ;;  %v1040_v38 = vmul.f32 %v2834_v7, %v2719_v49  ;;  %v776_v48 = vmul.f32 %v2819_v43, %v2733_v54 }
  0xaa   : > { %3871 = vst [vmem:[#allocation17_spill] sm:$0xff] %v2800_v25  ;;  %3872 = vst [vmem:[#allocation18_spill] sm:$0xff] %v2802_v26  ;;  %v2810_v32 = vmul.f32 %v2705_v45, %v2802_v26  ;;  %v2898_v44 = vmul.f32 %v2834_v7, %v2735_v55  ;;  %v1053_v6 = vmul.f32 %v2849_v18, %v2735_v55 }
  0xab   : > { %3881 = vst [vmem:[#allocation27_spill] sm:$0xff] %v2843_v15  ;;  %3882 = vst [vmem:[#allocation28_spill] sm:$0xff] %v2852_v19  ;;  %v775_v49 = vmul.f32 %v2824_v53, %v2733_v54  ;;  %v777_v40 = vmul.f32 %v2827_v56, %v2733_v54  ;;  %v2923_v55 = vmul.f32 %v2849_v18, %v2746_v61 }
  0xac   : > { %3873 = vst [vmem:[#allocation19_spill] sm:$0xff] %v2810_v32  ;;  %v2813_v41 = vpop.permute.xlu1 %942  ;;  %3884 = vst [vmem:[#allocation30_spill] sm:$0xff] %v2862_v58  ;;  %v2927_v32 = vmul.f32 %v2834_v7, %v2746_v61 }
  0xad   : > { %523 = vperm.xlu1 %2452, %v449_v29   ;;  %v2821_v52 = vpop.permute.xlu0 %711  ;;  %v2831_v60 = vmul.f32 %v2712_v46, %v2813_v41 }
  0xae   : > { %3876 = vst [vmem:[#allocation22_spill] sm:$0xff] %v2821_v52  ;;  %v2841_v11 = vmul.f32 %v2705_v45, %v2821_v52  ;;  %v782_v52 = vmul.f32 %v2827_v56, %v2777_v10 }
  0xaf   : > { %3879 = vst [vmem:[#allocation25_spill] sm:$0xff] %v2831_v60  ;;  %v588_v60 = vmul.f32 %v2852_v19, %v2762_v4 }
  0xb0   : > { %3880 = vst [vmem:[#allocation26_spill] sm:$0xff] %v2841_v11  ;;  %v3888_v11 = vmov 2   ;;  %v862_v26 = vadd.f32 %v782_v52, %v591_v5  ;;  %v2972_v5 = vmul.f32 %v2816_v42, %v2794_v21  ;;  %v785_v52 = vmul.f32 %v2824_v53, %v2794_v21 }
  0xb1   : > { %2453 = vset.pattern.permute.xlu1 %v2472_v3  ;;  %v2868_v27 = vpop.permute.xlu1 %1218  ;;  %v2870_v28 = vpop.permute.xlu0 %719  ;;  %v2882_v3 = vmul.f32 %v2816_v42, %v2733_v54 }
  0xb2   : > { %3885 = vst [vmem:[#allocation31_spill] sm:$0xff] %v2870_v28  ;;  %715 = vperm.xlu1 %2453, %v449_v29   ;;  %v2886_v37 = vmul.f32 %v2705_v45, %v2870_v28  ;;  %v780_v28 = vmul.f32 %v2824_v53, %v2777_v10 }
  0xb4   : > { %3886 = vst [vmem:[#allocation32_spill] sm:$0xff] %v2886_v37 }
  0xb5   : > { %v2908_v2 = vpop.permute.xlu1 %473 }
  0xb6   : > { %3887 = vst [vmem:[#allocation33_spill] sm:$0xff] %v2908_v2  ;;  %v454_v37 = vpop.permute.xlu0 %453  ;;  %2455 = vset.pattern.permute.xlu1 %v3888_v11  ;;  %v2931_v54 = vmul.f32 %v2758_v0, %v2908_v2  ;;  %v2939_v11 = vmul.f32 %v2846_v17, %v2746_v61  ;;  %v779_v61 = vmul.f32 %v2816_v42, %v2777_v10 }
  0xb7   : > { %v578_v13 = vmul.f32 %v2852_v19, %v454_v37  ;;  %v2935_v9 = vmul.f32 %v2758_v0, %v454_v37  ;;  %986 = vperm.xlu1 %2455, %v449_v29   ;;  %v579_v15 = vmul.f32 %v2855_v20, %v454_v37  ;;  %v590_v29 = vmul.f32 %v2862_v58, %v2762_v4 }
  0xb8   : > { %3889 = vst [vmem:[#allocation34_spill] sm:$0xff] %v2931_v54  ;;  %v581_v54 = vmul.f32 %v2865_v24, %v454_v37  ;;  %v580_v25 = vmul.f32 %v2862_v58, %v454_v37 }
  0xb9   : > { %3890 = vst [vmem:[#allocation35_spill] sm:$0xff] %v2935_v9  ;;  %v2954_v62 = vpop.permute.xlu1 %478  ;;  %v849_v50 = vadd.f32 %v769_v22, %v578_v13  ;;  %v860_v9 = vadd.f32 %v780_v28, %v589_v63  ;;  %v850_v10 = vadd.f32 %v770_v30, %v579_v15  ;;  %v1213_v22 = vld [vmem:[%s3788_s4 + $0x68] sm:$0xff] }
  0xba   : > { %3891 = vst [vmem:[#allocation36_spill] sm:$0xff] %v2954_v62  ;;  %v459_v57 = vpop.permute.xlu0 %458  ;;  %v2960_v16 = vmul.f32 %v2758_v0, %v2954_v62  ;;  %v852_v63 = vadd.f32 %v772_v33, %v581_v54  ;;  %v851_v28 = vadd.f32 %v771_v23, %v580_v25 }
  0xbb   : > { %v583_v4 = vmul.f32 %v2852_v19, %v459_v57  ;;  %v585_v2 = vmul.f32 %v2862_v58, %v459_v57  ;;  %v2965_v8 = vmul.f32 %v2758_v0, %v459_v57  ;;  %990 = vperm.xlu1 %2455, %v2599_v14   ;;  %v584_v37 = vmul.f32 %v2855_v20, %v459_v57 }
  0xbc   : > { %3892 = vst [vmem:[#allocation37_spill] sm:$0xff] %v2960_v16  ;;  %v586_v13 = vmul.f32 %v2865_v24, %v459_v57  ;;  %v859_v16 = vadd.f32 %v779_v61, %v588_v60  ;;  %v2981_v14 = vmul.f32 %v2819_v43, %v2794_v21  ;;  %v787_v57 = vmul.f32 %v2827_v56, %v2794_v21 }
  0xbd   : > { %3893 = vst [vmem:[#allocation38_spill] sm:$0xff] %v2965_v8  ;;  %v855_v33 = vadd.f32 %v775_v49, %v584_v37  ;;  %v1121_v54 = vadd.f32 %v1041_v31, %v850_v10  ;;  %v3894_v8 = vmov 0   ;;  %v1123_v53 = vadd.f32 %v1043_v35, %v852_v63  ;;  %v1214_v31 = vld [vmem:[%s3788_s4 + $0x70] sm:$0xff] }
  0xbe   : > { %v469_v15 = vpop.permute.xlu0 %468  ;;  %v2985_v30 = vpop.permute.xlu1 %679  ;;  %v857_v62 = vadd.f32 %v777_v40, %v586_v13  ;;  %v1120_v42 = vadd.f32 %v1040_v38, %v849_v50  ;;  %v1131_v1 = vadd.f32 %v1051_v47, %v860_v9  ;;  %v854_v60 = vadd.f32 %v2882_v3, %v583_v4 }
  0xbf   : > { %2456 = vset.pattern.permute.xlu1 %v3894_v8  ;;  %v2989_v25 = vmul.f32 %v2758_v0, %v469_v15  ;;  %v856_v23 = vadd.f32 %v776_v48, %v585_v2  ;;  %v1133_v61 = vadd.f32 %v1053_v6, %v862_v26  ;;  %v2994_v21 = vmul.f32 %v2705_v45, %v2985_v30 }
  0xc0   : > { %1283 = vperm.xlu1 %2456, %v1213_v22   ;;  %v1126_v40 = vadd.f32 %v1046_v36, %v855_v33  ;;  %v1122_v50 = vadd.f32 %v2892_v39, %v851_v28  ;;  %v1130_v9 = vadd.f32 %v2898_v44, %v859_v16  ;;  %v1055_v35 = vmul.f32 %v2834_v7, %v2813_v41 }
  0xc1   : > { %3895 = vst [vmem:[#allocation39_spill] sm:$0xff] %v2994_v21  ;;  %v1056_v2 = vmul.f32 %v2837_v12, %v2813_v41  ;;  %v1297_v26 = vadd.f32 %v2868_v27, %v1121_v54  ;;  %v3008_v3 = vadd.f32 %v781_v51, %v590_v29  ;;  %v1128_v39 = vadd.f32 %v2923_v55, %v857_v62  ;;  %v1504_v62 = vld [vmem:[%s3790_s6] sm:$0xff] }
  0xc2   : > { %v3005_v6 = vpop.permute.xlu0 %1223  ;;  %v1299_v16 = vadd.f32 %v2868_v27, %v1123_v53  ;;  %v1296_v48 = vadd.f32 %v2868_v27, %v1120_v42  ;;  %v594_v44 = vmul.f32 %v2855_v20, %v469_v15  ;;  %v596_v47 = vmul.f32 %v2865_v24, %v469_v15 }
  0xc3   : > { %3896 = vst [vmem:[#allocation40_spill] sm:$0xff] %v3005_v6  ;;  %v3010_v38 = vpop.permute.xlu1 %946  ;;  %v1302_v36 = vadd.f32 %v3005_v6, %v1126_v40  ;;  %v1125_v49 = vadd.f32 %v2927_v32, %v854_v60  ;;  %v1127_v51 = vadd.f32 %v2939_v11, %v856_v23  ;;  %v1304_v42 = vadd.f32 %v3005_v6, %v1128_v39 }
  0xc4   : > { %1288 = vperm.xlu1 %2456, %v1214_v31   ;;  %v3022_v29 = vmul.f32 %v2712_v46, %v3010_v38  ;;  %v1298_v55 = vadd.f32 %v2868_v27, %v1122_v50  ;;  %v593_v4 = vmul.f32 %v2852_v19, %v469_v15  ;;  %v1377_v32 = vmax.f32 %v1297_v26, 0.0 }
  0xc5   : > { %v1382_v53 = vmax.f32 %v1302_v36, 0.0  ;;  %v1301_v11 = vadd.f32 %v3005_v6, %v1125_v49  ;;  %v1303_v10 = vadd.f32 %v3005_v6, %v1127_v51  ;;  %v1058_v13 = vmul.f32 %v2849_v18, %v2813_v41 }
  0xc6   : > { %3897 = vst [vmem:[#allocation41_spill] sm:$0xff] %v3022_v29  ;;  %v3030_v37 = vpop.permute.xlu0 %483  ;;  %v595_v63 = vmul.f32 %v2862_v58, %v469_v15  ;;  %v1379_v22 = vmax.f32 %v1299_v16, 0.0  ;;  %v1376_v28 = vmax.f32 %v1296_v48, 0.0  ;;  %v1384_v23 = vmax.f32 %v1304_v42, 0.0  ;;  %v1506_v16 = vld [vmem:[%s3790_s6 + $0x10] sm:$0xff] }
  0xc7   : > { %v3039_v33 = vmul.f32 %v2758_v0, %v3030_v37  ;;  %v1465_v60 = vpack.c.bf16 %v1382_v53, %v1377_v32  ;;  %v1381_v31 = vmax.f32 %v1301_v11, 0.0  ;;  %v1378_v40 = vmax.f32 %v1298_v55, 0.0 }
  0xc8   : > { %1514 = vperm.xlu1 %2456, %v1504_v62   ;;  %v3041_v54 = vpop.permute.xlu1 %1228  ;;  %v1383_v50 = vmax.f32 %v1303_v10, 0.0  ;;  %v865_v26 = vadd.f32 %v785_v52, %v594_v44  ;;  %v867_v36 = vadd.f32 %v787_v57, %v596_v47  ;;  %v1467_v39 = vpack.c.bf16 %v1384_v23, %v1379_v22 }
  0xc9   : > { %3898 = vst [vmem:[#allocation42_spill] sm:$0xff] %v3039_v33  ;;  %3899 = vst [vmem:[#allocation43_spill] sm:$0xff] %v3041_v54  ;;  %1576 = vmatprep.subr.bf16.mxu0 %v1465_v60  ;;  %v1464_v15 = vpack.c.bf16 %v1381_v31, %v1376_v28  ;;  %v1307_v48 = vadd.f32 %v3041_v54, %v1131_v1  ;;  %v864_v51 = vadd.f32 %v2972_v5, %v593_v4 }
  0xca   : > { %v3043_v49 = vpop.permute.xlu0 %1238  ;;  %v1466_v62 = vpack.c.bf16 %v1383_v50, %v1378_v40  ;;  %v1136_v53 = vadd.f32 %v1056_v2, %v865_v26  ;;  %v1138_v42 = vadd.f32 %v1058_v13, %v867_v36  ;;  %v1309_v55 = vadd.f32 %v3041_v54, %v1133_v61  ;;  %1649 = vmatprep.subr.bf16.mxu1 %v1467_v39  ;;  %v1508_v61 = vld [vmem:[%s3790_s6 + $0x20] sm:$0xff] }
  0xcb   : > { %1577 = vmatpush1.bf16.msra.mxu0 %v1464_v15  ;;  %v1135_v57 = vadd.f32 %v1055_v35, %v864_v51  ;;  %v1306_v44 = vadd.f32 %v3041_v54, %v1130_v9  ;;  %v866_v5 = vadd.f32 %v2981_v14, %v595_v63  ;;  %v1057_v2 = vmul.f32 %v2846_v17, %v2813_v41  ;;  %v1851_v51 = vld [vmem:[%s3792_s8] sm:$0xff] }
  0xcc   : > { %v3051_v52 = vpop.permute.xlu1 %1233  ;;  %1650 = vmatpush1.bf16.msra.mxu1 %v1466_v62  ;;  %1524 = vperm.xlu1 %2456, %v1506_v16   ;;  %v1387_v9 = vmax.f32 %v1307_v48, 0.0  ;;  %v1389_v32 = vmax.f32 %v1309_v55, 0.0  ;;  %v1132_v10 = vadd.f32 %v2904_v34, %v3008_v3  ;;  %v1510_v34 = vld [vmem:[%s3790_s6 + $0x30] sm:$0xff]  ;;  %v1065_v16 = vmul.f32 %v2834_v7, %v2743_v59 }
  0xcd   : > { %3900 = vst [vmem:[#allocation44_spill] sm:$0xff] %v3051_v52  ;;  %v1312_v47 = vadd.f32 %v3051_v52, %v1136_v53  ;;  %v1314_v1 = vadd.f32 %v3051_v52, %v1138_v42  ;;  %v1311_v35 = vadd.f32 %v3051_v52, %v1135_v57  ;;  %v1386_v11 = vmax.f32 %v1306_v44, 0.0  ;;  %v3905_v44 = vld [vmem:[#allocation11_spill] sm:$0xff] }
  0xce   : > { %v3062_v4 = vpop.permute.xlu0 %498  ;;  %v1137_v28 = vadd.f32 %v1057_v2, %v866_v5  ;;  %v1308_v60 = vadd.f32 %v3041_v54, %v1132_v10  ;;  %v1066_v48 = vmul.f32 %v2837_v12, %v2743_v59  ;;  %v1067_v62 = vmul.f32 %v2846_v17, %v2743_v59  ;;  %v3907_v5 = vld [vmem:[#allocation23_spill] sm:$0xff] }
  0xcf   : > { %v3071_v14 = vmul.f32 %v2758_v0, %v3062_v4  ;;  %v1392_v41 = vmax.f32 %v1312_v47, 0.0  ;;  %v1394_v63 = vmax.f32 %v1314_v1, 0.0  ;;  %v1391_v22 = vmax.f32 %v1311_v35, 0.0  ;;  %v3906_v47 = vld [vmem:[#allocation20_spill] sm:$0xff] }
  0xd0   : > { %v3067_v13 = vpop.permute.xlu1 %488  ;;  %1534 = vperm.xlu1 %2456, %v1508_v61   ;;  %v1313_v26 = vadd.f32 %v3051_v52, %v1137_v28  ;;  %v1388_v36 = vmax.f32 %v1308_v60, 0.0  ;;  %v1068_v53 = vmul.f32 %v2849_v18, %v2743_v59  ;;  %v789_v1 = vmul.f32 %v3906_v47, %v3905_v44 }
  0xd1   : > { %3901 = vst [vmem:[#allocation45_spill] sm:$0xff] %v3071_v14  ;;  %v3076_v23 = vmul.f32 %v2758_v0, %v3067_v13  ;;  %v1470_v31 = vpack.c.bf16 %v1392_v41, %v1387_v9  ;;  %v1472_v40 = vpack.c.bf16 %v1394_v63, %v1389_v32  ;;  %v1469_v3 = vpack.c.bf16 %v1391_v22, %v1386_v11  ;;  %v3909_v9 = vld [vmem:[#allocation13_spill] sm:$0xff] }
  0xd2   : > { %v3081_v50 = vpop.permute.xlu0 %1248  ;;  %v1393_v39 = vmax.f32 %v1313_v26, 0.0  ;;  %v790_v2 = vmul.f32 %v3907_v5, %v3905_v44  ;;  %v791_v61 = vmul.f32 %v2819_v43, %v3905_v44  ;;  %v792_v59 = vmul.f32 %v2827_v56, %v3905_v44  ;;  %v3910_v11 = vld [vmem:[#allocation33_spill] sm:$0xff]  ;;  %v3911_v26 = vld [vmem:[#allocation36_spill] sm:$0xff] }
  0xd3   : > { %3902 = vst [vmem:[#allocation46_spill] sm:$0xff] %v3076_v23  ;;  %1578 = vmatprep.subr.bf16.mxu0 %v1470_v31  ;;  %1651 = vmatprep.subr.bf16.mxu1 %v1472_v40  ;;  %v3117_v32 = vmul.f32 %v3906_v47, %v3909_v9  ;;  %v598_v10 = vmul.f32 %v2852_v19, %v3910_v11  ;;  %v1853_v31 = vld [vmem:[%s3792_s8 + $0x10] sm:$0xff] }
  0xd4   : > { %1544 = vperm.xlu1 %2456, %v1510_v34   ;;  %1579 = vmatpush1.bf16.msra.mxu0 %v1469_v3  ;;  %v1471_v42 = vpack.c.bf16 %v1393_v39, %v1388_v36  ;;  %v794_v41 = vmul.f32 %v3906_v47, %v2985_v30  ;;  %v795_v63 = vmul.f32 %v3907_v5, %v2985_v30 }
  0xd5   : > { %v3084_v15 = vpop.permute.xlu1 %683  ;;  %v796_v22 = vmul.f32 %v2819_v43, %v2985_v30  ;;  %v797_v28 = vmul.f32 %v2827_v56, %v2985_v30  ;;  %v599_v40 = vmul.f32 %v2855_v20, %v3910_v11  ;;  %v600_v34 = vmul.f32 %v2862_v58, %v3910_v11 }
  0xd6   : > { %v3099_v55 = vmul.f32 %v2705_v45, %v3084_v15  ;;  %v3101_v57 = vpop.permute.xlu0 %508  ;;  %1652 = vmatpush1.bf16.msra.mxu1 %v1471_v42  ;;  %v601_v3 = vmul.f32 %v2865_v24, %v3910_v11  ;;  %v603_v36 = vmul.f32 %v2852_v19, %v3911_v26  ;;  %v604_v30 = vmul.f32 %v2855_v20, %v3911_v26 }
  0xd7   : > { %3904 = vst [vmem:[#allocation48_spill] sm:$0xff] %v3101_v57  ;;  %v3111_v35 = vmul.f32 %v2758_v0, %v3101_v57  ;;  %v605_v39 = vmul.f32 %v2862_v58, %v3911_v26  ;;  %v1060_v44 = vmul.f32 %v2834_v7, %v3010_v38  ;;  %v1061_v11 = vmul.f32 %v2837_v12, %v3010_v38 }
  0xd8   : > { %3903 = vst [vmem:[#allocation47_spill] sm:$0xff] %v3099_v55  ;;  %1857 = vperm.xlu1 %2456, %v1851_v51   ;;  %v606_v51 = vmul.f32 %v2865_v24, %v3911_v26  ;;  %v1062_v8 = vmul.f32 %v2846_v17, %v3010_v38  ;;  %v1063_v57 = vmul.f32 %v2849_v18, %v3010_v38  ;;  %v2078_v26 = vld [vmem:[#allocation2] sm:$0x1] }
  0xd9   : > { %3908 = vst [vmem:[#allocation11_spill] sm:$0xff] %v3111_v35  ;;  %v875_v14 = vadd.f32 %v795_v63, %v604_v30  ;;  %v874_v55 = vadd.f32 %v794_v41, %v603_v36  ;;  %v870_v33 = vadd.f32 %v790_v2, %v599_v40  ;;  %v872_v29 = vadd.f32 %v792_v59, %v601_v3 }
  0xda   : > { %v3129_v60 = vpop.permute.xlu1 %954  ;;  %v877_v23 = vadd.f32 %v797_v28, %v606_v51  ;;  %v869_v21 = vadd.f32 %v789_v1, %v598_v10  ;;  %v871_v52 = vadd.f32 %v791_v61, %v600_v34  ;;  %v3164_v54 = vmul.f32 %v3907_v5, %v3909_v9 }
  0xdb   : > { %v3150_v42 = vmul.f32 %v2712_v46, %v3129_v60  ;;  %v3168_v6 = vmul.f32 %v2819_v43, %v3909_v9  ;;  %v3172_v38 = vmul.f32 %v2827_v56, %v3909_v9  ;;  %v1141_v2 = vadd.f32 %v1061_v11, %v870_v33  ;;  %v3913_v33 = vld [vmem:[#allocation15_spill] sm:$0xff] }
  0xdc   : > { %1867 = vperm.xlu1 %2456, %v1853_v31   ;;  %v1143_v1 = vadd.f32 %v1063_v57, %v872_v29  ;;  %v1140_v61 = vadd.f32 %v1060_v44, %v869_v21  ;;  %v1142_v59 = vadd.f32 %v1062_v8, %v871_v52  ;;  %v1146_v10 = vadd.f32 %v1066_v48, %v875_v14  ;;  %v3914_v57 = vld [vmem:[#allocation18_spill] sm:$0xff] }
  0xdd   : > { %3912 = vst [vmem:[#allocation13_spill] sm:$0xff] %v3150_v42  ;;  %v876_v42 = vadd.f32 %v796_v22, %v605_v39  ;;  %v1148_v63 = vadd.f32 %v1068_v53, %v877_v23  ;;  %v1145_v22 = vadd.f32 %v1065_v16, %v874_v55  ;;  %v1317_v40 = vadd.f32 %v3043_v49, %v1141_v2 }
  0xde   : > { %v3160_v35 = vpop.permute.xlu1 %958  ;;  %v1319_v9 = vadd.f32 %v3043_v49, %v1143_v1  ;;  %v1316_v34 = vadd.f32 %v3043_v49, %v1140_v61  ;;  %v1318_v3 = vadd.f32 %v3043_v49, %v1142_v59  ;;  %v3190_v52 = vmul.f32 %v3906_v47, %v3913_v33 }
  0xdf   : > { %v3176_v41 = vmul.f32 %v2712_v46, %v3160_v35  ;;  %v1147_v28 = vadd.f32 %v1067_v62, %v876_v42  ;;  %v3194_v14 = vmul.f32 %v3907_v5, %v3913_v33  ;;  %v3198_v23 = vmul.f32 %v2819_v43, %v3913_v33 }
  0xe0   : > { %2081 = vperm.xlu1 %2456, %v2078_v26   ;;  %v3202_v16 = vmul.f32 %v2827_v56, %v3913_v33  ;;  %v3206_v30 = vmul.f32 %v3906_v47, %v3914_v57  ;;  %v3210_v39 = vmul.f32 %v3907_v5, %v3914_v57  ;;  %v1397_v42 = vmax.f32 %v1317_v40, 0.0  ;;  %v3240_v33 = vpop.permute.xlu0 %1258 }
  0xe1   : > { %v1399_v44 = vmax.f32 %v1319_v9, 0.0  ;;  %v608_v11 = vmul.f32 %v2852_v19, %v3030_v37  ;;  %v609_v26 = vmul.f32 %v2855_v20, %v3030_v37  ;;  %v1396_v2 = vmax.f32 %v1316_v34, 0.0  ;;  %3917 = vst [vmem:[#allocation15_spill] sm:$0xff] %v3240_v33 }
  0xe2   : > { %3915 = vst [vmem:[#allocation33_spill] sm:$0xff] %v3206_v30  ;;  %3916 = vst [vmem:[#allocation36_spill] sm:$0xff] %v3210_v39  ;;  %v1398_v1 = vmax.f32 %v1318_v3, 0.0  ;;  %v611_v61 = vmul.f32 %v2865_v24, %v3030_v37  ;;  %v610_v34 = vmul.f32 %v2862_v58, %v3030_v37  ;;  %v614_v3 = vmul.f32 %v2855_v20, %v3067_v13 }
  0xe3   : > { %v3178_v31 = vpop.permute.xlu1 %1243 }
  0xe4   : > { %v1322_v36 = vadd.f32 %v3178_v31, %v1146_v10  ;;  %v1324_v29 = vadd.f32 %v3178_v31, %v1148_v63  ;;  %v1321_v8 = vadd.f32 %v3178_v31, %v1145_v22  ;;  %v1323_v21 = vadd.f32 %v3178_v31, %v1147_v28 }
  0xe5   : > { %v800_v22 = vmul.f32 %v3907_v5, %v3084_v15  ;;  %v802_v28 = vmul.f32 %v2827_v56, %v3084_v15  ;;  %v3920_v56 = vld [vmem:[#allocation38_spill] sm:$0xff] }
  0xe6   : > { %v1402_v48 = vmax.f32 %v1322_v36, 0.0  ;;  %v1404_v62 = vmax.f32 %v1324_v29, 0.0  ;;  %v1401_v53 = vmax.f32 %v1321_v8, 0.0  ;;  %v1403_v55 = vmax.f32 %v1323_v21, 0.0 }
  0xe7   : > { %v3212_v51 = vpop.permute.xlu1 %493  ;;  %v616_v36 = vmul.f32 %v2865_v24, %v3067_v13  ;;  %v799_v29 = vmul.f32 %v3906_v47, %v3084_v15  ;;  %v1071_v8 = vmul.f32 %v2837_v12, %v3129_v60  ;;  %v1073_v21 = vmul.f32 %v2849_v18, %v3129_v60 }
  0xe8   : > { %v3222_v59 = vmul.f32 %v2758_v0, %v3212_v51  ;;  %v1475_v10 = vpack.c.bf16 %v1402_v48, %v1397_v42  ;;  %v1477_v63 = vpack.c.bf16 %v1404_v62, %v1399_v44  ;;  %v1474_v40 = vpack.c.bf16 %v1401_v53, %v1396_v2 }
  0xe9   : > { %v1476_v9 = vpack.c.bf16 %v1403_v55, %v1398_v1  ;;  %v613_v48 = vmul.f32 %v2852_v19, %v3067_v13  ;;  %v3248_v62 = vmul.f32 %v2852_v19, %v3062_v4  ;;  %v624_v53 = vmul.f32 %v2855_v20, %v3062_v4 }
  0xea   : > { %1580 = vmatprep.subr.bf16.mxu0 %v1475_v10  ;;  %1653 = vmatprep.subr.bf16.mxu1 %v1477_v63  ;;  %v801_v55 = vmul.f32 %v2819_v43, %v3084_v15  ;;  %v1070_v42 = vmul.f32 %v2834_v7, %v3129_v60  ;;  %v880_v2 = vadd.f32 %v800_v22, %v609_v26  ;;  %v3919_v22 = vld [vmem:[#allocation6_spill] sm:$0xff]  ;;  %v3921_v43 = vld [vmem:[#allocation8_spill] sm:$0xff] }
  0xeb   : > { %1581 = vmatpush1.bf16.msra.mxu0 %v1474_v40  ;;  %1654 = vmatpush1.bf16.msra.mxu1 %v1476_v9  ;;  %v882_v1 = vadd.f32 %v802_v28, %v611_v61  ;;  %v615_v10 = vmul.f32 %v2862_v58, %v3067_v13  ;;  %v3264_v63 = vmul.f32 %v2862_v58, %v3062_v4  ;;  %v3918_v13 = vld [vmem:[#allocation35_spill] sm:$0xff] }
  0xec   : > { %v3242_v37 = vpop.permute.xlu1 %691  ;;  %v1072_v40 = vmul.f32 %v2846_v17, %v3129_v60  ;;  %v885_v15 = vadd.f32 %v3164_v54, %v614_v3  ;;  %v1151_v9 = vadd.f32 %v1071_v8, %v880_v2  ;;  %v887_v30 = vadd.f32 %v3172_v38, %v616_v36 }
  0xed   : > { %v3258_v44 = vmul.f32 %v2705_v45, %v3242_v37  ;;  %v1153_v39 = vadd.f32 %v1073_v21, %v882_v1  ;;  %v879_v57 = vadd.f32 %v799_v29, %v608_v11  ;;  %v884_v26 = vadd.f32 %v3117_v32, %v613_v48  ;;  %v3283_v11 = vpop.permute.xlu0 %518  ;;  %v3924_v29 = vld [vmem:[#allocation9_spill] sm:$0xff]  ;;  %v3926_v1 = vld [vmem:[#allocation40_spill] sm:$0xff] }
  0xee   : > { %v881_v61 = vadd.f32 %v801_v55, %v610_v34  ;;  %v853_v28 = vadd.f32 %v3919_v22, %v3918_v13  ;;  %v858_v47 = vadd.f32 %v3921_v43, %v3920_v56  ;;  %v1075_v60 = vmul.f32 %v2834_v7, %v3160_v35  ;;  %3922 = vst [vmem:[#allocation35_spill] sm:$0xff] %v3283_v11  ;;  %v3923_v34 = vld [vmem:[#allocation7_spill] sm:$0xff]  ;;  %v3925_v56 = vld [vmem:[#allocation17_spill] sm:$0xff] }
  0xef   : > { %v1076_v54 = vmul.f32 %v2837_v12, %v3160_v35  ;;  %v1078_v38 = vmul.f32 %v2849_v18, %v3160_v35  ;;  %v1150_v3 = vadd.f32 %v1070_v42, %v879_v57  ;;  %v868_v8 = vadd.f32 %v3925_v56, %v2989_v25  ;;  %v3927_v22 = vld [vmem:[#allocation25_spill] sm:$0xff] }
  0xf0   : > { %v1124_v36 = vadd.f32 %v3923_v34, %v853_v28  ;;  %v1129_v43 = vadd.f32 %v3924_v29, %v858_v47  ;;  %v1077_v21 = vmul.f32 %v2846_v17, %v3160_v35  ;;  %v1327_v48 = vadd.f32 %v3081_v50, %v1151_v9  ;;  %v3928_v47 = vld [vmem:[#allocation27_spill] sm:$0xff] }
  0xf1   : > { %v3270_v33 = vpop.permute.xlu1 %962  ;;  %v1329_v55 = vadd.f32 %v3081_v50, %v1153_v39  ;;  %v1152_v2 = vadd.f32 %v1072_v40, %v881_v61  ;;  %v1139_v28 = vadd.f32 %v3927_v22, %v868_v8  ;;  %v3929_v34 = vld [vmem:[#allocation43_spill] sm:$0xff]  ;;  %v626_v25 = vmul.f32 %v2865_v24, %v3062_v4 }
  0xf2   : > { %v3287_v32 = vmul.f32 %v2712_v46, %v3270_v33  ;;  %v1300_v42 = vadd.f32 %v2868_v27, %v1124_v36  ;;  %v1305_v13 = vadd.f32 %v3926_v1, %v1129_v43  ;;  %v1310_v29 = vadd.f32 %v3929_v34, %v3928_v47  ;;  %v3316_v43 = vpop.permute.xlu0 %1268 }
  0xf3   : > { %v3308_v35 = vmul.f32 %v2758_v0, %v3283_v11  ;;  %v1326_v39 = vadd.f32 %v3081_v50, %v1150_v3  ;;  %v886_v40 = vadd.f32 %v3168_v6, %v615_v10  ;;  %v1156_v9 = vadd.f32 %v1076_v54, %v885_v15  ;;  %3930 = vst [vmem:[#allocation6_spill] sm:$0xff] %v3316_v43  ;;  %v3934_v43 = vld [vmem:[#allocation12_spill] sm:$0xff] }
  0xf4   : > { %v1158_v61 = vadd.f32 %v1078_v38, %v887_v30  ;;  %v1155_v36 = vadd.f32 %v1075_v60, %v884_v26  ;;  %v1407_v56 = vmax.f32 %v1327_v48, 0.0  ;;  %v1328_v4 = vadd.f32 %v3081_v50, %v1152_v2  ;;  %v3931_v38 = vld [vmem:[#allocation44_spill] sm:$0xff] }
  0xf5   : > { %v3297_v57 = vpop.permute.xlu1 %966  ;;  %v1157_v8 = vadd.f32 %v1077_v21, %v886_v40  ;;  %v3320_v1 = vadd.f32 %v3194_v14, %v624_v53  ;;  %v3324_v3 = vmul.f32 %v2852_v19, %v3212_v51  ;;  %v3328_v6 = vmul.f32 %v2855_v20, %v3212_v51  ;;  %v3933_v40 = vld [vmem:[#allocation34_spill] sm:$0xff] }
  0xf6   : > { %v3314_v27 = vmul.f32 %v2712_v46, %v3297_v57  ;;  %v3332_v30 = vmul.f32 %v2862_v58, %v3212_v51  ;;  %v1409_v10 = vmax.f32 %v1329_v55, 0.0  ;;  %v1406_v26 = vmax.f32 %v1326_v39, 0.0  ;;  %v3339_v39 = vpop.permute.xlu0 %528 }
  0xf7   : > { %v1380_v60 = vmax.f32 %v1300_v42, 0.0  ;;  %v1385_v54 = vmax.f32 %v1305_v13, 0.0  ;;  %v1315_v14 = vadd.f32 %v3931_v38, %v1139_v28  ;;  %v1390_v47 = vmax.f32 %v1310_v29, 0.0  ;;  %v3936_v28 = vld [vmem:[#allocation37_spill] sm:$0xff]  ;;  %v3939_v29 = vld [vmem:[#allocation42_spill] sm:$0xff] }
  0xf8   : > { %v873_v11 = vadd.f32 %v3934_v43, %v3933_v40  ;;  %v621_v43 = vmul.f32 %v2865_v24, %v3212_v51  ;;  %v657_v38 = vmul.f32 %v2758_v0, %v3339_v39  ;;  %v3943_v51 = vld [vmem:[#allocation14_spill] sm:$0xff] }
  0xf9   : > { %v3335_v22 = vpack.c.bf16 %v1385_v54, %v1380_v60  ;;  %v1395_v34 = vmax.f32 %v1315_v14, 0.0  ;;  %v3940_v60 = vld [vmem:[#allocation47_spill] sm:$0xff]  ;;  %v1408_v14 = vmax.f32 %v1328_v4, 0.0  ;;  %v3944_v4 = vld [vmem:[#allocation13_spill] sm:$0xff] }
  0xfa   : > { %v1254_v15 = vpop.permute.xlu1 %1253  ;;  %v883_v54 = vadd.f32 %v3940_v60, %v3939_v29  ;;  %v3946_v60 = vld [vmem:[#allocation16_spill] sm:$0xff] }
  0xfb   : > { %v1332_v53 = vadd.f32 %v1254_v15, %v1156_v9  ;;  %v1334_v21 = vadd.f32 %v1254_v15, %v1158_v61  ;;  %v1331_v48 = vadd.f32 %v1254_v15, %v1155_v36  ;;  %v1333_v2 = vadd.f32 %v1254_v15, %v1157_v8  ;;  %3932 = vst [vmem:[#allocation38_spill] sm:$0xff] %v3335_v22  ;;  %v3937_v9 = vld [vmem:[#allocation39_spill] sm:$0xff]  ;;  %v3938_v36 = vld [vmem:[#allocation41_spill] sm:$0xff] }
  0xfc   : > { %v3343_v13 = vpack.c.bf16 %v1395_v34, %v1390_v47  ;;  %v878_v61 = vadd.f32 %v3937_v9, %v3936_v28  ;;  %v1144_v8 = vadd.f32 %v3938_v36, %v873_v11  ;;  %v3941_v34 = vld [vmem:[#allocation10_spill] sm:$0xff]  ;;  %v1154_v29 = vadd.f32 %v3944_v4, %v883_v54  ;;  %v3971_v22 = vld [vmem:[#allocation33_spill] sm:$0xff] }
  0xfd   : > { %v1412_v58 = vmax.f32 %v1332_v53, 0.0  ;;  %v1414_v20 = vmax.f32 %v1334_v21, 0.0  ;;  %v1411_v55 = vmax.f32 %v1331_v48, 0.0  ;;  %v1413_v19 = vmax.f32 %v1333_v2, 0.0  ;;  %v3942_v9 = vld [vmem:[#allocation46_spill] sm:$0xff] }
  0xfe   : > { %v3341_v42 = vpop.permute.xlu1 %503  ;;  %3935 = vst [vmem:[#allocation8_spill] sm:$0xff] %v3343_v13  ;;  %v3355_v53 = vadd.f32 %v3202_v16, %v626_v25  ;;  %v1149_v40 = vadd.f32 %v3941_v34, %v878_v61  ;;  %v1320_v28 = vadd.f32 %v3043_v49, %v1144_v8  ;;  %v888_v36 = vadd.f32 %v3943_v51, %v3942_v9  ;;  %v3945_v25 = vld [vmem:[#allocation45_spill] sm:$0xff]  ;;  %v3953_v9 = vld [vmem:[#allocation26_spill] sm:$0xff] }
  0xff   : > { %v632_v21 = vmul.f32 %v2758_v0, %v3341_v42  ;;  %v1480_v48 = vpack.c.bf16 %v1412_v58, %v1407_v56  ;;  %v1482_v2 = vpack.c.bf16 %v1414_v20, %v1409_v10  ;;  %v1479_v47 = vpack.c.bf16 %v1411_v55, %v1406_v26  ;;  %v3947_v56 = vld [vmem:[#allocation11_spill] sm:$0xff] }
 0x100   : > { %v1481_v11 = vpack.c.bf16 %v1413_v19, %v1408_v14  ;;  %v893_v16 = vadd.f32 %v3258_v44, %v3222_v59  ;;  %v898_v58 = vadd.f32 %v3946_v60, %v3945_v25  ;;  %v1325_v20 = vadd.f32 %v3178_v31, %v1149_v40  ;;  %v3948_v10 = vld [vmem:[#allocation19_spill] sm:$0xff]  ;;  %v3949_v14 = vld [vmem:[#allocation20_spill] sm:$0xff] }
 0x101   : > { %1582 = vmatprep.subr.bf16.mxu0 %v1480_v48  ;;  %1655 = vmatprep.subr.bf16.mxu1 %v1482_v2  ;;  %v1159_v49 = vadd.f32 %v3176_v41, %v888_v36  ;;  %v908_v26 = vadd.f32 %v3948_v10, %v3947_v56  ;;  %v810_v55 = vmul.f32 %v3907_v5, %v3242_v37  ;;  %v1400_v61 = vmax.f32 %v1320_v28, 0.0  ;;  %v3950_v2 = vld [vmem:[#allocation21_spill] sm:$0xff]  ;;  %v3954_v36 = vld [vmem:[#allocation32_spill] sm:$0xff]  ;;  %v3957_v25 = vld [vmem:[#allocation15_spill] sm:$0xff] }
 0x102   : > { %1583 = vmatpush1.bf16.msra.mxu0 %v1479_v47  ;;  %1656 = vmatpush1.bf16.msra.mxu1 %v1481_v11  ;;  %v894_v59 = vadd.f32 %v3190_v52, %v3248_v62  ;;  %v896_v44 = vadd.f32 %v3198_v23, %v3264_v63  ;;  %v1405_v54 = vmax.f32 %v1325_v20, 0.0  ;;  %v1330_v31 = vadd.f32 %v3081_v50, %v1154_v29  ;;  %v3951_v11 = vld [vmem:[#allocation24_spill] sm:$0xff] }
 0x103   : > { %v3368_v19 = vpop.permute.xlu1 %699  ;;  %v1335_v41 = vadd.f32 %v1254_v15, %v1159_v49  ;;  %v809_v48 = vmul.f32 %v3949_v14, %v3242_v37  ;;  %v811_v47 = vmul.f32 %v3950_v2, %v3242_v37  ;;  %v812_v52 = vmul.f32 %v3951_v11, %v3242_v37 }
 0x104   : > { %v823_v8 = vmul.f32 %v2705_v45, %v3368_v19  ;;  %v1081_v23 = vmul.f32 %v2837_v12, %v3270_v33  ;;  %v3391_v62 = vpack.c.bf16 %v1405_v54, %v1400_v61  ;;  %v1410_v63 = vmax.f32 %v1330_v31, 0.0  ;;  %v3959_v31 = vld [vmem:[#allocation22_spill] sm:$0xff] }
 0x105   : > { %v1415_v34 = vmax.f32 %v1335_v41, 0.0  ;;  %v1164_v40 = vadd.f32 %v3287_v32, %v893_v16  ;;  %v1169_v15 = vadd.f32 %v3314_v27, %v898_v58  ;;  %v3399_v51 = vadd.f32 %v3953_v9, %v3308_v35 }
 0x106   : > { %3952 = vst [vmem:[#allocation7_spill] sm:$0xff] %v3391_v62  ;;  %v903_v28 = vadd.f32 %v823_v8, %v632_v21  ;;  %v3402_v37 = vadd.f32 %v3954_v36, %v657_v38  ;;  %v1080_v4 = vmul.f32 %v2834_v7, %v3270_v33  ;;  %v1082_v29 = vmul.f32 %v2846_v17, %v3270_v33 }
 0x107   : > { %v1083_v32 = vmul.f32 %v2849_v18, %v3270_v33  ;;  %v890_v16 = vadd.f32 %v810_v55, %v3328_v6  ;;  %v892_v21 = vadd.f32 %v812_v52, %v621_v43  ;;  %v3413_v35 = vpack.c.bf16 %v1415_v34, %v1410_v63  ;;  %v3958_v55 = vld [vmem:[#allocation18_spill] sm:$0xff] }
 0x108   : > { %v3394_v50 = vpop.permute.xlu1 %970  ;;  %3955 = vst [vmem:[#allocation9_spill] sm:$0xff] %v3402_v37  ;;  %v1340_v38 = vadd.f32 %v3957_v25, %v1164_v40  ;;  %v1085_v60 = vmul.f32 %v2834_v7, %v3297_v57  ;;  %v889_v20 = vadd.f32 %v809_v48, %v3324_v3  ;;  %v891_v49 = vadd.f32 %v811_v47, %v3332_v30 }
 0x109   : > { %v1094_v27 = vmul.f32 %v2712_v46, %v3394_v50  ;;  %3956 = vst [vmem:[#allocation17_spill] sm:$0xff] %v3413_v35  ;;  %v1161_v58 = vadd.f32 %v1081_v23, %v890_v16  ;;  %v1086_v33 = vmul.f32 %v2837_v12, %v3297_v57  ;;  %v1087_v6 = vmul.f32 %v2846_v17, %v3297_v57  ;;  %v3960_v23 = vld [vmem:[#allocation31_spill] sm:$0xff] }
 0x10a   : > { %v1088_v43 = vmul.f32 %v2849_v18, %v3297_v57  ;;  %v3432_v61 = vmul.f32 %v3950_v2, %v3958_v55  ;;  %v1163_v3 = vadd.f32 %v1083_v32, %v892_v21  ;;  %v1160_v8 = vadd.f32 %v1080_v4, %v889_v20 }
 0x10b   : > { %v3428_v10 = vadd.f32 %v1094_v27, %v903_v28  ;;  %v1162_v30 = vadd.f32 %v1082_v29, %v891_v49  ;;  %v3436_v54 = vmul.f32 %v3951_v11, %v3958_v55  ;;  %v3440_v41 = vmul.f32 %v3949_v14, %v3959_v31 }
 0x10c   : > { %v3426_v56 = vpop.permute.xlu1 %974  ;;  %v3444_v57 = vmul.f32 %v3907_v5, %v3959_v31  ;;  %v3450_v47 = vmul.f32 %v3950_v2, %v3959_v31  ;;  %v3454_v52 = vmul.f32 %v3951_v11, %v3959_v31  ;;  %v3458_v63 = vmul.f32 %v3949_v14, %v3960_v23  ;;  %v3964_v31 = vld [vmem:[#allocation28_spill] sm:$0xff] }
 0x10d   : > { %v1099_v48 = vmul.f32 %v2712_v46, %v3426_v56  ;;  %v1337_v34 = vadd.f32 %v3957_v25, %v1161_v58  ;;  %v1166_v40 = vadd.f32 %v1086_v33, %v3320_v1  ;;  %v1168_v28 = vadd.f32 %v1088_v43, %v3355_v53 }
 0x10e   : > { %3961 = vst [vmem:[#allocation40_spill] sm:$0xff] %v3458_v63  ;;  %v1165_v9 = vadd.f32 %v1085_v60, %v894_v59  ;;  %v1167_v36 = vadd.f32 %v1087_v6, %v896_v44  ;;  %v1339_v29 = vadd.f32 %v3957_v25, %v1163_v3  ;;  %v1336_v32 = vadd.f32 %v3957_v25, %v1160_v8 }
 0x10f   : > { %v1338_v16 = vadd.f32 %v3957_v25, %v1162_v30  ;;  %v3466_v27 = vadd.f32 %v1099_v48, %v908_v26  ;;  %v3470_v1 = vmul.f32 %v3907_v5, %v3960_v23  ;;  %v3474_v53 = vmul.f32 %v3950_v2, %v3960_v23  ;;  %v3963_v30 = vld [vmem:[#allocation48_spill] sm:$0xff] }
 0x110   : > { %v3478_v59 = vmul.f32 %v3951_v11, %v3960_v23  ;;  %v1417_v6 = vmax.f32 %v1337_v34, 0.0  ;;  %v1419_v43 = vmax.f32 %v1339_v29, 0.0  ;;  %v1416_v3 = vmax.f32 %v1336_v32, 0.0 }
 0x111   : > { %v1264_v4 = vpop.permute.xlu1 %1263  ;;  %3962 = vst [vmem:[#allocation25_spill] sm:$0xff] %v3474_v53  ;;  %v633_v48 = vmul.f32 %v3964_v31, %v3963_v30  ;;  %v1420_v23 = vmax.f32 %v1340_v38, 0.0  ;;  %v631_v29 = vmul.f32 %v2865_v24, %v3341_v42  ;;  %v1091_v38 = vmul.f32 %v2837_v12, %v3394_v50 }
 0x112   : > { %v1342_v21 = vadd.f32 %v1264_v4, %v1166_v40  ;;  %v1344_v20 = vadd.f32 %v1264_v4, %v1168_v28  ;;  %v1341_v49 = vadd.f32 %v1264_v4, %v1165_v9  ;;  %v1343_v55 = vadd.f32 %v1264_v4, %v1167_v36 }
 0x113   : > { %v1345_v44 = vadd.f32 %v1264_v4, %v1169_v15  ;;  %v820_v40 = vmul.f32 %v3907_v5, %v3368_v19  ;;  %v1418_v28 = vmax.f32 %v1338_v16, 0.0  ;;  %v822_v15 = vmul.f32 %v3951_v11, %v3368_v19 }
 0x114   : > { %v1422_v25 = vmax.f32 %v1342_v21, 0.0  ;;  %v1424_v26 = vmax.f32 %v1344_v20, 0.0  ;;  %v1421_v60 = vmax.f32 %v1341_v49, 0.0  ;;  %v1423_v58 = vmax.f32 %v1343_v55, 0.0  ;;  %v3965_v21 = vld [vmem:[#allocation29_spill] sm:$0xff] }
 0x115   : > { %v3480_v33 = vpop.permute.xlu1 %513  ;;  %v1425_v8 = vmax.f32 %v1345_v44, 0.0  ;;  %v629_v34 = vmul.f32 %v3965_v21, %v3341_v42  ;;  %v819_v49 = vmul.f32 %v3949_v14, %v3368_v19  ;;  %v1093_v16 = vmul.f32 %v2849_v18, %v3394_v50  ;;  %v3967_v44 = vld [vmem:[#allocation30_spill] sm:$0xff] }
 0x116   : > { %v1485_v9 = vpack.c.bf16 %v1422_v25, %v1417_v6  ;;  %v1487_v36 = vpack.c.bf16 %v1424_v26, %v1419_v43  ;;  %v1484_v4 = vpack.c.bf16 %v1421_v60, %v1416_v3  ;;  %v1486_v32 = vpack.c.bf16 %v1423_v58, %v1418_v28 }
 0x117   : > { %v3492_v20 = vpack.c.bf16 %v1425_v8, %v1420_v23  ;;  %v634_v55 = vmul.f32 %v3965_v21, %v3963_v30  ;;  %v635_v25 = vmul.f32 %v3967_v44, %v3963_v30  ;;  %v636_v26 = vmul.f32 %v2865_v24, %v3963_v30  ;;  %v3968_v8 = vld [vmem:[#allocation35_spill] sm:$0xff] }
 0x118   : > { %1584 = vmatprep.subr.bf16.mxu0 %v1485_v9  ;;  %1657 = vmatprep.subr.bf16.mxu1 %v1487_v36  ;;  %v628_v58 = vmul.f32 %v3964_v31, %v3341_v42  ;;  %v1090_v6 = vmul.f32 %v2834_v7, %v3394_v50  ;;  %v900_v43 = vadd.f32 %v820_v40, %v629_v34 }
 0x119   : > { %3966 = vst [vmem:[#allocation27_spill] sm:$0xff] %v3492_v20  ;;  %1585 = vmatpush1.bf16.msra.mxu0 %v1484_v4  ;;  %1658 = vmatpush1.bf16.msra.mxu1 %v1486_v32  ;;  %v902_v3 = vadd.f32 %v822_v15, %v631_v29  ;;  %v3512_v28 = vmul.f32 %v3964_v31, %v3968_v8 }
 0x11a   : > { %v708_v60 = vpop.permute.xlu1 %707  ;;  %v821_v23 = vmul.f32 %v3950_v2, %v3368_v19  ;;  %v642_v30 = vmul.f32 %v2758_v0, %v3480_v33  ;;  %v3521_v36 = vmul.f32 %v3965_v21, %v3968_v8  ;;  %v1171_v4 = vadd.f32 %v1091_v38, %v900_v43 }
 0x11b   : > { %v833_v9 = vmul.f32 %v2705_v45, %v708_v60  ;;  %v1173_v32 = vadd.f32 %v1093_v16, %v902_v3  ;;  %v899_v40 = vadd.f32 %v819_v49, %v628_v58  ;;  %v3525_v15 = vmul.f32 %v3967_v44, %v3968_v8 }
 0x11c   : > { %v630_v34 = vmul.f32 %v3967_v44, %v3341_v42  ;;  %v1092_v19 = vmul.f32 %v2846_v17, %v3394_v50  ;;  %v3533_v20 = vmul.f32 %v2865_v24, %v3968_v8  ;;  %v3537_v38 = vmul.f32 %v3964_v31, %v3339_v39 }
 0x11d   : > { %v913_v29 = vadd.f32 %v833_v9, %v642_v30  ;;  %v3541_v49 = vmul.f32 %v3965_v21, %v3339_v39  ;;  %v1170_v58 = vadd.f32 %v1090_v6, %v899_v40  ;;  %v1095_v42 = vmul.f32 %v2834_v7, %v3426_v56  ;;  %v3969_v9 = vld [vmem:[#allocation6_spill] sm:$0xff]  ;;  %v3970_v6 = vld [vmem:[#allocation36_spill] sm:$0xff] }
 0x11e   : > { %v1096_v50 = vmul.f32 %v2837_v12, %v3426_v56  ;;  %v1098_v43 = vmul.f32 %v2849_v18, %v3426_v56  ;;  %v901_v3 = vadd.f32 %v821_v23, %v630_v34  ;;  %v1097_v8 = vmul.f32 %v2846_v17, %v3426_v56 }
 0x11f   : > { %v979_v16 = vpop.permute.xlu1 %978  ;;  %v1347_v35 = vadd.f32 %v3969_v9, %v1171_v4  ;;  %v1349_v62 = vadd.f32 %v3969_v9, %v1173_v32  ;;  %v905_v40 = vadd.f32 %v3970_v6, %v634_v55  ;;  %v907_v13 = vadd.f32 %v3436_v54, %v636_v26 }
 0x120   : > { %v1104_v30 = vmul.f32 %v2712_v46, %v979_v16  ;;  %v904_v37 = vadd.f32 %v3971_v22, %v633_v48  ;;  %v1172_v53 = vadd.f32 %v1092_v19, %v901_v3  ;;  %v3559_v63 = vmul.f32 %v3967_v44, %v3339_v39 }
 0x121   : > { %v1346_v56 = vadd.f32 %v3969_v9, %v1170_v58  ;;  %v906_v34 = vadd.f32 %v3432_v61, %v635_v25  ;;  %v830_v32 = vmul.f32 %v3907_v5, %v708_v60  ;;  %v1176_v55 = vadd.f32 %v1096_v50, %v905_v40 }
 0x122   : > { %v3565_v4 = vadd.f32 %v1104_v30, %v913_v29  ;;  %v1178_v6 = vadd.f32 %v1098_v43, %v907_v13  ;;  %v1175_v54 = vadd.f32 %v1095_v42, %v904_v37  ;;  %v1427_v48 = vmax.f32 %v1347_v35, 0.0 }
 0x123   : > { %v3561_v23 = vpop.permute.xlu1 %982  ;;  %v1429_v26 = vmax.f32 %v1349_v62, 0.0  ;;  %v1177_v19 = vadd.f32 %v1097_v8, %v906_v34  ;;  %v638_v3 = vmul.f32 %v3964_v31, %v3480_v33  ;;  %v639_v58 = vmul.f32 %v3965_v21, %v3480_v33 }
 0x124   : > { %3972 = vst [vmem:[#allocation43_spill] sm:$0xff] %v3565_v4  ;;  %v1109_v22 = vmul.f32 %v2712_v46, %v3561_v23  ;;  %v1348_v61 = vadd.f32 %v3969_v9, %v1172_v53  ;;  %v1350_v25 = vadd.f32 %v3969_v9, %v3428_v10  ;;  %v640_v13 = vmul.f32 %v3967_v44, %v3480_v33 }
 0x125   : > { %v641_v37 = vmul.f32 %v2865_v24, %v3480_v33  ;;  %v829_v62 = vmul.f32 %v3949_v14, %v708_v60  ;;  %v831_v35 = vmul.f32 %v3950_v2, %v708_v60  ;;  %v832_v29 = vmul.f32 %v3951_v11, %v708_v60 }
 0x126   : > { %v1101_v42 = vmul.f32 %v2837_v12, %v979_v16  ;;  %v910_v43 = vadd.f32 %v830_v32, %v639_v58  ;;  %v3586_v53 = vadd.f32 %v1109_v22, %v3399_v51  ;;  %v1100_v40 = vmul.f32 %v2834_v7, %v979_v16 }
 0x127   : > { %v1102_v33 = vmul.f32 %v2846_v17, %v979_v16  ;;  %v1103_v34 = vmul.f32 %v2849_v18, %v979_v16  ;;  %v1426_v58 = vmax.f32 %v1346_v56, 0.0  ;;  %v1428_v51 = vmax.f32 %v1348_v61, 0.0 }
 0x128   : > { %v1274_v50 = vpop.permute.xlu1 %1273  ;;  %3973 = vst [vmem:[#allocation44_spill] sm:$0xff] %v3586_v53  ;;  %v912_v22 = vadd.f32 %v832_v29, %v641_v37  ;;  %v1430_v53 = vmax.f32 %v1350_v25, 0.0  ;;  %v917_v56 = vadd.f32 %v3454_v52, %v3533_v20 }
 0x129   : > { %v1352_v10 = vadd.f32 %v1274_v50, %v1176_v55  ;;  %v1354_v8 = vadd.f32 %v1274_v50, %v1178_v6  ;;  %v1351_v30 = vadd.f32 %v1274_v50, %v1175_v54  ;;  %v1353_v9 = vadd.f32 %v1274_v50, %v1177_v19 }
 0x12a   : > { %v1355_v2 = vadd.f32 %v1274_v50, %v3466_v27  ;;  %v1181_v6 = vadd.f32 %v1101_v42, %v910_v43  ;;  %v909_v54 = vadd.f32 %v829_v62, %v638_v3  ;;  %v911_v19 = vadd.f32 %v831_v35, %v640_v13  ;;  %v3974_v3 = vld [vmem:[#allocation40_spill] sm:$0xff]  ;;  %v3976_v13 = vld [vmem:[#allocation23_spill] sm:$0xff] }
 0x12b   : > { %v1432_v60 = vmax.f32 %v1352_v10, 0.0  ;;  %v1434_v14 = vmax.f32 %v1354_v8, 0.0  ;;  %v1431_v44 = vmax.f32 %v1351_v30, 0.0  ;;  %v1433_v46 = vmax.f32 %v1353_v9, 0.0  ;;  %v3978_v42 = vld [vmem:[#allocation28_spill] sm:$0xff]  ;;  %v3981_v9 = vld [vmem:[#allocation5_spill] sm:$0xff] }
 0x12c   : > { %v524_v32 = vpop.permute.xlu1 %523  ;;  %v1435_v55 = vmax.f32 %v1355_v2, 0.0  ;;  %v1183_v4 = vadd.f32 %v1103_v34, %v912_v22  ;;  %v1180_v5 = vadd.f32 %v1100_v40, %v909_v54  ;;  %v1182_v27 = vadd.f32 %v1102_v33, %v911_v19  ;;  %v3980_v8 = vld [vmem:[#allocation24_spill] sm:$0xff]  ;;  %v3982_v33 = vld [vmem:[#allocation30_spill] sm:$0xff]  ;;  %v3984_v22 = vld [vmem:[#allocation21_spill] sm:$0xff] }
 0x12d   : > { %v1490_v11 = vpack.c.bf16 %v1432_v60, %v1427_v48  ;;  %v1492_v21 = vpack.c.bf16 %v1434_v14, %v1429_v26  ;;  %v1489_v31 = vpack.c.bf16 %v1431_v44, %v1426_v58  ;;  %v1491_v16 = vpack.c.bf16 %v1433_v46, %v1428_v51  ;;  %v1279_v48 = vpop.permute.xlu0 %1278  ;;  %v3983_v58 = vld [vmem:[#allocation20_spill] sm:$0xff] }
 0x12e   : > { %v3592_v50 = vpack.c.bf16 %v1435_v55, %v1430_v53  ;;  %v656_v10 = vmul.f32 %v2865_v24, %v3339_v39  ;;  %v915_v2 = vadd.f32 %v3444_v57, %v3521_v36  ;;  %v1106_v14 = vmul.f32 %v2837_v12, %v3561_v23 }
 0x12f   : > { %1586 = vmatprep.subr.bf16.mxu0 %v1490_v11  ;;  %1659 = vmatprep.subr.bf16.mxu1 %v1492_v21  ;;  %v1108_v46 = vmul.f32 %v2849_v18, %v3561_v23  ;;  %v914_v39 = vadd.f32 %v3440_v41, %v3512_v28  ;;  %v1105_v11 = vmul.f32 %v2834_v7, %v3561_v23 }
 0x130   : > { %1587 = vmatpush1.bf16.msra.mxu0 %v1489_v31  ;;  %1660 = vmatpush1.bf16.msra.mxu1 %v1491_v16  ;;  %v1107_v57 = vmul.f32 %v2846_v17, %v3561_v23  ;;  %v3610_v52 = vadd.f32 %v1279_v48, %v1181_v6  ;;  %v3612_v21 = vadd.f32 %v1279_v48, %v1183_v4 }
 0x131   : > { %v716_v44 = vpop.permute.xlu1 %715  ;;  %v652_v20 = vmul.f32 %v2758_v0, %v524_v32  ;;  %v3616_v31 = vadd.f32 %v1279_v48, %v1180_v5  ;;  %v3618_v26 = vadd.f32 %v1279_v48, %v1182_v27  ;;  %v916_v41 = vadd.f32 %v3450_v47, %v3525_v15  ;;  %v3975_v0 = vld [vmem:[#allocation25_spill] sm:$0xff] }
 0x132   : > { %v843_v36 = vmul.f32 %v2705_v45, %v716_v44  ;;  %v925_v28 = vadd.f32 %v3470_v1, %v3541_v49  ;;  %v927_v23 = vadd.f32 %v3478_v59, %v656_v10  ;;  %v924_v4 = vadd.f32 %v3974_v3, %v3537_v38  ;;  %v3977_v38 = vld [vmem:[#allocation43_spill] sm:$0xff] }
 0x133   : > { %v1186_v61 = vadd.f32 %v1106_v14, %v915_v2  ;;  %v1188_v25 = vadd.f32 %v1108_v46, %v917_v56  ;;  %v926_v45 = vadd.f32 %v3975_v0, %v3559_v63  ;;  %v840_v37 = vmul.f32 %v3976_v13, %v716_v44  ;;  %v3979_v63 = vld [vmem:[#allocation29_spill] sm:$0xff] }
 0x134   : > { %v923_v5 = vadd.f32 %v843_v36, %v652_v20  ;;  %v1437_v35 = vmax.f32 %v3610_v52, 0.0  ;;  %v1185_v47 = vadd.f32 %v1105_v11, %v914_v39  ;;  %v1187_v15 = vadd.f32 %v1107_v57, %v916_v41  ;;  %v1294_v52 = vpop.permute.xlu0 %1293  ;;  %v3985_v36 = vld [vmem:[#allocation9_spill] sm:$0xff] }
 0x135   : > { %v1439_v1 = vmax.f32 %v3612_v21, 0.0  ;;  %v1436_v59 = vmax.f32 %v3616_v31, 0.0  ;;  %v1438_v49 = vmax.f32 %v3618_v26, 0.0  ;;  %v3635_v29 = vadd.f32 %v1279_v48, %v3977_v38 }
 0x136   : > { %v987_v62 = vpop.permute.xlu1 %986  ;;  %v648_v43 = vmul.f32 %v3978_v42, %v524_v32  ;;  %v649_v53 = vmul.f32 %v3979_v63, %v524_v32  ;;  %v842_v30 = vmul.f32 %v3980_v8, %v716_v44  ;;  %v650_v34 = vmul.f32 %v3982_v33, %v524_v32 }
 0x137   : > { %v1114_v40 = vmul.f32 %v3981_v9, %v987_v62  ;;  %v651_v60 = vmul.f32 %v2865_v24, %v524_v32  ;;  %v839_v51 = vmul.f32 %v3983_v58, %v716_v44  ;;  %v841_v55 = vmul.f32 %v3984_v22, %v716_v44 }
 0x138   : > { %v1111_v6 = vmul.f32 %v2837_v12, %v987_v62  ;;  %v1113_v54 = vmul.f32 %v2849_v18, %v987_v62  ;;  %v920_v16 = vadd.f32 %v840_v37, %v649_v53  ;;  %v1110_v24 = vmul.f32 %v2834_v7, %v987_v62  ;;  %v3986_v53 = vld [vmem:[#allocation44_spill] sm:$0xff] }
 0x139   : > { %v1194_v27 = vadd.f32 %v1114_v40, %v923_v5  ;;  %v1112_v32 = vmul.f32 %v2846_v17, %v987_v62  ;;  %v922_v46 = vadd.f32 %v842_v30, %v651_v60  ;;  %v919_v21 = vadd.f32 %v839_v51, %v648_v43 }
 0x13a   : > { %v991_v19 = vpop.permute.xlu1 %990  ;;  %v921_v20 = vadd.f32 %v841_v55, %v650_v34 }
 0x13b   : > { %v1115_v10 = vmul.f32 %v2834_v7, %v991_v19  ;;  %v1116_v2 = vmul.f32 %v2837_v12, %v991_v19  ;;  %v1117_v56 = vmul.f32 %v2846_v17, %v991_v19  ;;  %v1118_v48 = vmul.f32 %v2849_v18, %v991_v19 }
 0x13c   : > { %v1119_v14 = vmul.f32 %v3981_v9, %v991_v19  ;;  %v1440_v12 = vmax.f32 %v3635_v29, 0.0  ;;  %v1191_v18 = vadd.f32 %v1111_v6, %v920_v16  ;;  %v1193_v7 = vadd.f32 %v1113_v54, %v922_v46  ;;  %v3990_v46 = vld [vmem:[#allocation7_spill] sm:$0xff] }
 0x13d   : > { %v1196_v44 = vadd.f32 %v1116_v2, %v925_v28  ;;  %v1198_v39 = vadd.f32 %v1118_v48, %v927_v23  ;;  %v1195_v11 = vadd.f32 %v1115_v10, %v924_v4  ;;  %v1197_v57 = vadd.f32 %v1117_v56, %v926_v45  ;;  %v3987_v48 = vld [vmem:[#allocation38_spill] sm:$0xff] }
 0x13e   : > { %v1199_v31 = vadd.f32 %v1119_v14, %v3985_v36  ;;  %v1190_v28 = vadd.f32 %v1110_v24, %v919_v21  ;;  %v1192_v4 = vadd.f32 %v1112_v32, %v921_v20  ;;  %v3988_v24 = vmov 0   ;;  %v3989_v32 = vld [vmem:[#allocation8_spill] sm:$0xff] }
 0x13f   : > { %v1284_v26 = vpop.permute.xlu1 %1283  ;;  %v1372_v41 = vadd.f32 %v1294_v52, %v1196_v44  ;;  %v1374_v3 = vadd.f32 %v1294_v52, %v1198_v39  ;;  %v1371_v23 = vadd.f32 %v1294_v52, %v1195_v11  ;;  %v1373_v45 = vadd.f32 %v1294_v52, %v1197_v57  ;;  %v2458_v14 = vld [vmem:[%s3789_s5 + $0x8] sm:$0xff]   ;;  %v3991_v44 = vld [vmem:[#allocation17_spill] sm:$0xff] }
 0x140   : > { %v1362_v17 = vadd.f32 %v1284_v26, %v1186_v61  ;;  %v1364_v0 = vadd.f32 %v1284_v26, %v1188_v25  ;;  %v1361_v5 = vadd.f32 %v1284_v26, %v1185_v47  ;;  %v1363_v13 = vadd.f32 %v1284_v26, %v1187_v15  ;;  %v2459_v39 = vld [vmem:[%s3789_s5 + $0x10] sm:$0xff]   ;;  %v3992_v11 = vld [vmem:[#allocation27_spill] sm:$0xff]  ;;  %v2460_v57 = vld [vmem:[%s3789_s5 + $0x18] sm:$0xff]  }
 0x141   : > { %v1452_v43 = vmax.f32 %v1372_v41, 0.0  ;;  %v1454_v63 = vmax.f32 %v1374_v3, 0.0  ;;  %v1365_v8 = vadd.f32 %v1284_v26, %v3986_v53  ;;  %v1375_v30 = vadd.f32 %v1294_v52, %v1199_v31  ;;  %v3689_v52 = vpop.permute.xlu0 %1519 }
 0x142   : > { %v1442_v37 = vmax.f32 %v1362_v17, 0.0  ;;  %v1444_v62 = vmax.f32 %v1364_v0, 0.0  ;;  %v1441_v38 = vmax.f32 %v1361_v5, 0.0  ;;  %v1443_v42 = vmax.f32 %v1363_v13, 0.0 }
 0x143   : > { %v1289_v29 = vpop.permute.xlu1 %1288  ;;  %v1451_v60 = vmax.f32 %v1371_v23, 0.0  ;;  %v1453_v58 = vmax.f32 %v1373_v45, 0.0  ;;  %v1445_v51 = vmax.f32 %v1365_v8, 0.0 }
 0x144   : > { %v1495_v9 = vpack.c.bf16 %v1442_v37, %v1437_v35  ;;  %v1497_v40 = vpack.c.bf16 %v1444_v62, %v1439_v1  ;;  %v1494_v61 = vpack.c.bf16 %v1441_v38, %v1436_v59  ;;  %v1496_v25 = vpack.c.bf16 %v1443_v42, %v1438_v49 }
 0x145   : > { %v1367_v47 = vadd.f32 %v1289_v29, %v1191_v18  ;;  %v1369_v15 = vadd.f32 %v1289_v29, %v1193_v7  ;;  %v1366_v33 = vadd.f32 %v1289_v29, %v1190_v28  ;;  %v1368_v34 = vadd.f32 %v1289_v29, %v1192_v4 }
 0x146   : > { %1588 = vmatprep.subr.bf16.mxu0 %v1495_v9  ;;  %1661 = vmatprep.subr.bf16.mxu1 %v1497_v40  ;;  %v1370_v22 = vadd.f32 %v1289_v29, %v1194_v27  ;;  %v1498_v35 = vpack.c.bf16 %v1445_v51, %v1440_v12  ;;  %v1455_v59 = vmax.f32 %v1375_v30, 0.0  ;;  %v2457_v27 = vld [vmem:[%s3789_s5] sm:$0xff]  }
 0x147   : > { %1589 = vmatpush1.bf16.msra.mxu0 %v1494_v61  ;;  %1662 = vmatpush1.bf16.msra.mxu1 %v1496_v25  ;;  %v1447_v55 = vmax.f32 %v1367_v47, 0.0  ;;  %v1449_v6 = vmax.f32 %v1369_v15, 0.0  ;;  %v1446_v54 = vmax.f32 %v1366_v33, 0.0  ;;  %v1448_v19 = vmax.f32 %v1368_v34, 0.0  ;;  %v3691_v21 = vpop.permute.xlu1 %1514 }
 0x148   : > { %v1450_v1 = vmax.f32 %v1370_v22, 0.0 }
 0x149   : > { %v1500_v49 = vpack.c.bf16 %v1452_v43, %v1447_v55  ;;  %v1502_v16 = vpack.c.bf16 %v1454_v63, %v1449_v6  ;;  %v1499_v10 = vpack.c.bf16 %v1451_v60, %v1446_v54  ;;  %v1501_v2 = vpack.c.bf16 %v1453_v58, %v1448_v19  ;;  %v3701_v63 = vpop.permute.xlu0 %1529 }
 0x14a   : > { %v1503_v56 = vpack.c.bf16 %v1455_v59, %v1450_v1 }
 0x14b   : > { %1590 = vmatprep.subr.bf16.mxu0 %v1500_v49  ;;  %1663 = vmatprep.subr.bf16.mxu1 %v1502_v16  ;;  %v3703_v53 = vpop.permute.xlu1 %1524 }
 0x14c   : > { %1591 = vmatpush1.bf16.msra.mxu0 %v1499_v10  ;;  %1664 = vmatpush1.bf16.msra.mxu1 %v1501_v2 }
 0x14d   : > { %2372 = vmatprep.subr.bf16.mxu0 %v3987_v48 }
 0x14f   : > { %1609 = vmatmul.mubr.bf16.vlgmr.msra.gmra.mrb[0].mxu0 %v2457_v27  ;;  %1682 = vmatmul.mubr.bf16.vlgmr.msra.gmra.mrb[0].mxu1 %v2457_v27 }
 0x150   : > { %2373 = vmatpush3.bf16.msra.mxu0 %v3987_v48  ;;  %1618 = vmatprep.mubr.bf16.mxu0 %v3988_v24 }
 0x151   : > { %2374 = vmatprep.subr.bf16.mxu0 %v3989_v32  ;;  %1691 = vmatprep.mubr.bf16.mxu1 %v3988_v24 }
 0x154   : > { %2375 = vmatpush3.bf16.msra.mxu0 %v3989_v32  ;;  %v3713_v32 = vpop.permute.xlu0 %1539 }
 0x155   : > { %2376 = vmatprep.subr.bf16.mxu0 %v3990_v46 }
 0x157   : > { %1619 = vmatmul.mubr.bf16.gmra.mrb[4].mxu0 %v2458_v14  ;;  %1692 = vmatmul.mubr.bf16.gmra.mrb[4].mxu1 %v2458_v14 }
 0x158   : > { %2377 = vmatpush3.bf16.msra.mxu0 %v3990_v46  ;;  %1628 = vmatprep.mubr.bf16.mxu0 %v3988_v24 }
 0x159   : > { %2378 = vmatprep.subr.bf16.mxu0 %v3991_v44  ;;  %1701 = vmatprep.mubr.bf16.mxu1 %v3988_v24 }
 0x15c   : > { %2379 = vmatpush3.bf16.msra.mxu0 %v3991_v44 }
 0x15d   : > { %2380 = vmatprep.subr.bf16.mxu0 %v3992_v11 }
 0x15f   : > { %1629 = vmatmul.mubr.bf16.gmra.mrb[8].mxu0 %v2459_v39  ;;  %1702 = vmatmul.mubr.bf16.gmra.mrb[8].mxu1 %v2459_v39 }
 0x160   : > { %2381 = vmatpush3.bf16.msra.mxu0 %v3992_v11  ;;  %1638 = vmatprep.mubr.bf16.mxu0 %v3988_v24 }
 0x161   : > { %2382 = vmatprep.subr.bf16.mxu0 %v3592_v50  ;;  %1711 = vmatprep.mubr.bf16.mxu1 %v3988_v24 }
 0x164   : > { %2383 = vmatpush3.bf16.msra.mxu0 %v3592_v50 }
 0x165   : > { %2384 = vmatprep.subr.bf16.mxu0 %v1498_v35 }
 0x167   : > { %1639 = vmatmul.mubr.bf16.gmra.mrb[12].mxu0 %v2460_v57  ;;  %1712 = vmatmul.mubr.bf16.gmra.mrb[12].mxu1 %v2460_v57 }
 0x168   : > { %2385 = vmatpush3.bf16.msra.mxu0 %v1498_v35  ;;  %2388 = vmatprep.mubr.bf16.mxu0 %v2457_v27 }
 0x169   : > { %2386 = vmatprep.subr.bf16.mxu0 %v1503_v56  ;;  %1924 = vmatprep.mubr.bf16.mxu1 %v3988_v24 }
 0x16c   : > { %2387 = vmatpush3.bf16.msra.mxu0 %v1503_v56 }
 0x16f   : > { %2389 = vmatmul.mubr.bf16.vlgmr.msra.gmra.mrb[16].mxu0 %v2458_v14  ;;  %v3715_v14 = vpop.permute.xlu1 %1534 }
 0x170   : > { %2392 = vmatprep.mubr.bf16.mxu0 %v2459_v39 }
 0x177   : > { %2393 = vmatmul.mubr.bf16.gmra.mrb[20].mxu0 %v2460_v57 }
 0x178   : > { %1977 = vmatprep.mubr.bf16.mxu0 %v3988_v24 }
 0x222   : > { %v1610_v20 = vpop.f32.mrb[0].mxu0  ;;  %v1683_v50 = vpop.f32.mrb[0].mxu1 }
 0x223   : > { %v1611_v12 = vadd.f32 %v1610_v20, %v3691_v21  ;;  %v1684_v36 = vadd.f32 %v1683_v50, %v3691_v21  ;;  %v1612_v31 = vpop.f32.mrb[1].mxu0  ;;  %v1685_v26 = vpop.f32.mrb[1].mxu1 }
 0x224   : > { %v1613_v18 = vadd.f32 %v1612_v31, %v3691_v21  ;;  %v1686_v41 = vadd.f32 %v1685_v26, %v3691_v21  ;;  %v1614_v7 = vpop.f32.mrb[2].mxu0  ;;  %v1687_v3 = vpop.f32.mrb[2].mxu1 }
 0x225   : > { %v1615_v17 = vadd.f32 %v1614_v7, %v3689_v52  ;;  %v1688_v0 = vadd.f32 %v1687_v3, %v3689_v52  ;;  %v1616_v5 = vpop.f32.mrb[3].mxu0  ;;  %v1689_v13 = vpop.f32.mrb[3].mxu1  ;;  %v1787_v4 = vmax.f32 %v1611_v12, 0.0  ;;  %v1789_v45 = vmax.f32 %v1684_v36, 0.0 }
 0x226   : > { %v1617_v28 = vadd.f32 %v1616_v5, %v3689_v52  ;;  %v1690_v23 = vadd.f32 %v1689_v13, %v3689_v52  ;;  %v1788_v38 = vmax.f32 %v1613_v18, 0.0  ;;  %v1790_v42 = vmax.f32 %v1686_v41, 0.0 }
 0x227   : > { %v1792_v37 = vmax.f32 %v1615_v17, 0.0  ;;  %v1794_v62 = vmax.f32 %v1688_v0, 0.0 }
 0x228   : > { %v1793_v29 = vmax.f32 %v1617_v28, 0.0  ;;  %v1795_v43 = vmax.f32 %v1690_v23, 0.0 }
 0x229   : > { %v1831_v8 = vpack.c.bf16 %v1792_v37, %v1787_v4  ;;  %v1833_v30 = vpack.c.bf16 %v1794_v62, %v1789_v45 }
 0x22a   : > { %v1832_v9 = vpack.c.bf16 %v1793_v29, %v1788_v38  ;;  %v1834_v40 = vpack.c.bf16 %v1795_v43, %v1790_v42  ;;  %v1620_v61 = vpop.f32.mrb[4].mxu0  ;;  %v1693_v25 = vpop.f32.mrb[4].mxu1 }
 0x22b   : > { %v1621_v47 = vadd.f32 %v1620_v61, %v3703_v53  ;;  %v1694_v15 = vadd.f32 %v1693_v25, %v3703_v53  ;;  %v1622_v33 = vpop.f32.mrb[5].mxu0  ;;  %v1695_v34 = vpop.f32.mrb[5].mxu1 }
 0x22c   : > { %v1623_v60 = vadd.f32 %v1622_v33, %v3703_v53  ;;  %v1696_v58 = vadd.f32 %v1695_v34, %v3703_v53  ;;  %v1624_v51 = vpop.f32.mrb[6].mxu0  ;;  %v1697_v22 = vpop.f32.mrb[6].mxu1  ;;  %1892 = vmatprep.subr.bf16.mxu1 %v1832_v9  ;;  %1945 = vmatprep.subr.bf16.mxu0 %v1834_v40 }
 0x22d   : > { %v1625_v55 = vadd.f32 %v1624_v51, %v3701_v63  ;;  %v1698_v6 = vadd.f32 %v1697_v22, %v3701_v63  ;;  %v1626_v54 = vpop.f32.mrb[7].mxu0  ;;  %v1699_v19 = vpop.f32.mrb[7].mxu1  ;;  %1893 = vmatpush1.bf16.msra.mxu1 %v1831_v8  ;;  %1946 = vmatpush1.bf16.msra.mxu0 %v1833_v30  ;;  %v1797_v59 = vmax.f32 %v1621_v47, 0.0  ;;  %v1799_v49 = vmax.f32 %v1694_v15, 0.0 }
 0x22e   : > { %v1627_v35 = vadd.f32 %v1626_v54, %v3701_v63  ;;  %v1700_v1 = vadd.f32 %v1699_v19, %v3701_v63  ;;  %v1798_v2 = vmax.f32 %v1623_v60, 0.0  ;;  %v1800_v56 = vmax.f32 %v1696_v58, 0.0  ;;  %v3725_v43 = vpop.permute.xlu0 %1549  ;;  %v1545_v8 = vpop.permute.xlu1 %1544 }
 0x22f   : > { %v1802_v16 = vmax.f32 %v1625_v55, 0.0  ;;  %v1804_v10 = vmax.f32 %v1698_v6, 0.0 }
 0x230   : > { %v1803_v27 = vmax.f32 %v1627_v35, 0.0  ;;  %v1805_v48 = vmax.f32 %v1700_v1, 0.0 }
 0x231   : > { %v1836_v46 = vpack.c.bf16 %v1802_v16, %v1797_v59  ;;  %v1838_v44 = vpack.c.bf16 %v1804_v10, %v1799_v49 }
 0x232   : > { %v1837_v39 = vpack.c.bf16 %v1803_v27, %v1798_v2  ;;  %v1839_v11 = vpack.c.bf16 %v1805_v48, %v1800_v56  ;;  %v1630_v57 = vpop.f32.mrb[8].mxu0  ;;  %v1703_v20 = vpop.f32.mrb[8].mxu1 }
 0x233   : > { %v1631_v50 = vadd.f32 %v1630_v57, %v3715_v14  ;;  %v1704_v12 = vadd.f32 %v1703_v20, %v3715_v14  ;;  %v1632_v36 = vpop.f32.mrb[9].mxu0  ;;  %v1705_v31 = vpop.f32.mrb[9].mxu1 }
 0x234   : > { %v1633_v26 = vadd.f32 %v1632_v36, %v3715_v14  ;;  %v1706_v18 = vadd.f32 %v1705_v31, %v3715_v14  ;;  %v1634_v41 = vpop.f32.mrb[10].mxu0  ;;  %v1707_v7 = vpop.f32.mrb[10].mxu1  ;;  %1894 = vmatprep.subr.bf16.mxu1 %v1837_v39  ;;  %1947 = vmatprep.subr.bf16.mxu0 %v1839_v11 }
 0x235   : > { %v1635_v3 = vadd.f32 %v1634_v41, %v3713_v32  ;;  %v1708_v17 = vadd.f32 %v1707_v7, %v3713_v32  ;;  %v1636_v0 = vpop.f32.mrb[11].mxu0  ;;  %v1709_v5 = vpop.f32.mrb[11].mxu1  ;;  %1895 = vmatpush1.bf16.msra.mxu1 %v1836_v46  ;;  %1948 = vmatpush1.bf16.msra.mxu0 %v1838_v44  ;;  %v1807_v23 = vmax.f32 %v1631_v50, 0.0  ;;  %v1809_v4 = vmax.f32 %v1704_v12, 0.0 }
 0x236   : > { %v1637_v13 = vadd.f32 %v1636_v0, %v3713_v32  ;;  %v1710_v28 = vadd.f32 %v1709_v5, %v3713_v32  ;;  %v1808_v62 = vmax.f32 %v1633_v26, 0.0  ;;  %v1810_v38 = vmax.f32 %v1706_v18, 0.0  ;;  %v2461_v26 = vld [vmem:[%s3791_s7] sm:$0xff]  }
 0x237   : > { %v1812_v45 = vmax.f32 %v1635_v3, 0.0  ;;  %v1814_v37 = vmax.f32 %v1708_v17, 0.0 }
 0x238   : > { %v1813_v42 = vmax.f32 %v1637_v13, 0.0  ;;  %v1815_v29 = vmax.f32 %v1710_v28, 0.0 }
 0x239   : > { %v1841_v30 = vpack.c.bf16 %v1812_v45, %v1807_v23  ;;  %v1843_v9 = vpack.c.bf16 %v1814_v37, %v1809_v4  ;;  %v2462_v4 = vld [vmem:[%s3791_s7 + $0x8] sm:$0xff]  }
 0x23a   : > { %v1842_v40 = vpack.c.bf16 %v1813_v42, %v1808_v62  ;;  %v1844_v61 = vpack.c.bf16 %v1815_v29, %v1810_v38  ;;  %v1640_v25 = vpop.f32.mrb[12].mxu0  ;;  %v1713_v47 = vpop.f32.mrb[12].mxu1 }
 0x23b   : > { %v1641_v15 = vadd.f32 %v1640_v25, %v1545_v8  ;;  %v1714_v33 = vadd.f32 %v1713_v47, %v1545_v8  ;;  %v1642_v34 = vpop.f32.mrb[13].mxu0  ;;  %v1715_v60 = vpop.f32.mrb[13].mxu1 }
 0x23c   : > { %v1643_v58 = vadd.f32 %v1642_v34, %v1545_v8  ;;  %v1716_v51 = vadd.f32 %v1715_v60, %v1545_v8  ;;  %v1644_v22 = vpop.f32.mrb[14].mxu0  ;;  %v1717_v55 = vpop.f32.mrb[14].mxu1  ;;  %1896 = vmatprep.subr.bf16.mxu1 %v1842_v40  ;;  %1949 = vmatprep.subr.bf16.mxu0 %v1844_v61 }
 0x23d   : > { %v1645_v6 = vadd.f32 %v1644_v22, %v3725_v43  ;;  %v1718_v54 = vadd.f32 %v1717_v55, %v3725_v43  ;;  %v1646_v19 = vpop.f32.mrb[15].mxu0  ;;  %v1719_v35 = vpop.f32.mrb[15].mxu1  ;;  %1897 = vmatpush1.bf16.msra.mxu1 %v1841_v30  ;;  %1950 = vmatpush1.bf16.msra.mxu0 %v1843_v9  ;;  %v1817_v49 = vmax.f32 %v1641_v15, 0.0  ;;  %v1819_v16 = vmax.f32 %v1714_v33, 0.0 }
 0x23e   : > { %v1647_v1 = vadd.f32 %v1646_v19, %v3725_v43  ;;  %v1720_v59 = vadd.f32 %v1719_v35, %v3725_v43  ;;  %v1818_v56 = vmax.f32 %v1643_v58, 0.0  ;;  %v1820_v27 = vmax.f32 %v1716_v51, 0.0 }
 0x23f   : > { %v1822_v10 = vmax.f32 %v1645_v6, 0.0  ;;  %v1824_v2 = vmax.f32 %v1718_v54, 0.0 }
 0x240   : > { %v1823_v48 = vmax.f32 %v1647_v1, 0.0  ;;  %v1825_v46 = vmax.f32 %v1720_v59, 0.0 }
 0x241   : > { %v1846_v44 = vpack.c.bf16 %v1822_v10, %v1817_v49  ;;  %v1848_v39 = vpack.c.bf16 %v1824_v2, %v1819_v16 }
 0x242   : > { %v1847_v11 = vpack.c.bf16 %v1823_v48, %v1818_v56  ;;  %v1849_v57 = vpack.c.bf16 %v1825_v46, %v1820_v27  ;;  %v2390_v20 = vpop.f32.mrb[16].mxu0 }
 0x243   : > { %v1765_v50 = vadd.f32 %v2390_v20, %v3703_v53  ;;  %v1756_v12 = vpop.f32.mrb[17].mxu0 }
 0x244   : > { %v1757_v36 = vadd.f32 %v1756_v12, %v3691_v21  ;;  %v2391_v31 = vpop.f32.mrb[18].mxu0  ;;  %1898 = vmatprep.subr.bf16.mxu1 %v1847_v11  ;;  %1951 = vmatprep.subr.bf16.mxu0 %v1849_v57 }
 0x245   : > { %v1768_v18 = vadd.f32 %v2391_v31, %v3701_v63  ;;  %v1759_v41 = vpop.f32.mrb[19].mxu0  ;;  %1899 = vmatpush1.bf16.msra.mxu1 %v1846_v44  ;;  %1952 = vmatpush1.bf16.msra.mxu0 %v1848_v39  ;;  %v1801_v3 = vmax.f32 %v1765_v50, 0.0 }
 0x246   : > { %v1760_v7 = vadd.f32 %v1759_v41, %v3689_v52  ;;  %v1791_v17 = vmax.f32 %v1757_v36, 0.0 }
 0x247   : > { %v1806_v53 = vmax.f32 %v1768_v18, 0.0 }
 0x248   : > { %v1796_v0 = vmax.f32 %v1760_v7, 0.0  ;;  %2340 = vmatmul.mubr.msk.bf16.vlgmr.msra.gmra.mrb[16].mxu1 %vm1885_vm0, %v2461_v26  ;;  %2342 = vmatmul.mubr.msk.bf16.vlgmr.msra.gmra.mrb[24].mxu0 %vm1885_vm0, %v2461_v26 }
 0x249   : > { %v1840_v21 = vpack.c.bf16 %v1806_v53, %v1801_v3  ;;  %1934 = vmatprep.mubr.bf16.mxu1 %v3988_v24  ;;  %1987 = vmatprep.mubr.bf16.mxu0 %v3988_v24 }
 0x24a   : > { %v1835_v63 = vpack.c.bf16 %v1796_v0, %v1791_v17  ;;  %v2394_v5 = vpop.f32.mrb[20].mxu0 }
 0x24b   : > { %v1781_v13 = vadd.f32 %v2394_v5, %v1545_v8  ;;  %v1772_v28 = vpop.f32.mrb[21].mxu0 }
 0x24c   : > { %v1773_v23 = vadd.f32 %v1772_v28, %v3715_v14  ;;  %v2395_v52 = vpop.f32.mrb[22].mxu0  ;;  %2396 = vmatprep.subr.bf16.mxu1 %v1835_v63 }
 0x24d   : > { %v1784_v45 = vadd.f32 %v2395_v52, %v3725_v43  ;;  %v1775_v37 = vpop.f32.mrb[23].mxu0  ;;  %2397 = vmatpush3.bf16.msra.mxu1 %v1835_v63  ;;  %v1821_v38 = vmax.f32 %v1781_v13, 0.0  ;;  %v3756_v43 = vpop.permute.xlu1 %1857 }
 0x24e   : > { %v1776_v62 = vadd.f32 %v1775_v37, %v3713_v32  ;;  %2398 = vmatprep.subr.bf16.mxu1 %v1840_v21  ;;  %v1811_v29 = vmax.f32 %v1773_v23, 0.0  ;;  %v3754_v32 = vpop.permute.xlu0 %1862 }
 0x24f   : > { %v1826_v42 = vmax.f32 %v1784_v45, 0.0 }
 0x250   : > { %v1816_v8 = vmax.f32 %v1776_v62, 0.0  ;;  %2341 = vmatmul.mubr.msk.bf16.gmra.mrb[20].mxu1 %vm1885_vm0, %v2462_v4  ;;  %2343 = vmatmul.mubr.msk.bf16.gmra.mrb[28].mxu0 %vm1885_vm0, %v2462_v4 }
 0x251   : > { %v1850_v14 = vpack.c.bf16 %v1826_v42, %v1821_v38  ;;  %2399 = vmatpush3.bf16.msra.mxu1 %v1840_v21  ;;  %2404 = vmatprep.mubr.msk.bf16.mxu1 %vm1885_vm0, %v2461_v26  ;;  %v1868_v27 = vpop.permute.xlu1 %1867 }
 0x252   : > { %v1845_v30 = vpack.c.bf16 %v1816_v8, %v1811_v29  ;;  %2165 = vmatprep.mubr.bf16.mxu0 %v3988_v24  ;;  %v1873_v56 = vpop.permute.xlu0 %1872  ;;  %v2067_v29 = vld [vmem:[%s3793_s9] sm:$0x1] }
 0x254   : > { %2400 = vmatprep.subr.bf16.mxu1 %v1845_v30 }
 0x255   : > { %2401 = vmatpush3.bf16.msra.mxu1 %v1845_v30 }
 0x256   : > { %2402 = vmatprep.subr.bf16.mxu1 %v1850_v14 }
 0x259   : > { %2403 = vmatpush3.bf16.msra.mxu1 %v1850_v14  ;;  %v2474_v14 = vmov 0.0  }
 0x25c   : > { %2405 = vmatmul.mubr.msk.bf16.vlgmr.msra.gmra.mrb[24].mxu1 %vm1885_vm0, %v2462_v4 }
 0x25d   : > { %2124 = vmatprep.mubr.bf16.mxu1 %v3988_v24 }
 0x31b   : > { %v1926_v9 = vpop.f32.mrb[16].mxu1  ;;  %v1979_v40 = vpop.f32.mrb[24].mxu0 }
 0x31c   : > { %v1927_v61 = vadd.f32 %v1926_v9, %v3756_v43  ;;  %v1980_v25 = vadd.f32 %v1979_v40, %v3756_v43  ;;  %v1928_v47 = vpop.f32.mrb[17].mxu1  ;;  %v1981_v15 = vpop.f32.mrb[25].mxu0 }
 0x31d   : > { %v1929_v33 = vadd.f32 %v1928_v47, %v3756_v43  ;;  %v1982_v34 = vadd.f32 %v1981_v15, %v3756_v43  ;;  %v1930_v60 = vpop.f32.mrb[18].mxu1  ;;  %v1983_v58 = vpop.f32.mrb[26].mxu0 }
 0x31e   : > { %v1931_v24 = vadd.f32 %v1930_v60, %v3754_v32  ;;  %v1984_v51 = vadd.f32 %v1983_v58, %v3754_v32  ;;  %v1932_v22 = vpop.f32.mrb[19].mxu1  ;;  %v1985_v55 = vpop.f32.mrb[27].mxu0  ;;  %v2047_v19 = vmax.f32 %v1927_v61, 0.0  ;;  %v2049_v35 = vmax.f32 %v1980_v25, 0.0 }
 0x31f   : > { %v1933_v6 = vadd.f32 %v1932_v22, %v3754_v32  ;;  %v1986_v54 = vadd.f32 %v1985_v55, %v3754_v32  ;;  %v2048_v49 = vmax.f32 %v1929_v33, 0.0  ;;  %v2050_v16 = vmax.f32 %v1982_v34, 0.0  ;;  %v2082_v55 = vpop.permute.xlu1 %2081 }
 0x320   : > { %v2052_v1 = vmax.f32 %v1931_v24, 0.0  ;;  %v2054_v59 = vmax.f32 %v1984_v51, 0.0 }
 0x321   : > { %v2053_v10 = vmax.f32 %v1933_v6, 0.0  ;;  %v2055_v2 = vmax.f32 %v1986_v54, 0.0  ;;  %v3993_v54 = vld [vmem:[#allocation4_spill] sm:$0xff] }
 0x322   : > { %v2068_v48 = vpack.c.bf16 %v2052_v1, %v2047_v19  ;;  %v2070_v46 = vpack.c.bf16 %v2054_v59, %v2049_v35  ;;  %v2087_v19 = vrot.slane %v2082_v55, %v3993_v54 }
 0x323   : > { %v2069_v44 = vpack.c.bf16 %v2053_v10, %v2048_v49  ;;  %v2071_v39 = vpack.c.bf16 %v2055_v2, %v2050_v16  ;;  %v1936_v11 = vpop.f32.mrb[20].mxu1  ;;  %v1989_v57 = vpop.f32.mrb[28].mxu0  ;;  %v3994_v2 = vld [vmem:[#allocation3_spill] sm:$0xff] }
 0x324   : > { %v1937_v20 = vadd.f32 %v1936_v11, %v1868_v27  ;;  %v1990_v50 = vadd.f32 %v1989_v57, %v1868_v27  ;;  %v1938_v12 = vpop.f32.mrb[21].mxu1  ;;  %v1991_v36 = vpop.f32.mrb[29].mxu0 }
 0x325   : > { %v1939_v31 = vadd.f32 %v1938_v12, %v1868_v27  ;;  %v1992_v26 = vadd.f32 %v1991_v36, %v1868_v27  ;;  %v1940_v18 = vpop.f32.mrb[22].mxu1  ;;  %v1993_v41 = vpop.f32.mrb[30].mxu0  ;;  %2092 = vmatprep.subr.bf16.mxu1 %v2069_v44  ;;  %2133 = vmatprep.subr.bf16.mxu0 %v2071_v39 }
 0x326   : > { %v1941_v7 = vadd.f32 %v1940_v18, %v1873_v56  ;;  %v1994_v3 = vadd.f32 %v1993_v41, %v1873_v56  ;;  %v1942_v53 = vpop.f32.mrb[23].mxu1  ;;  %v1995_v17 = vpop.f32.mrb[31].mxu0  ;;  %2093 = vmatpush1.bf16.msra.mxu1 %v2068_v48  ;;  %2134 = vmatpush1.bf16.msra.mxu0 %v2070_v46  ;;  %v2057_v63 = vmax.f32 %v1937_v20, 0.0  ;;  %v2059_v5 = vmax.f32 %v1990_v50, 0.0 }
 0x327   : > { %v1943_v0 = vadd.f32 %v1942_v53, %v1873_v56  ;;  %v1996_v21 = vadd.f32 %v1995_v17, %v1873_v56  ;;  %v2058_v23 = vmax.f32 %v1939_v31, 0.0  ;;  %v2060_v52 = vmax.f32 %v1992_v26, 0.0 }
 0x328   : > { %v2062_v13 = vmax.f32 %v1941_v7, 0.0  ;;  %v2064_v28 = vmax.f32 %v1994_v3, 0.0  ;;  %v3995_v17 = vlaneseq }
 0x329   : > { %v2063_v4 = vmax.f32 %v1943_v0, 0.0  ;;  %v2065_v45 = vmax.f32 %v1996_v21, 0.0 }
 0x32a   : > { %v2073_v37 = vpack.c.bf16 %v2062_v13, %v2057_v63  ;;  %v2075_v62 = vpack.c.bf16 %v2064_v28, %v2059_v5  ;;  %vm2261_vm3 = vcmp.lt.s32.totalorder %v3995_v17, 640 }
 0x32b   : > { %v2074_v38 = vpack.c.bf16 %v2063_v4, %v2058_v23  ;;  %v2076_v42 = vpack.c.bf16 %v2065_v45, %v2060_v52 }
 0x32d   : > { %2094 = vmatprep.subr.bf16.mxu1 %v2074_v38  ;;  %2135 = vmatprep.subr.bf16.mxu0 %v2076_v42 }
 0x32e   : > { %2095 = vmatpush1.bf16.msra.mxu1 %v2073_v37  ;;  %2136 = vmatpush1.bf16.msra.mxu0 %v2075_v62 }
 0x32f   : > { %v2406_v8 = vpop.f32.mrb[24].mxu1  ;;  %2408 = vmatprep.subr.bf16.mxu1 %v2474_v14 }
 0x330   : > { %v2041_v30 = vadd.f32 %v2406_v8, %v1868_v27  ;;  %v2032_v9 = vpop.f32.mrb[25].mxu1 }
 0x331   : > { %v2033_v40 = vadd.f32 %v2032_v9, %v3756_v43  ;;  %v2407_v61 = vpop.f32.mrb[26].mxu1  ;;  %2346 = vmatmul.mubr.msk.bf16.vlgmr.msra.gmra.mrb[28].mxu1 %vm2088_vm1, %v2067_v29  ;;  %2347 = vmatmul.mubr.msk.bf16.vlgmr.msra.gmra.mrb[32].mxu0 %vm2088_vm1, %v2067_v29  ;;  %v2476_v43 = vmov 1966171168  }
 0x332   : > { %v2044_v25 = vadd.f32 %v2407_v61, %v1873_v56  ;;  %v2035_v47 = vpop.f32.mrb[27].mxu1  ;;  %2412 = vmatprep.mubr.msk.bf16.mxu1 %vm2475_vm2, %v2474_v14  ;;  %v2061_v33 = vmax.f32 %v2041_v30, 0.0  ;;  %v2222_v22 = vunpack.c.l.s4 %v2476_v43 }
 0x333   : > { %v2036_v15 = vadd.f32 %v2035_v47, %v3754_v32  ;;  %v2051_v60 = vmax.f32 %v2033_v40, 0.0 }
 0x334   : > { %v2066_v34 = vmax.f32 %v2044_v25, 0.0  ;;  %v2223_v6 = vunpack.c.0.s8 %v2222_v22 }
 0x335   : > { %v2056_v58 = vmax.f32 %v2036_v15, 0.0 }
 0x336   : > { %v2077_v24 = vpack.c.bf16 %v2066_v34, %v2061_v33  ;;  %v2226_v56 = vsub.s32 %v2223_v6, %v3994_v2 }
 0x337   : > { %v2072_v51 = vpack.c.bf16 %v2056_v58, %v2051_v60 }
 0x339   : > { %2409 = vmatpush3.bf16.msra.mxu1 %v2072_v51 }
 0x33a   : > { %2410 = vmatprep.subr.bf16.mxu1 %v2474_v14 }
 0x33d   : > { %2411 = vmatpush3.bf16.msra.mxu1 %v2077_v24 }
 0x340   : > { %2413 = vmatmul.mubr.msk.bf16.vlgmr.msra.gmra.mrb[32].mxu1 %vm2088_vm1, %v2067_v29 }
 0x404   : > { %v2126_v35 = vpop.f32.mrb[28].mxu1  ;;  %v2167_v1 = vpop.f32.mrb[32].mxu0 }
 0x405   : > { %v2127_v32 = vadd.f32 %v2126_v35, %v2087_v19  ;;  %v2168_v59 = vadd.f32 %v2167_v1, %v2087_v19  ;;  %v2128_v49 = vpop.f32.mrb[29].mxu1  ;;  %v2169_v16 = vpop.f32.mrb[33].mxu0 }
 0x406   : > { %v2129_v10 = vadd.f32 %v2128_v49, %v2087_v19  ;;  %v2170_v27 = vadd.f32 %v2169_v16, %v2087_v19  ;;  %v2130_v48 = vpop.f32.mrb[30].mxu1  ;;  %v2171_v46 = vpop.f32.mrb[34].mxu0 }
 0x407   : > { %v2131_v44 = vpop.f32.mrb[31].mxu1  ;;  %v2172_v39 = vpop.f32.mrb[35].mxu0 }
 0x408   : > { %v2219_v11 = vcombine.low %v2127_v32, %v2129_v10  ;;  %v2220_v57 = vcombine.low %v2168_v59, %v2170_v27 }
 0x40a   : > { %v2227_v20 = vrot.slane %v2219_v11, %v2226_v56  ;;  %v2234_v50 = vrot.slane %v2220_v57, %v2226_v56 }
 0x40c   : > { %v2242_v12 = vcombine.low %v2227_v20, %v2234_v50 }
 0x40e   : > { %v2249_v3 = vrot.slane %v2242_v12, %v2226_v56 }
 0x413   : > { %v2208_v36 = vpop.f32.mrb[32].mxu1 }
 0x414   : > { %v2209_v31 = vadd.f32 %v2208_v36, %v2087_v19  ;;  %v2414_v26 = vpop.f32.mrb[33].mxu1 }
 0x415   : > { %v2211_v18 = vpop.f32.mrb[34].mxu1 }
 0x416   : > { %v2241_v41 = vrot.slane %v2209_v31, %v2226_v56  ;;  %v2415_v7 = vpop.f32.mrb[35].mxu1 }
 0x418   : > { %v2256_v53 = vrot.slane %v2241_v41, %v2226_v56 }
 0x41a   : > { %v2257_v0 = vcombine.low %v2249_v3, %v2256_v53 }
 0x41c   : > { %2263 = vst.msk [vmem:[%s423_s25] sm:$0x1f] %vm2261_vm3, %v2257_v0 }
 0x41d PF: > { %s23_s19 = sadd.s32 1, %s2469_s19  }
 0x41e   : > { %p20_p4 = scmp.ge.s32.totalorder %s23_s19, 4  }
 0x420   :  { %22 = sbr.rel (!%p20_p4) target bundleno = 3 (0x3), region = 100 }

</bundles_post_ra>
